<compile_context>
chip_gen: v7x
topology: tpu7x:2x2x1
jax: 0.10.0
libtpu: 0.0.40
codegen_flags: <defaults>
</compile_context>

<pallas_src>
import functools

import jax
import jax.numpy as jnp
from jax import lax
from jax.experimental import pallas as pl
from jax.experimental.pallas import tpu as pltpu

ENC_DIM = 2048   # encoder output dim (projection head input)
HID_DIM = 512    # projection head hidden dim
PROJ_DIM = 128   # projection output dim
LANE = 128       # TPU lane width


def _round_up(x, m):
    return (x + m - 1) // m * m


def _moco_kernel(hw, t_hw, inv_hw, mask_tail,
                 x_ref, we_ref, be_ref, w1_ref, b1_ref, w2_ref, b2_ref,
                 h_ref, z_ref, acc_ref):
    """grid = (batch tiles, spatial tiles).  Spatial axis (last) is the reduction."""
    k = pl.program_id(1)

    @pl.when(k == 0)
    def _init():
        acc_ref[...] = jnp.zeros_like(acc_ref)

    base = k * t_hw
    n_full, rem = divmod(t_hw, LANE)

    def _masked(xj, lane0):
        # Mask the ragged spatial tail (only compiled in when HW % T_HW != 0).
        if not mask_tail:
            return xj
        lane = lax.broadcasted_iota(jnp.int32, xj.shape, 2)
        return jnp.where(base + lane0 + lane < hw, xj, 0.0)

    # Stage 1: lane-aligned 128-wide chunk adds into the f32 accumulator.
    # Pure VPU work, no per-step cross-lane reduce; hidden under the x DMA.
    for j in range(n_full):
        acc_ref[...] += _masked(x_ref[:, :, j * LANE:(j + 1) * LANE], j * LANE)
    if rem:
        acc_ref[:, :, :rem] += _masked(x_ref[:, :, n_full * LANE:], n_full * LANE)

    @pl.when(k == pl.num_programs(1) - 1)
    def _finish():
        # Stage 2: single cross-lane (XLU) reduce -> global average pool.
        pooled = jnp.sum(acc_ref[...], axis=-1) * inv_hw                   # [TB, C] f32

        # ---- synthetic encoder: GAP -> Linear(C, 2048) ----
        h = jnp.dot(pooled, we_ref[...],
                    preferred_element_type=jnp.float32) + be_ref[...]      # [TB, 2048]
        h_ref[...] = h.astype(h_ref.dtype)

        # ---- projection head: Linear(2048,512) -> ReLU -> Linear(512,128) ----
        a = jnp.maximum(jnp.dot(h, w1_ref[...],
                                preferred_element_type=jnp.float32) + b1_ref[...], 0.0)
        z = jnp.dot(a, w2_ref[...],
                    preferred_element_type=jnp.float32) + b2_ref[...]      # [TB, 128]
        z_ref[...] = z.astype(z_ref.dtype)


def _batch_tile(B):
    """Batch tile <= 128, multiple of 8 (or == B when B <= 8), preferring exact
    divisors of B (no batch padding) and nb >= 2 so v7x megacore sharding engages."""
    if B <= 8:
        return B
    half = _round_up((B + 1) // 2, 8)
    cap = min(128, half)
    cands = [t for t in range(8, cap + 1, 8) if B % t == 0]
    return max(cands) if cands else cap


def moco_forward(x, params):
    """x: [B, C, H, W] float32 (NCHW).  Returns (h [B, 2048] f32, z [B, 128] f32)."""
    we, be, w1, b1, w2, b2 = params
    B, C, H, W = x.shape
    HW = H * W
    x3 = x.reshape(B, C, HW)                     # contiguous reshape, no HBM copy

    # ---- batch tiling (TB <= 128; nb >= 2 when possible for v7x megacore) ----
    TB = _batch_tile(B)
    B_pad = _round_up(B, TB)
    if B_pad != B:                               # only for awkward batch sizes
        x3 = jnp.pad(x3, ((0, B_pad - B), (0, 0), (0, 0)))
    nb = B_pad // TB

    # ---- per-generation VMEM budget ----
    try:
        info = pltpu.get_tpu_info()
        vmem_cap = int(getattr(info, "vmem_capacity_bytes", 64 << 20))
    except Exception:
        vmem_cap = 64 << 20                      # conservative (v7x-sized) fallback
    vmem_cap = max(vmem_cap, 32 << 20)
    vmem_allow = (vmem_cap * 3) // 4             # ~96 MiB v5e/v6e, ~48 MiB v7x

    C_pad = _round_up(C, 8)                      # f32 sublane padding of the C dim
    w_bytes = 2 * 4 * (we.size + be.size + w1.size + b1.size + w2.size + b2.size)
    out_bytes = 2 * 4 * (TB * ENC_DIM + TB * PROJ_DIM)

    def vmem_need(t):
        x_bytes = 2 * TB * C_pad * t * 4         # double-buffered, sublane-padded
        acc_bytes = TB * C_pad * LANE * 4
        return x_bytes + acc_bytes + w_bytes + out_bytes + (2 << 20)

    # ---- spatial tiling: largest multiple-of-128 tile that fits the budget ----
    if HW <= LANE:
        T_HW = HW                                # block == full (tiny) spatial dim
    else:
        target = 8192 if vmem_allow >= (64 << 20) else 4096
        t = min(_round_up(HW, LANE), target)
        while t > LANE and vmem_need(t) > (vmem_allow * 85) // 100:
            t = max(LANE, _round_up(t // 2, LANE))
        T_HW = t
    nk = pl.cdiv(HW, T_HW)
    mask_tail = (HW % T_HW) != 0                 # ragged last spatial tile

    vmem_limit = int(max(32 << 20, min(vmem_allow, (vmem_need(T_HW) * 5) // 4)))

    def const(shape):
        # Constant index_map -> block stays VMEM resident across the grid.
        # (pipeline_mode=pl.Buffered(1) could halve weight VMEM; left at the
        #  default buffering since headroom is ample at this tile plan.)
        return pl.BlockSpec(shape, lambda i, k: tuple(0 for _ in shape))

    flops = (2 * B_pad * (C * ENC_DIM + ENC_DIM * HID_DIM + HID_DIM * PROJ_DIM)
             + B_pad * C * HW)
    bytes_accessed = 4 * (x3.size + we.size + be.size + w1.size + b1.size
                          + w2.size + b2.size + B_pad * (ENC_DIM + PROJ_DIM))

    kernel = functools.partial(_moco_kernel, HW, T_HW, 1.0 / HW, mask_tail)

    h, z = pl.pallas_call(
        kernel,
        out_shape=(jax.ShapeDtypeStruct((B_pad, ENC_DIM), jnp.float32),
                   jax.ShapeDtypeStruct((B_pad, PROJ_DIM), jnp.float32)),
        grid=(nb, nk),
        in_specs=[
            pl.BlockSpec((TB, C, T_HW), lambda i, k: (i, 0, k)),   # x tile (f32)
            const(we.shape),    # W_enc [C, 2048]   (VMEM resident)
            const(be.shape),    # b_enc [1, 2048]
            const(w1.shape),    # W1    [2048, 512]
            const(b1.shape),    # b1    [1, 512]
            const(w2.shape),    # W2    [512, 128]
            const(b2.shape),    # b2    [1, 128]
        ],
        out_specs=(pl.BlockSpec((TB, ENC_DIM), lambda i, k: (i, 0)),
                   pl.BlockSpec((TB, PROJ_DIM), lambda i, k: (i, 0))),
        scratch_shapes=[pltpu.VMEM((TB, C, LANE), jnp.float32)],   # pooling accumulator
        compiler_params=pltpu.CompilerParams(
            dimension_semantics=("parallel", "arbitrary"),
            vmem_limit_bytes=vmem_limit),
        cost_estimate=pl.CostEstimate(flops=int(flops), transcendentals=0,
                                      bytes_accessed=int(bytes_accessed)),
    )(x3, we, be, w1, b1, w2, b2)

    if B_pad != B:
        h, z = h[:B], z[:B]
    # NOTE: if downstream only consumes z (typical MoCo contrastive loss), the h
    # output / writeback could be dropped behind a flag; kept to match the module.
    return h, z


def init_params(key, in_channels):
    """Deterministic small-scale init of all weights (stored [in_dim, out_dim], f32)."""
    k = jax.random.split(key, 6)
    s = 0.02
    we = jax.random.normal(k[0], (in_channels, ENC_DIM), jnp.float32) * s
    be = jax.random.normal(k[1], (1, ENC_DIM), jnp.float32) * s
    w1 = jax.random.normal(k[2], (ENC_DIM, HID_DIM), jnp.float32) * s
    b1 = jax.random.normal(k[3], (1, HID_DIM), jnp.float32) * s
    w2 = jax.random.normal(k[4], (HID_DIM, PROJ_DIM), jnp.float32) * s
    b2 = jax.random.normal(k[5], (1, PROJ_DIM), jnp.float32) * s
    return we, be, w1, b1, w2, b2


def _reference(x, params):
    """Pure f32 JAX reference mirroring the PyTorch module (GAP encoder stand-in)."""
    we, be, w1, b1, w2, b2 = params
    B, C, _, _ = x.shape
    pooled = jnp.mean(x.reshape(B, C, -1), axis=-1)
    h = pooled @ we + be
    a = jnp.maximum(h @ w1 + b1, 0.0)
    z = a @ w2 + b2
    return h, z


if __name__ == "__main__":
    key = jax.random.PRNGKey(0)
    kx, kp = jax.random.split(key)

    B, C, H, W = 2, 4, 16, 16
    x = jax.random.normal(kx, (B, C, H, W), jnp.float32)
    params = init_params(kp, C)

    h, z = moco_forward(x, params)
    h = jax.block_until_ready(h)
    z = jax.block_until_ready(z)

    h_ref, z_ref = _reference(x, params)
    assert h.shape == (B, ENC_DIM) and z.shape == (B, PROJ_DIM)
    assert jnp.allclose(h, h_ref, atol=1e-2, rtol=1e-2)
    assert jnp.allclose(z, z_ref, atol=1e-2, rtol=1e-2)

    print("KERNEL_OK")
</pallas_src>

<mosaic_0001>
module attributes {stable_mosaic.version = 11 : i64} {
  func.func @_moco_kernel(%arg0: i32, %arg1: i32, %arg2: memref<2x4x256xf32, #tpu.memory_space<vmem>>, %arg3: memref<4x2048xf32, #tpu.memory_space<vmem>>, %arg4: memref<1x2048xf32, #tpu.memory_space<vmem>>, %arg5: memref<2048x512xf32, #tpu.memory_space<vmem>>, %arg6: memref<1x512xf32, #tpu.memory_space<vmem>>, %arg7: memref<512x128xf32, #tpu.memory_space<vmem>>, %arg8: memref<1x128xf32, #tpu.memory_space<vmem>>, %arg9: memref<2x2048xf32, #tpu.memory_space<vmem>>, %arg10: memref<2x128xf32, #tpu.memory_space<vmem>>, %arg11: memref<2x4x128xf32, #tpu.memory_space<vmem>>) attributes {dimension_semantics = [#tpu.dimension_semantics<parallel>, #tpu.dimension_semantics<arbitrary>], iteration_bounds = array<i64: 1, 1>, scalar_prefetch = 0 : i64, scratch_operands = 1 : i64, tpu.core_type = #tpu.core_type<tc>, window_params = [{transform_indices = @transform_0, window_bounds = array<i64: 2, 4, 256>}, {pipeline_mode = #tpu.pipeline_mode<synchronous>, transform_indices = @transform_1, window_bounds = array<i64: 4, 2048>}, {pipeline_mode = #tpu.pipeline_mode<synchronous>, transform_indices = @transform_2, window_bounds = array<i64: 1, 2048>}, {pipeline_mode = #tpu.pipeline_mode<synchronous>, transform_indices = @transform_3, window_bounds = array<i64: 2048, 512>}, {pipeline_mode = #tpu.pipeline_mode<synchronous>, transform_indices = @transform_4, window_bounds = array<i64: 1, 512>}, {pipeline_mode = #tpu.pipeline_mode<synchronous>, transform_indices = @transform_5, window_bounds = array<i64: 512, 128>}, {pipeline_mode = #tpu.pipeline_mode<synchronous>, transform_indices = @transform_6, window_bounds = array<i64: 1, 128>}, {transform_indices = @transform_7, window_bounds = array<i64: 2, 2048>}, {transform_indices = @transform_8, window_bounds = array<i64: 2, 128>}]} {
    %c0_i32 = arith.constant 0 : i32
    %0 = arith.cmpi eq, %arg1, %c0_i32 : i32
    %1 = arith.extui %0 : i1 to i32
    %c0_i32_0 = arith.constant 0 : i32
    %2 = arith.cmpi ne, %1, %c0_i32_0 : i32
    scf.if %2 {
      %cst = arith.constant 0.000000e+00 : f32
      %14 = vector.broadcast %cst : f32 to vector<2x4x128xf32>
      %c0_19 = arith.constant 0 : index
      %c0_20 = arith.constant 0 : index
      %c0_21 = arith.constant 0 : index
      %15 = vector.load %arg11[%c0_19, %c0_20, %c0_21] : memref<2x4x128xf32, #tpu.memory_space<vmem>>, vector<2x4x128xf32>
      tpu.vector_store %arg11[%c0_19, %c0_20, %c0_21], %14 {strides = array<i32>} : memref<2x4x128xf32, #tpu.memory_space<vmem>>, vector<2x4x128xf32>,
    } else {
    }
    %c0 = arith.constant 0 : index
    %c0_1 = arith.constant 0 : index
    %c0_2 = arith.constant 0 : index
    %3 = vector.load %arg11[%c0, %c0_1, %c0_2] : memref<2x4x128xf32, #tpu.memory_space<vmem>>, vector<2x4x128xf32>
    %c0_3 = arith.constant 0 : index
    %c0_4 = arith.constant 0 : index
    %c0_5 = arith.constant 0 : index
    %4 = vector.load %arg2[%c0_3, %c0_4, %c0_5] : memref<2x4x256xf32, #tpu.memory_space<vmem>>, vector<2x4x128xf32>
    %5 = arith.addf %3, %4 : vector<2x4x128xf32>
    %c0_6 = arith.constant 0 : index
    %c0_7 = arith.constant 0 : index
    %c0_8 = arith.constant 0 : index
    %6 = vector.load %arg11[%c0_6, %c0_7, %c0_8] : memref<2x4x128xf32, #tpu.memory_space<vmem>>, vector<2x4x128xf32>
    tpu.vector_store %arg11[%c0_6, %c0_7, %c0_8], %5 {strides = array<i32>} : memref<2x4x128xf32, #tpu.memory_space<vmem>>, vector<2x4x128xf32>,
    %c0_9 = arith.constant 0 : index
    %c0_10 = arith.constant 0 : index
    %c0_11 = arith.constant 0 : index
    %7 = vector.load %arg11[%c0_9, %c0_10, %c0_11] : memref<2x4x128xf32, #tpu.memory_space<vmem>>, vector<2x4x128xf32>
    %c0_12 = arith.constant 0 : index
    %c0_13 = arith.constant 0 : index
    %c128 = arith.constant 128 : index
    %8 = vector.load %arg2[%c0_12, %c0_13, %c128] : memref<2x4x256xf32, #tpu.memory_space<vmem>>, vector<2x4x128xf32>
    %9 = arith.addf %7, %8 : vector<2x4x128xf32>
    %c0_14 = arith.constant 0 : index
    %c0_15 = arith.constant 0 : index
    %c0_16 = arith.constant 0 : index
    %10 = vector.load %arg11[%c0_14, %c0_15, %c0_16] : memref<2x4x128xf32, #tpu.memory_space<vmem>>, vector<2x4x128xf32>
    tpu.vector_store %arg11[%c0_14, %c0_15, %c0_16], %9 {strides = array<i32>} : memref<2x4x128xf32, #tpu.memory_space<vmem>>, vector<2x4x128xf32>,
    %c0_i32_17 = arith.constant 0 : i32
    %11 = arith.cmpi eq, %arg1, %c0_i32_17 : i32
    %12 = arith.extui %11 : i1 to i32
    %c0_i32_18 = arith.constant 0 : i32
    %13 = arith.cmpi ne, %12, %c0_i32_18 : i32
    scf.if %13 {
      %c0_19 = arith.constant 0 : index
      %c0_20 = arith.constant 0 : index
      %c0_21 = arith.constant 0 : index
      %14 = vector.load %arg11[%c0_19, %c0_20, %c0_21] : memref<2x4x128xf32, #tpu.memory_space<vmem>>, vector<2x4x128xf32>
      %cst = arith.constant dense<0.000000e+00> : vector<2x4xf32>
      %15 = vector.multi_reduction <add>, %14, %cst [2] : vector<2x4x128xf32> to vector<2x4xf32>
      %cst_22 = arith.constant 3.906250e-03 : f32
      %16 = vector.broadcast %cst_22 : f32 to vector<2x4xf32>
      %17 = arith.mulf %15, %16 : vector<2x4xf32>
      %c0_23 = arith.constant 0 : index
      %c0_24 = arith.constant 0 : index
      %18 = vector.load %arg3[%c0_23, %c0_24] : memref<4x2048xf32, #tpu.memory_space<vmem>>, vector<4x2048xf32>
      %cst_25 = arith.constant dense<0.000000e+00> : vector<2x2048xf32>
      %19 = tpu.matmul %17, %18, %cst_25 {dimension_numbers = #tpu.dot_dimension_numbers<[1], [0], [0], [1], [0, 0, 1, 1], [], []>} : vector<2x4xf32>, vector<4x2048xf32>, vector<2x2048xf32> -> vector<2x2048xf32>
      %c0_26 = arith.constant 0 : index
      %c0_27 = arith.constant 0 : index
      %20 = vector.load %arg4[%c0_26, %c0_27] : memref<1x2048xf32, #tpu.memory_space<vmem>>, vector<1x2048xf32>
      %21 = vector.broadcast %20 : vector<1x2048xf32> to vector<2x2048xf32>
      %22 = arith.addf %19, %21 : vector<2x2048xf32>
      %c0_28 = arith.constant 0 : index
      %c0_29 = arith.constant 0 : index
      %23 = vector.load %arg9[%c0_28, %c0_29] : memref<2x2048xf32, #tpu.memory_space<vmem>>, vector<2x2048xf32>
      tpu.vector_store %arg9[%c0_28, %c0_29], %22 {strides = array<i32>} : memref<2x2048xf32, #tpu.memory_space<vmem>>, vector<2x2048xf32>,
      %c0_30 = arith.constant 0 : index
      %c0_31 = arith.constant 0 : index
      %24 = vector.load %arg5[%c0_30, %c0_31] : memref<2048x512xf32, #tpu.memory_space<vmem>>, vector<2048x512xf32>
      %cst_32 = arith.constant dense<0.000000e+00> : vector<2x512xf32>
      %25 = tpu.matmul %22, %24, %cst_32 {dimension_numbers = #tpu.dot_dimension_numbers<[1], [0], [0], [1], [0, 0, 1, 1], [], []>} : vector<2x2048xf32>, vector<2048x512xf32>, vector<2x512xf32> -> vector<2x512xf32>
      %c0_33 = arith.constant 0 : index
      %c0_34 = arith.constant 0 : index
      %26 = vector.load %arg6[%c0_33, %c0_34] : memref<1x512xf32, #tpu.memory_space<vmem>>, vector<1x512xf32>
      %27 = vector.broadcast %26 : vector<1x512xf32> to vector<2x512xf32>
      %28 = arith.addf %25, %27 : vector<2x512xf32>
      %cst_35 = arith.constant 0.000000e+00 : f32
      %29 = vector.broadcast %cst_35 : f32 to vector<2x512xf32>
      %30 = arith.maximumf %28, %29 : vector<2x512xf32>
      %c0_36 = arith.constant 0 : index
      %c0_37 = arith.constant 0 : index
      %31 = vector.load %arg7[%c0_36, %c0_37] : memref<512x128xf32, #tpu.memory_space<vmem>>, vector<512x128xf32>
      %cst_38 = arith.constant dense<0.000000e+00> : vector<2x128xf32>
      %32 = tpu.matmul %30, %31, %cst_38 {dimension_numbers = #tpu.dot_dimension_numbers<[1], [0], [0], [1], [0, 0, 1, 1], [], []>} : vector<2x512xf32>, vector<512x128xf32>, vector<2x128xf32> -> vector<2x128xf32>
      %c0_39 = arith.constant 0 : index
      %c0_40 = arith.constant 0 : index
      %33 = vector.load %arg8[%c0_39, %c0_40] : memref<1x128xf32, #tpu.memory_space<vmem>>, vector<1x128xf32>
      %34 = vector.broadcast %33 : vector<1x128xf32> to vector<2x128xf32>
      %35 = arith.addf %32, %34 : vector<2x128xf32>
      %c0_41 = arith.constant 0 : index
      %c0_42 = arith.constant 0 : index
      %36 = vector.load %arg10[%c0_41, %c0_42] : memref<2x128xf32, #tpu.memory_space<vmem>>, vector<2x128xf32>
      tpu.vector_store %arg10[%c0_41, %c0_42], %35 {strides = array<i32>} : memref<2x128xf32, #tpu.memory_space<vmem>>, vector<2x128xf32>,
    } else {
    }
    return
  }
  func.func @transform_0(%arg0: i32, %arg1: i32) -> (i32, i32, i32) {
    %c0_i32 = arith.constant 0 : i32
    %c0_i32_0 = arith.constant 0 : i32
    return %arg0, %c0_i32, %arg1 : i32, i32, i32
  }
  func.func @transform_1(%arg0: i32, %arg1: i32) -> (i32, i32) {
    %c0_i32 = arith.constant 0 : i32
    %c0_i32_0 = arith.constant 0 : i32
    %c0_i32_1 = arith.constant 0 : i32
    return %c0_i32, %c0_i32_0 : i32, i32
  }
  func.func @transform_2(%arg0: i32, %arg1: i32) -> (i32, i32) {
    %c0_i32 = arith.constant 0 : i32
    %c0_i32_0 = arith.constant 0 : i32
    %c0_i32_1 = arith.constant 0 : i32
    return %c0_i32, %c0_i32_0 : i32, i32
  }
  func.func @transform_3(%arg0: i32, %arg1: i32) -> (i32, i32) {
    %c0_i32 = arith.constant 0 : i32
    %c0_i32_0 = arith.constant 0 : i32
    %c0_i32_1 = arith.constant 0 : i32
    return %c0_i32, %c0_i32_0 : i32, i32
  }
  func.func @transform_4(%arg0: i32, %arg1: i32) -> (i32, i32) {
    %c0_i32 = arith.constant 0 : i32
    %c0_i32_0 = arith.constant 0 : i32
    %c0_i32_1 = arith.constant 0 : i32
    return %c0_i32, %c0_i32_0 : i32, i32
  }
  func.func @transform_5(%arg0: i32, %arg1: i32) -> (i32, i32) {
    %c0_i32 = arith.constant 0 : i32
    %c0_i32_0 = arith.constant 0 : i32
    %c0_i32_1 = arith.constant 0 : i32
    return %c0_i32, %c0_i32_0 : i32, i32
  }
  func.func @transform_6(%arg0: i32, %arg1: i32) -> (i32, i32) {
    %c0_i32 = arith.constant 0 : i32
    %c0_i32_0 = arith.constant 0 : i32
    %c0_i32_1 = arith.constant 0 : i32
    return %c0_i32, %c0_i32_0 : i32, i32
  }
  func.func @transform_7(%arg0: i32, %arg1: i32) -> (i32, i32) {
    %c0_i32 = arith.constant 0 : i32
    %c0_i32_0 = arith.constant 0 : i32
    return %arg0, %c0_i32 : i32, i32
  }
  func.func @transform_8(%arg0: i32, %arg1: i32) -> (i32, i32) {
    %c0_i32 = arith.constant 0 : i32
    %c0_i32_0 = arith.constant 0 : i32
    return %arg0, %c0_i32 : i32, i32
  }
}

</mosaic_0001>

<bundles_post_ra>
// kernel: tpu_custom_call.1
= control target key start
LH: loop header
LB: loop body
LE: loop exit
PB: predicated region body
PF: predicated region fallthrough
CT: control target
= control target key end

     0   :  { %14 = vsyncpa [#allocation4], 0  ;;  %s5244_s0 = inlined_call_operand.hbm [shape: f32[2,4,256], index: 0, kind: input, shape index: {}]   ;;  %s5245_s1 = inlined_call_operand.hbm [shape: f32[4,2048], index: 1, kind: input, shape index: {}]   ;;  %s5246_s2 = inlined_call_operand.hbm [shape: f32[1,2048], index: 2, kind: input, shape index: {}]   ;;  %s5247_s3 = inlined_call_operand.hbm [shape: f32[2048,512], index: 3, kind: input, shape index: {}]   ;;  %s5248_s4 = inlined_call_operand.hbm [shape: f32[1,512], index: 4, kind: input, shape index: {}]   ;;  %s5249_s5 = inlined_call_operand.hbm [shape: f32[512,128], index: 5, kind: input, shape index: {}]   ;;  %s5250_s6 = inlined_call_operand.hbm [shape: f32[1,128], index: 6, kind: input, shape index: {}]   ;;  %s5251_s7 = inlined_call_operand.hbm [shape: f32[2,2048], index: 7, kind: output, shape index: {0}]   ;;  %s5252_s8 = inlined_call_operand.hbm [shape: f32[2,128], index: 8, kind: output, shape index: {1}]  }
   0x1   :  { %15 = vsyncpa [#allocation7], 0 }
   0x2   :  { %16 = vsyncpa [#allocation10], 0 }
   0x3   :  { %17 = vsyncpa [#allocation13], 0 }
   0x4   :  { %18 = vsyncpa [#allocation5], 0 }
   0x5   :  { %19 = vsyncpa [#allocation17], 0  ;;  %s4848_s27 = smov [#allocation6]   ;;  %s4849_s29 = smov [#allocation9]  }
   0x6   :  { %s38_s28 = sshll.u32 %s4848_s27, 4  ;;  %s57_s30 = sshll.u32 %s4849_s29, 4  ;;  %s39_s28 = int_to_ptr.vmem [resolvable:$true] %s38_s28  ;;  %s4908_s30 = int_to_ptr.vmem [resolvable:$true] %s57_s30 }
   0x7   :  { %s4638_s11 = scalar_lea.hbm %s5245_s1, 1024 }
   0x8   :  { %p4639_p0 = scmp.ne.s32.totalorder %s5245_s1, %s4638_s11  ;;  %p4642_p1 = scmp.lt.u32.totalorder %s4638_s11, %s5245_s1 }
   0xa   :  { %p4644_p2 = pnand %p4642_p1, %p4639_p0 }
   0xc   :  { %4647 = shalt.err (!%p4644_p2)
}
   0xd   :  { %s4648_s16 = scalar_lea.vmem %s39_s28, 1024  ;;  %p4653_p4 = scmp.lt.s32.totalorder %s39_s28, %s39_s28 }
   0xe   :  { %p4649_p3 = scmp.ne.s32.totalorder %s39_s28, %s4648_s16  ;;  %p4654_p5 = scmp.lt.s32.totalorder %s4648_s16, %s4648_s16 }
  0x10   :  { %p4655_p6 = por %p4654_p5, %p4653_p4 }
  0x12   :  { %p4656_p7 = pnand %p4655_p6, %p4649_p3 }
  0x14   :  { %4659 = shalt.err (!%p4656_p7)
}
  0x15   :  { %41 = dma.hbm_to_vmem [thread:$0]  %s5245_s1, 1024, %s39_s28, [#allocation7]  }
  0x16   :  { %s4660_s21 = scalar_lea.hbm %s5247_s3, 131072 }
  0x17   :  { %p4661_p8 = scmp.ne.s32.totalorder %s5247_s3, %s4660_s21  ;;  %p4664_p9 = scmp.lt.u32.totalorder %s4660_s21, %s5247_s3 }
  0x19   :  { %p4666_p10 = pnand %p4664_p9, %p4661_p8 }
  0x1b   :  { %4669 = shalt.err (!%p4666_p10)
}
  0x1c   :  { %s4670_s26 = scalar_lea.vmem %s4908_s30, 131072  ;;  %p4675_p12 = scmp.lt.s32.totalorder %s4908_s30, %s4908_s30 }
  0x1d   :  { %p4671_p11 = scmp.ne.s32.totalorder %s4908_s30, %s4670_s26  ;;  %p4676_p13 = scmp.lt.s32.totalorder %s4670_s26, %s4670_s26 }
  0x1f   :  { %p4677_p0 = por %p4676_p13, %p4675_p12 }
  0x21   :  { %p4678_p1 = pnand %p4677_p0, %p4671_p11 }
  0x23   :  { %4681 = shalt.err (!%p4678_p1)
}
  0x24   :  { %s4850_s1 = smov 512   ;;  %s4851_s27 = smov 32  }
  0x25   :  { %63 = dma.hbm_to_vmem [thread:$0]  %s5247_s3, 131072, %s4908_s30, [#allocation10], %s4850_s1, %s4850_s1, %s4851_s27  }
  0x26   :  { %s4852_s9 = smov [#allocation12]   ;;  %s4853_s11 = smov [#allocation3]  }
  0x27   :  { %s79_s10 = sshll.u32 %s4852_s9, 4  ;;  %s25_s12 = sshll.u32 %s4853_s11, 4  ;;  %s80_s10 = int_to_ptr.vmem [resolvable:$true] %s79_s10  ;;  %s4939_s12 = int_to_ptr.vmem [resolvable:$true] %s25_s12 }
  0x28   :  { %s4682_s15 = scalar_lea.hbm %s5249_s5, 8192 }
  0x29   :  { %p4683_p2 = scmp.ne.s32.totalorder %s5249_s5, %s4682_s15  ;;  %p4686_p3 = scmp.lt.u32.totalorder %s4682_s15, %s5249_s5 }
  0x2b   :  { %p4688_p4 = pnand %p4686_p3, %p4683_p2 }
  0x2d   :  { %4691 = shalt.err (!%p4688_p4)
}
  0x2e   :  { %s4692_s3 = scalar_lea.vmem %s80_s10, 8192  ;;  %p4697_p6 = scmp.lt.s32.totalorder %s80_s10, %s80_s10 }
  0x2f   :  { %p4693_p5 = scmp.ne.s32.totalorder %s80_s10, %s4692_s3  ;;  %p4698_p7 = scmp.lt.s32.totalorder %s4692_s3, %s4692_s3 }
  0x31   :  { %p4699_p8 = por %p4698_p7, %p4697_p6 }
  0x33   :  { %p4700_p9 = pnand %p4699_p8, %p4693_p5 }
  0x35   :  { %4703 = shalt.err (!%p4700_p9)
}
  0x36   :  { %s4854_s30 = smov 128   ;;  %s4855_s20 = smov 8  }
  0x37   :  { %85 = dma.hbm_to_vmem [thread:$0]  %s5249_s5, 8192, %s80_s10, [#allocation13], %s4854_s30, %s4854_s30, %s4855_s20  }
  0x38   :  { %s4704_s25 = scalar_lea.hbm %s5244_s0, 256 }
  0x39   :  { %p4705_p10 = scmp.ne.s32.totalorder %s5244_s0, %s4704_s25  ;;  %p4708_p11 = scmp.lt.u32.totalorder %s4704_s25, %s5244_s0 }
  0x3b   :  { %p4710_p12 = pnand %p4708_p11, %p4705_p10 }
  0x3d   :  { %4713 = shalt.err (!%p4710_p12)
}
  0x3e   :  { %s4714_s29 = scalar_lea.vmem %s4939_s12, 256  ;;  %p4719_p0 = scmp.lt.s32.totalorder %s4939_s12, %s4939_s12 }
  0x3f   :  { %p4715_p13 = scmp.ne.s32.totalorder %s4939_s12, %s4714_s29  ;;  %p4720_p1 = scmp.lt.s32.totalorder %s4714_s29, %s4714_s29 }
  0x41   :  { %p4721_p2 = por %p4720_p1, %p4719_p0 }
  0x43   :  { %p4722_p3 = pnand %p4721_p2, %p4715_p13 }
  0x45   :  { %4725 = shalt.err (!%p4722_p3)
}
  0x46   :  { %31 = dma.hbm_to_vmem [thread:$0]  %s5244_s0, 256, %s4939_s12, [#allocation4], %s4854_s30, %s4854_s30, %s4855_s20  }
  0x47   :  { %s4856_s10 = smov [#allocation8]   ;;  %s4857_s13 = smov [#allocation11]  }
  0x48   :  { %s48_s11 = sshll.u32 %s4856_s10, 4  ;;  %s70_s14 = sshll.u32 %s4857_s13, 4  ;;  %s49_s11 = int_to_ptr.vmem [resolvable:$true] %s48_s11  ;;  %s71_s14 = int_to_ptr.vmem [resolvable:$true] %s70_s14 }
  0x49   :  { %s4726_s17 = scalar_lea.hbm %s5246_s2, 256 }
  0x4a   :  { %p4727_p4 = scmp.ne.s32.totalorder %s5246_s2, %s4726_s17  ;;  %p4730_p5 = scmp.lt.u32.totalorder %s4726_s17, %s5246_s2 }
  0x4c   :  { %p4732_p6 = pnand %p4730_p5, %p4727_p4 }
  0x4e   :  { %4735 = shalt.err (!%p4732_p6)
}
  0x4f   :  { %s4736_s0 = scalar_lea.vmem %s49_s11, 256  ;;  %p4741_p8 = scmp.lt.s32.totalorder %s49_s11, %s49_s11 }
  0x50   :  { %p4737_p7 = scmp.ne.s32.totalorder %s49_s11, %s4736_s0  ;;  %p4742_p9 = scmp.lt.s32.totalorder %s4736_s0, %s4736_s0 }
  0x52   :  { %p4743_p10 = por %p4742_p9, %p4741_p8 }
  0x54   :  { %p4744_p11 = pnand %p4743_p10, %p4737_p7 }
  0x56   :  { %4747 = shalt.err (!%p4744_p11)
}
  0x57   :  { %51 = dma.hbm_to_vmem [thread:$0]  %s5246_s2, 256, %s49_s11, [#allocation7]  }
  0x58   :  { %s4748_s23 = scalar_lea.hbm %s5248_s4, 64 }
  0x59   :  { %p4749_p12 = scmp.ne.s32.totalorder %s5248_s4, %s4748_s23  ;;  %p4752_p13 = scmp.lt.u32.totalorder %s4748_s23, %s5248_s4 }
  0x5b   :  { %p4754_p0 = pnand %p4752_p13, %p4749_p12 }
  0x5d   :  { %4757 = shalt.err (!%p4754_p0)
}
  0x5e   :  { %s4758_s27 = scalar_lea.vmem %s71_s14, 64  ;;  %p4763_p2 = scmp.lt.s32.totalorder %s71_s14, %s71_s14 }
  0x5f   :  { %p4759_p1 = scmp.ne.s32.totalorder %s71_s14, %s4758_s27  ;;  %p4764_p3 = scmp.lt.s32.totalorder %s4758_s27, %s4758_s27 }
  0x61   :  { %p4765_p4 = por %p4764_p3, %p4763_p2 }
  0x63   :  { %p4766_p5 = pnand %p4765_p4, %p4759_p1 }
  0x65   :  { %4769 = shalt.err (!%p4766_p5)
}
  0x66   :  { %73 = dma.hbm_to_vmem [thread:$0]  %s5248_s4, 64, %s71_s14, [#allocation10]  }
  0x67   :  { %s4858_s29 = smov [#allocation14]   ;;  %s4770_s11 = scalar_lea.hbm %s5250_s6, 16 }
  0x68   :  { %s92_s5 = sshll.u32 %s4858_s29, 4  ;;  %p4771_p6 = scmp.ne.s32.totalorder %s5250_s6, %s4770_s11  ;;  %s93_s5 = int_to_ptr.vmem [resolvable:$true] %s92_s5 }
  0x69   :  { %p4774_p7 = scmp.lt.u32.totalorder %s4770_s11, %s5250_s6 }
  0x6b   :  { %p4776_p8 = pnand %p4774_p7, %p4771_p6 }
  0x6d   :  { %4779 = shalt.err (!%p4776_p8)
}
  0x6e   :  { %s4780_s18 = scalar_lea.vmem %s93_s5, 16  ;;  %s4784_s4 = scalar_lea.vmem %s93_s5, 32 }
  0x6f   :  { %p4781_p9 = scmp.ne.s32.totalorder %s93_s5, %s4780_s18  ;;  %p4785_p10 = scmp.lt.s32.totalorder %s93_s5, %s93_s5 }
  0x70   :  { %p4786_p11 = scmp.lt.s32.totalorder %s4784_s4, %s4780_s18 }
  0x72   :  { %p4787_p12 = por %p4786_p11, %p4785_p10 }
  0x74   :  { %p4788_p13 = pnand %p4787_p12, %p4781_p9 }
  0x76   :  { %4791 = shalt.err (!%p4788_p13)
}
  0x77   :  { %95 = dma.hbm_to_vmem [thread:$0]  %s5250_s6, 16, %s93_s5, [#allocation13]  }
  0x78   :  { %4836 = dma.done.wait [#allocation4], 256  }
  0x79   :  { %4837 = vsyncadd [#allocation4], 4294967040 }
  0x7a   :  { %4838 = dma.done.wait [#allocation7], 1280  }
  0x7b   :  { %4839 = vsyncadd [#allocation7], 4294966016 }
  0x7c   :  { %4840 = dma.done.wait [#allocation10], 131136  }
  0x7d   :  { %4841 = vsyncadd [#allocation10], 4294836160 }
  0x7e   :  { %4842 = dma.done.wait [#allocation13], 8208  }
  0x7f   :  { %4843 = vsyncadd [#allocation13], 4294959088  ;;  %v4859_v0 = vmov 0.0   ;;  %v125_v1 = vld [vmem:[#allocation3] sm:$0xf]  ;;  %vm144_vm0 = vcmask 1043456   ;;  %v165_v25 = vlaneseq }
  0x80   :  { %121 = vst [vmem:[#allocation2] sm:$0xf] %v4859_v0  ;;  %122 = vst [vmem:[#allocation2 + $0x4] sm:$0xf] %v4859_v0  ;;  %374 = vmatprep.mubr.f32.mxu0 %v4859_v0  ;;  %445 = vmatprep.mubr.f32.mxu1 %v4859_v0  ;;  %v126_v2 = vld [vmem:[#allocation3 + $0x8] sm:$0xf] }
  0x81   :  { %v133_v7 = vld [vmem:[#allocation3 + $0x4] sm:$0xf]  ;;  %v134_v8 = vld [vmem:[#allocation3 + $0xc] sm:$0xf]  ;;  %v153_v17 = vld [vmem:[#allocation6] sm:$0xff]  ;;  %v5018_v26 = vshrl.u32 %v165_v25, 7 }
  0x82   :  { %v154_v18 = vld [vmem:[#allocation6 + $0x8] sm:$0xff]  ;;  %v267_v19 = vcombine.high %v153_v17, %v153_v17  ;;  %v155_v21 = vld [vmem:[#allocation6 + $0x10] sm:$0xff]  ;;  %v156_v22 = vld [vmem:[#allocation6 + $0x18] sm:$0xff]  ;;  %v248_v27 = vand.u32 127, %v165_v25  ;;  %vm257_vm1 = vcmask 1041409   ;;  %vm275_vm2 = vcmask 31744  }
  0x83   :  { %v268_v20 = vcombine.high %v154_v18, %v154_v18  ;;  %v269_v23 = vcombine.high %v155_v21, %v155_v21  ;;  %v270_v24 = vcombine.high %v156_v22, %v156_v22  ;;  %v157_v33 = vld [vmem:[#allocation6 + $0x20] sm:$0xff]  ;;  %v158_v34 = vld [vmem:[#allocation6 + $0x28] sm:$0xff]  ;;  %v159_v40 = vld [vmem:[#allocation6 + $0x30] sm:$0xff]  ;;  %s4861_s6 = smov [#allocation15]  }
  0x84   :  { %3400 = vmatprep.subr.msk.mxu0 %vm144_vm0, %v267_v19  ;;  %v251_v29 = vsub.s32 %v248_v27, %v5018_v26  ;;  %v271_v38 = vcombine.high %v157_v33, %v157_v33  ;;  %v272_v39 = vcombine.high %v158_v34, %v158_v34  ;;  %v160_v41 = vld [vmem:[#allocation6 + $0x38] sm:$0xff]  ;;  %v273_v42 = vcombine.high %v159_v40, %v159_v40  ;;  %v973_v46 = vld [vmem:[#allocation9 + $0x18] sm:$0xff]  ;;  %v970_v48 = vld [vmem:[#allocation9] sm:$0xff]  ;;  %s3374_s3 = sshll.u32 %s4861_s6, 4  ;;  %s3375_s3 = int_to_ptr.vmem [resolvable:$true] %s3374_s3 }
  0x85   :  { %3403 = vmatprep.subr.msk.mxu1 %vm144_vm0, %v268_v20  ;;  %3401 = vmatpush1.msk.msra.mxu0 %vm144_vm0, %v153_v17  ;;  %v274_v43 = vcombine.high %v160_v41, %v160_v41  ;;  %v971_v44 = vld [vmem:[#allocation9 + $0x8] sm:$0xff]  ;;  %v977_v47 = vld [vmem:[#allocation9 + $0x38] sm:$0xff]  ;;  %v974_v49 = vld [vmem:[#allocation9 + $0x20] sm:$0xff]  ;;  %s4792_s21 = scalar_lea.vmem %s3375_s3, 512  ;;  %p4797_p1 = scmp.lt.s32.totalorder %s3375_s3, %s3375_s3 }
  0x86   :  { %3404 = vmatpush1.msk.msra.mxu1 %vm144_vm0, %v154_v18  ;;  %3406 = vmatprep.subr.msk.mxu0 %vm144_vm0, %v269_v23  ;;  %v975_v45 = vld [vmem:[#allocation9 + $0x28] sm:$0xff]  ;;  %v972_v50 = vld [vmem:[#allocation9 + $0x10] sm:$0xff]  ;;  %v4007_v54 = vpack.c.bf16 %v977_v47, %v973_v46  ;;  %v981_v56 = vld [vmem:[#allocation9 + $0x58] sm:$0xff]  ;;  %v3497_v58 = vpack.c.bf16 %v974_v49, %v970_v48  ;;  %p4793_p0 = scmp.ne.s32.totalorder %s3375_s3, %s4792_s21  ;;  %p4798_p2 = scmp.lt.s32.totalorder %s4792_s21, %s4792_s21 }
  0x87   :  { %v123_v3 = vld [vmem:[#allocation2] sm:$0xf]  ;;  %v124_v4 = vld [vmem:[#allocation2 + $0x4] sm:$0xf]  ;;  %3409 = vmatprep.subr.msk.mxu1 %vm144_vm0, %v270_v24  ;;  %v976_v51 = vld [vmem:[#allocation9 + $0x30] sm:$0xff]  ;;  %v3495_v53 = vpack.c.bf16 %v975_v45, %v971_v44 }
  0x88   :  { %v127_v5 = vadd.f32 %v125_v1, %v123_v3  ;;  %v128_v6 = vadd.f32 %v126_v2, %v124_v4  ;;  %v979_v52 = vld [vmem:[#allocation9 + $0x48] sm:$0xff]  ;;  %v985_v57 = vld [vmem:[#allocation9 + $0x78] sm:$0xff]  ;;  %v4009_v59 = vpack.c.bf16 %v976_v51, %v972_v50  ;;  %v978_v60 = vld [vmem:[#allocation9 + $0x40] sm:$0xff]  ;;  %p4799_p3 = por %p4798_p2, %p4797_p1 }
  0x89   :  { %v983_v55 = vld [vmem:[#allocation9 + $0x68] sm:$0xff]  ;;  %v982_v61 = vld [vmem:[#allocation9 + $0x60] sm:$0xff]  ;;  %v4011_v63 = vpack.c.bf16 %v985_v57, %v981_v56  ;;  %v980_v1 = vld [vmem:[#allocation9 + $0x50] sm:$0xff] }
  0x8a   :  { %129 = vst [vmem:[#allocation2] sm:$0xf] %v127_v5  ;;  %130 = vst [vmem:[#allocation2 + $0x4] sm:$0xf] %v128_v6  ;;  %v3499_v62 = vpack.c.bf16 %v983_v55, %v979_v52  ;;  %v984_v2 = vld [vmem:[#allocation9 + $0x70] sm:$0xff]  ;;  %v987_v3 = vld [vmem:[#allocation9 + $0x88] sm:$0xff]  ;;  %p4800_p4 = pnand %p4799_p3, %p4793_p0 }
  0x8b   :  { %v991_v4 = vld [vmem:[#allocation9 + $0xa8] sm:$0xff]  ;;  %v989_v5 = vld [vmem:[#allocation9 + $0x98] sm:$0xff]  ;;  %v994_v20 = vld [vmem:[#allocation9 + $0xc0] sm:$0xff] }
  0x8c   :  { %v993_v6 = vld [vmem:[#allocation9 + $0xb8] sm:$0xff]  ;;  %v996_v24 = vld [vmem:[#allocation9 + $0xd0] sm:$0xff]  ;;  %v1003_v27 = vld [vmem:[#allocation9 + $0x108] sm:$0xff] }
  0x8d   :  { %v1001_v17 = vld [vmem:[#allocation9 + $0xf8] sm:$0xff]  ;;  %v1000_v25 = vld [vmem:[#allocation9 + $0xf0] sm:$0xff]  ;;  %v1010_v45 = vld [vmem:[#allocation9 + $0x140] sm:$0xff] }
  0x8e   :  { %v1014_v46 = vld [vmem:[#allocation9 + $0x160] sm:$0xff]  ;;  %v1012_v49 = vld [vmem:[#allocation9 + $0x150] sm:$0xff]  ;;  %v1019_v51 = vld [vmem:[#allocation9 + $0x188] sm:$0xff] }
  0x8f   :  { %v1016_v50 = vld [vmem:[#allocation9 + $0x170] sm:$0xff]  ;;  %v1023_v52 = vld [vmem:[#allocation9 + $0x1a8] sm:$0xff]  ;;  %v3517_v55 = vpack.c.bf16 %v1014_v46, %v1010_v45  ;;  %v1018_v57 = vld [vmem:[#allocation9 + $0x180] sm:$0xff] }
  0x90   :  { %v4029_v56 = vpack.c.bf16 %v1016_v50, %v1012_v49  ;;  %v1052_v46 = vld [vmem:[#allocation9 + $0x290] sm:$0xff]  ;;  %v1063_v49 = vld [vmem:[#allocation9 + $0x2e8] sm:$0xff]  ;;  %v1061_v50 = vld [vmem:[#allocation9 + $0x2d8] sm:$0xff] }
  0x91   :  { %v131_v9 = vld [vmem:[#allocation2] sm:$0xf]  ;;  %v132_v10 = vld [vmem:[#allocation2 + $0x4] sm:$0xf] }
  0x92   :  { %v135_v11 = vadd.f32 %v133_v7, %v131_v9  ;;  %v136_v12 = vadd.f32 %v134_v8, %v132_v10  ;;  %v3501_v7 = vpack.c.bf16 %v982_v61, %v978_v60  ;;  %v4013_v8 = vpack.c.bf16 %v984_v2, %v980_v1  ;;  %v986_v9 = vld [vmem:[#allocation9 + $0x80] sm:$0xff]  ;;  %v1020_v61 = vld [vmem:[#allocation9 + $0x190] sm:$0xff]  ;;  %v1031_v1 = vld [vmem:[#allocation9 + $0x1e8] sm:$0xff] }
  0x93   :  { %v3503_v10 = vpack.c.bf16 %v991_v4, %v987_v3  ;;  %v1029_v2 = vld [vmem:[#allocation9 + $0x1d8] sm:$0xff] }
  0x94   :  { %137 = vst [vmem:[#allocation2] sm:$0xf] %v135_v11  ;;  %138 = vst [vmem:[#allocation2 + $0x4] sm:$0xf] %v136_v12  ;;  %v4015_v11 = vpack.c.bf16 %v993_v6, %v989_v5  ;;  %v988_v12 = vld [vmem:[#allocation9 + $0x90] sm:$0xff]  ;;  %v1033_v3 = vld [vmem:[#allocation9 + $0x1f8] sm:$0xff] }
  0x95   :  { %v1026_v6 = vld [vmem:[#allocation9 + $0x1c0] sm:$0xff] }
  0x9b   :  { %v142_v13 = vld [vmem:[#allocation2] sm:$0xf]  ;;  %v143_v14 = vld [vmem:[#allocation2 + $0x4] sm:$0xf] }
  0x9c   :  { %v145_v15 = vsel %vm144_vm0, %v142_v13, 0.0  ;;  %v148_v16 = vsel %vm144_vm0, %v143_v14, 0.0  ;;  %v992_v13 = vld [vmem:[#allocation9 + $0xb0] sm:$0xff]  ;;  %v995_v14 = vld [vmem:[#allocation9 + $0xc8] sm:$0xff] }
  0x9d   :  { %146 = vadd.xlane.f32.xlu0 %v145_v15  ;;  %v999_v15 = vld [vmem:[#allocation9 + $0xe8] sm:$0xff]  ;;  %v4017_v19 = vpack.c.bf16 %v992_v13, %v988_v12  ;;  %v1037_v13 = vld [vmem:[#allocation9 + $0x218] sm:$0xff] }
  0x9e   :  { %v1039_v12 = vld [vmem:[#allocation9 + $0x228] sm:$0xff] }
  0xa1   :  { %149 = vadd.xlane.f32.xlu0 %v148_v16  ;;  %v997_v16 = vld [vmem:[#allocation9 + $0xd8] sm:$0xff] }
  0xa2   :  { %v4019_v23 = vpack.c.bf16 %v1001_v17, %v997_v16  ;;  %v1034_v17 = vld [vmem:[#allocation9 + $0x200] sm:$0xff] }
 0x12a   :  { %v147_v28 = vpop.xlane.xlu0 %146 }
 0x12b   :  { %v151_v30 = vmul.f32 0.00390625, %v147_v28  ;;  %v1007_v28 = vld [vmem:[#allocation9 + $0x128] sm:$0xff] }
 0x12d   :  { %v252_v35 = vrot.slane %v151_v30, %v251_v29  ;;  %v1009_v30 = vld [vmem:[#allocation9 + $0x138] sm:$0xff] }
 0x12e   :  { %v150_v31 = vpop.xlane.xlu0 %149 }
 0x12f   :  { %v152_v32 = vmul.f32 0.00390625, %v150_v31 }
 0x131   :  { %v256_v36 = vrot.slane %v152_v32, %v251_v29  ;;  %v1005_v29 = vld [vmem:[#allocation9 + $0x118] sm:$0xff]  ;;  %v4021_v32 = vpack.c.bf16 %v1000_v25, %v996_v24  ;;  %v1047_v24 = vld [vmem:[#allocation9 + $0x268] sm:$0xff] }
 0x132   :  { %v1045_v25 = vld [vmem:[#allocation9 + $0x258] sm:$0xff] }
 0x133   :  { %v258_v37 = vsel %vm257_vm1, %v256_v36, %v252_v35  ;;  %v3511_v35 = vpack.c.bf16 %v1007_v28, %v1003_v27  ;;  %v4023_v36 = vpack.c.bf16 %v1009_v30, %v1005_v29  ;;  %v1049_v27 = vld [vmem:[#allocation9 + $0x278] sm:$0xff]  ;;  %v1042_v30 = vld [vmem:[#allocation9 + $0x240] sm:$0xff] }
 0x134   :  { %3402 = vmatmul.mubr.msk.f32.vlgmr.msra.gmra.mrb[0].mxu0 %vm275_vm2, %v258_v37  ;;  %3405 = vmatmul.mubr.msk.f32.vlgmr.msra.gmra.mrb[0].mxu1 %vm275_vm2, %v258_v37 }
 0x135   :  { %3407 = vmatpush1.msk.msra.mxu0 %vm144_vm0, %v155_v21  ;;  %516 = vmatprep.mubr.f32.mxu0 %v4859_v0  ;;  %v998_v21 = vld [vmem:[#allocation9 + $0xe0] sm:$0xff] }
 0x136   :  { %3410 = vmatpush1.msk.msra.mxu1 %vm144_vm0, %v156_v22  ;;  %587 = vmatprep.mubr.f32.mxu1 %v4859_v0  ;;  %v3507_v22 = vpack.c.bf16 %v999_v15, %v995_v14  ;;  %v3509_v31 = vpack.c.bf16 %v998_v21, %v994_v20  ;;  %v1041_v14 = vld [vmem:[#allocation9 + $0x238] sm:$0xff]  ;;  %v1036_v21 = vld [vmem:[#allocation9 + $0x210] sm:$0xff] }
 0x137   :  { %3412 = vmatprep.subr.msk.mxu0 %vm144_vm0, %v271_v38  ;;  %3415 = vmatprep.subr.msk.mxu1 %vm144_vm0, %v272_v39  ;;  %v1008_v38 = vld [vmem:[#allocation9 + $0x130] sm:$0xff]  ;;  %v1011_v39 = vld [vmem:[#allocation9 + $0x148] sm:$0xff]  ;;  %v4039_v20 = vpack.c.bf16 %v1041_v14, %v1037_v13  ;;  %v1074_v14 = vld [vmem:[#allocation9 + $0x340] sm:$0xff] }
 0x138   :  { %3408 = vmatmul.mubr.msk.f32.vlgmr.msra.gmra.mrb[2].mxu0 %vm275_vm2, %v258_v37  ;;  %3411 = vmatmul.mubr.msk.f32.vlgmr.msra.gmra.mrb[2].mxu1 %vm275_vm2, %v258_v37 }
 0x139   :  { %3413 = vmatpush1.msk.msra.mxu0 %vm144_vm0, %v157_v33  ;;  %658 = vmatprep.mubr.f32.mxu0 %v4859_v0  ;;  %v1002_v33 = vld [vmem:[#allocation9 + $0x100] sm:$0xff] }
 0x13a   :  { %3416 = vmatpush1.msk.msra.mxu1 %vm144_vm0, %v158_v34  ;;  %729 = vmatprep.mubr.f32.mxu1 %v4859_v0  ;;  %v1006_v34 = vld [vmem:[#allocation9 + $0x120] sm:$0xff] }
 0x13b   :  { %3418 = vmatprep.subr.msk.mxu0 %vm144_vm0, %v273_v42  ;;  %3421 = vmatprep.subr.msk.mxu1 %vm144_vm0, %v274_v43  ;;  %v1017_v42 = vld [vmem:[#allocation9 + $0x178] sm:$0xff]  ;;  %v3513_v43 = vpack.c.bf16 %v1006_v34, %v1002_v33  ;;  %v4043_v33 = vpack.c.bf16 %v1049_v27, %v1045_v25  ;;  %v1044_v34 = vld [vmem:[#allocation9 + $0x250] sm:$0xff]  ;;  %v1082_v27 = vld [vmem:[#allocation9 + $0x380] sm:$0xff] }
 0x13c   :  { %3414 = vmatmul.mubr.msk.f32.vlgmr.msra.gmra.mrb[4].mxu0 %vm275_vm2, %v258_v37  ;;  %3417 = vmatmul.mubr.msk.f32.vlgmr.msra.gmra.mrb[4].mxu1 %vm275_vm2, %v258_v37 }
 0x13d   :  { %3419 = vmatpush1.msk.msra.mxu0 %vm144_vm0, %v159_v40  ;;  %800 = vmatprep.mubr.f32.mxu0 %v4859_v0  ;;  %v1015_v40 = vld [vmem:[#allocation9 + $0x168] sm:$0xff] }
 0x13e   :  { %3422 = vmatpush1.msk.msra.mxu1 %vm144_vm0, %v160_v41  ;;  %871 = vmatprep.mubr.f32.mxu1 %v4859_v0  ;;  %v990_v0 = vld [vmem:[#allocation9 + $0xa0] sm:$0xff]  ;;  %v1013_v41 = vld [vmem:[#allocation9 + $0x158] sm:$0xff]  ;;  %v3515_v47 = vpack.c.bf16 %v1015_v40, %v1011_v39 }
 0x13f   :  { %3496 = vmatprep.subr.bf16.mxu0 %v3495_v53  ;;  %4008 = vmatprep.subr.bf16.mxu1 %v4007_v54  ;;  %v3505_v18 = vpack.c.bf16 %v990_v0, %v986_v9  ;;  %v4027_v48 = vpack.c.bf16 %v1017_v42, %v1013_v41  ;;  %v1021_v53 = vld [vmem:[#allocation9 + $0x198] sm:$0xff]  ;;  %v4035_v9 = vpack.c.bf16 %v1033_v3, %v1029_v2  ;;  %v1028_v0 = vld [vmem:[#allocation9 + $0x1d0] sm:$0xff]  ;;  %v1050_v42 = vld [vmem:[#allocation9 + $0x280] sm:$0xff] }
 0x140   :  { %3420 = vmatmul.mubr.msk.f32.vlgmr.msra.gmra.mrb[6].mxu0 %vm275_vm2, %v258_v37  ;;  %3423 = vmatmul.mubr.msk.f32.vlgmr.msra.gmra.mrb[6].mxu1 %vm275_vm2, %v258_v37  ;;  %v1004_v37 = vld [vmem:[#allocation9 + $0x110] sm:$0xff]  ;;  %v1025_v54 = vld [vmem:[#allocation9 + $0x1b8] sm:$0xff]  ;;  %v1066_v3 = vld [vmem:[#allocation9 + $0x300] sm:$0xff] }
 0x141   :  { %3498 = vmatpush1.bf16.msra.mxu0 %v3497_v58  ;;  %4010 = vmatpush1.bf16.msra.mxu1 %v4009_v59  ;;  %v4025_v44 = vpack.c.bf16 %v1008_v38, %v1004_v37  ;;  %v1022_v58 = vld [vmem:[#allocation9 + $0x1a0] sm:$0xff]  ;;  %v3519_v59 = vpack.c.bf16 %v1023_v52, %v1019_v51  ;;  %v4031_v60 = vpack.c.bf16 %v1025_v54, %v1021_v53  ;;  %v1055_v37 = vld [vmem:[#allocation9 + $0x2a8] sm:$0xff]  ;;  %v1053_v38 = vld [vmem:[#allocation9 + $0x298] sm:$0xff] }
 0x142   :  { %3500 = vmatprep.subr.bf16.mxu0 %v3499_v62  ;;  %4012 = vmatprep.subr.bf16.mxu1 %v4011_v63  ;;  %v1024_v62 = vld [vmem:[#allocation9 + $0x1b0] sm:$0xff]  ;;  %v1027_v63 = vld [vmem:[#allocation9 + $0x1c8] sm:$0xff]  ;;  %v3521_v4 = vpack.c.bf16 %v1022_v58, %v1018_v57  ;;  %v1057_v39 = vld [vmem:[#allocation9 + $0x2b8] sm:$0xff] }
 0x143   :  { %v4033_v5 = vpack.c.bf16 %v1024_v62, %v1020_v61  ;;  %v4047_v45 = vpack.c.bf16 %v1057_v39, %v1053_v38  ;;  %v1065_v51 = vld [vmem:[#allocation9 + $0x2f8] sm:$0xff]  ;;  %v1058_v54 = vld [vmem:[#allocation9 + $0x2c0] sm:$0xff]  ;;  %v1060_v58 = vld [vmem:[#allocation9 + $0x2d0] sm:$0xff] }
 0x144   :  { %v4051_v57 = vpack.c.bf16 %v1065_v51, %v1061_v50  ;;  %v1071_v61 = vld [vmem:[#allocation9 + $0x328] sm:$0xff]  ;;  %v1069_v62 = vld [vmem:[#allocation9 + $0x318] sm:$0xff] }
 0x145   :  { %3502 = vmatpush1.bf16.msra.mxu0 %v3501_v7  ;;  %4014 = vmatpush1.bf16.msra.mxu1 %v4013_v8  ;;  %v1030_v7 = vld [vmem:[#allocation9 + $0x1e0] sm:$0xff]  ;;  %v3523_v8 = vpack.c.bf16 %v1031_v1, %v1027_v63  ;;  %v1073_v63 = vld [vmem:[#allocation9 + $0x338] sm:$0xff] }
 0x146   :  { %3504 = vmatprep.subr.bf16.mxu0 %v3503_v10  ;;  %4016 = vmatprep.subr.bf16.mxu1 %v4015_v11  ;;  %v1032_v10 = vld [vmem:[#allocation9 + $0x1f0] sm:$0xff]  ;;  %v1035_v11 = vld [vmem:[#allocation9 + $0x208] sm:$0xff]  ;;  %v3525_v15 = vpack.c.bf16 %v1030_v7, %v1026_v6  ;;  %v4055_v6 = vpack.c.bf16 %v1073_v63, %v1069_v62  ;;  %v1097_v39 = vld [vmem:[#allocation9 + $0x3f8] sm:$0xff]  ;;  %v187_v63 = vsub.s32 5, %v5018_v26 }
 0x147   :  { %v4037_v16 = vpack.c.bf16 %v1032_v10, %v1028_v0  ;;  %v1068_v7 = vld [vmem:[#allocation9 + $0x310] sm:$0xff]  ;;  %v1079_v0 = vld [vmem:[#allocation9 + $0x368] sm:$0xff]  ;;  %v1077_v10 = vld [vmem:[#allocation9 + $0x358] sm:$0xff] }
 0x148   :  { %v1105_v51 = vld [vmem:[#allocation9 + $0x438] sm:$0xff] }
 0x149   :  { %3506 = vmatpush1.bf16.msra.mxu0 %v3505_v18  ;;  %4018 = vmatpush1.bf16.msra.mxu1 %v4017_v19  ;;  %v1038_v18 = vld [vmem:[#allocation9 + $0x220] sm:$0xff]  ;;  %v3527_v19 = vpack.c.bf16 %v1039_v12, %v1035_v11  ;;  %v1081_v11 = vld [vmem:[#allocation9 + $0x378] sm:$0xff] }
 0x14a   :  { %3508 = vmatprep.subr.bf16.mxu0 %v3507_v22  ;;  %4020 = vmatprep.subr.bf16.mxu1 %v4019_v23  ;;  %v1040_v22 = vld [vmem:[#allocation9 + $0x230] sm:$0xff]  ;;  %v1043_v23 = vld [vmem:[#allocation9 + $0x248] sm:$0xff]  ;;  %v3529_v28 = vpack.c.bf16 %v1038_v18, %v1034_v17  ;;  %v4059_v17 = vpack.c.bf16 %v1081_v11, %v1077_v10 }
 0x14b   :  { %v4041_v29 = vpack.c.bf16 %v1040_v22, %v1036_v21  ;;  %v1076_v18 = vld [vmem:[#allocation9 + $0x350] sm:$0xff]  ;;  %v1087_v21 = vld [vmem:[#allocation9 + $0x3a8] sm:$0xff]  ;;  %v1085_v22 = vld [vmem:[#allocation9 + $0x398] sm:$0xff] }
 0x14c   :  { %v5071_v10 = vld [vmem:[#allocation9 + $0x448] sm:$0xff] }
 0x14d   :  { %3510 = vmatpush1.bf16.msra.mxu0 %v3509_v31  ;;  %4022 = vmatpush1.bf16.msra.mxu1 %v4021_v32  ;;  %v1046_v31 = vld [vmem:[#allocation9 + $0x260] sm:$0xff]  ;;  %v3531_v32 = vpack.c.bf16 %v1047_v24, %v1043_v23  ;;  %v1089_v23 = vld [vmem:[#allocation9 + $0x3b8] sm:$0xff]  ;;  %v5073_v11 = vld [vmem:[#allocation9 + $0x468] sm:$0xff] }
 0x14e   :  { %3512 = vmatprep.subr.bf16.mxu0 %v3511_v35  ;;  %4024 = vmatprep.subr.bf16.mxu1 %v4023_v36  ;;  %v1048_v35 = vld [vmem:[#allocation9 + $0x270] sm:$0xff]  ;;  %v1051_v36 = vld [vmem:[#allocation9 + $0x288] sm:$0xff]  ;;  %v3533_v40 = vpack.c.bf16 %v1046_v31, %v1042_v30  ;;  %v1086_v30 = vld [vmem:[#allocation9 + $0x3a0] sm:$0xff] }
 0x14f   :  { %v4045_v41 = vpack.c.bf16 %v1048_v35, %v1044_v34  ;;  %v1084_v31 = vld [vmem:[#allocation9 + $0x390] sm:$0xff]  ;;  %v1091_v35 = vld [vmem:[#allocation9 + $0x3c8] sm:$0xff] }
 0x151   :  { %3514 = vmatpush1.bf16.msra.mxu0 %v3513_v43  ;;  %4026 = vmatpush1.bf16.msra.mxu1 %v4025_v44  ;;  %v1054_v43 = vld [vmem:[#allocation9 + $0x2a0] sm:$0xff]  ;;  %v3535_v44 = vpack.c.bf16 %v1055_v37, %v1051_v36  ;;  %v1095_v36 = vld [vmem:[#allocation9 + $0x3e8] sm:$0xff]  ;;  %v1093_v37 = vld [vmem:[#allocation9 + $0x3d8] sm:$0xff] }
 0x152   :  { %3516 = vmatprep.subr.bf16.mxu0 %v3515_v47  ;;  %4028 = vmatprep.subr.bf16.mxu1 %v4027_v48  ;;  %v1056_v47 = vld [vmem:[#allocation9 + $0x2b0] sm:$0xff]  ;;  %v1059_v48 = vld [vmem:[#allocation9 + $0x2c8] sm:$0xff]  ;;  %v3537_v52 = vpack.c.bf16 %v1054_v43, %v1050_v42  ;;  %v3555_v38 = vpack.c.bf16 %v1095_v36, %v1091_v35  ;;  %v4067_v42 = vpack.c.bf16 %v1097_v39, %v1093_v37 }
 0x153   :  { %v4049_v53 = vpack.c.bf16 %v1056_v47, %v1052_v46  ;;  %v1099_v47 = vld [vmem:[#allocation9 + $0x408] sm:$0xff] }
 0x154   :  { %v5108_v35 = vld [vmem:[#allocation9 + $0x4a8] sm:$0xff] }
 0x155   :  { %3518 = vmatpush1.bf16.msra.mxu0 %v3517_v55  ;;  %4030 = vmatpush1.bf16.msra.mxu1 %v4029_v56  ;;  %v1062_v55 = vld [vmem:[#allocation9 + $0x2e0] sm:$0xff]  ;;  %v3539_v56 = vpack.c.bf16 %v1063_v49, %v1059_v48  ;;  %v1103_v48 = vld [vmem:[#allocation9 + $0x428] sm:$0xff]  ;;  %v1101_v49 = vld [vmem:[#allocation9 + $0x418] sm:$0xff] }
 0x156   :  { %3520 = vmatprep.subr.bf16.mxu0 %v3519_v59  ;;  %4032 = vmatprep.subr.bf16.mxu1 %v4031_v60  ;;  %v1064_v59 = vld [vmem:[#allocation9 + $0x2f0] sm:$0xff]  ;;  %v1067_v60 = vld [vmem:[#allocation9 + $0x308] sm:$0xff]  ;;  %v3541_v1 = vpack.c.bf16 %v1062_v55, %v1058_v54  ;;  %v3559_v50 = vpack.c.bf16 %v1103_v48, %v1099_v47  ;;  %v5046_v55 = vsub.s32 0, %v5018_v26 }
 0x157   :  { %v4053_v2 = vpack.c.bf16 %v1064_v59, %v1060_v58  ;;  %v5052_v58 = vsub.s32 1, %v5018_v26  ;;  %v5055_v59 = vsub.s32 3, %v5018_v26 }
 0x159   :  { %3522 = vmatpush1.bf16.msra.mxu0 %v3521_v4  ;;  %4034 = vmatpush1.bf16.msra.mxu1 %v4033_v5  ;;  %v1070_v4 = vld [vmem:[#allocation9 + $0x320] sm:$0xff]  ;;  %v3543_v5 = vpack.c.bf16 %v1071_v61, %v1067_v60  ;;  %v183_v60 = vsub.s32 4, %v5018_v26  ;;  %v191_v61 = vsub.s32 6, %v5018_v26 }
 0x15a   :  { %3524 = vmatprep.subr.bf16.mxu0 %v3523_v8  ;;  %4036 = vmatprep.subr.bf16.mxu1 %v4035_v9  ;;  %v1072_v8 = vld [vmem:[#allocation9 + $0x330] sm:$0xff]  ;;  %v1075_v9 = vld [vmem:[#allocation9 + $0x348] sm:$0xff]  ;;  %v3545_v12 = vpack.c.bf16 %v1070_v4, %v1066_v3  ;;  %v5063_v3 = vld [vmem:[#allocation9 + $0x420] sm:$0xff] }
 0x15b   :  { %v4057_v13 = vpack.c.bf16 %v1072_v8, %v1068_v7  ;;  %v1104_v7 = vld [vmem:[#allocation9 + $0x430] sm:$0xff] }
 0x15d   :  { %3526 = vmatpush1.bf16.msra.mxu0 %v3525_v15  ;;  %4038 = vmatpush1.bf16.msra.mxu1 %v4037_v16  ;;  %v1078_v15 = vld [vmem:[#allocation9 + $0x360] sm:$0xff]  ;;  %v3547_v16 = vpack.c.bf16 %v1079_v0, %v1075_v9  ;;  %v5069_v0 = vld [vmem:[#allocation8 + $0x8] sm:$0xff] }
 0x15e   :  { %3528 = vmatprep.subr.bf16.mxu0 %v3527_v19  ;;  %4040 = vmatprep.subr.bf16.mxu1 %v4039_v20  ;;  %v1080_v19 = vld [vmem:[#allocation9 + $0x370] sm:$0xff]  ;;  %v1083_v20 = vld [vmem:[#allocation9 + $0x388] sm:$0xff]  ;;  %v3549_v24 = vpack.c.bf16 %v1078_v15, %v1074_v14  ;;  %v5081_v15 = vld [vmem:[#allocation9 + $0x458] sm:$0xff] }
 0x15f   :  { %v4061_v25 = vpack.c.bf16 %v1080_v19, %v1076_v18 }
 0x161   :  { %3530 = vmatpush1.bf16.msra.mxu0 %v3529_v28  ;;  %4042 = vmatpush1.bf16.msra.mxu1 %v4041_v29  ;;  %v3551_v28 = vpack.c.bf16 %v1087_v21, %v1083_v20  ;;  %v4063_v29 = vpack.c.bf16 %v1089_v23, %v1085_v22 }
 0x162   :  { %3532 = vmatprep.subr.bf16.mxu0 %v3531_v32  ;;  %4044 = vmatprep.subr.bf16.mxu1 %v4043_v33  ;;  %v1088_v32 = vld [vmem:[#allocation9 + $0x3b0] sm:$0xff]  ;;  %v3553_v33 = vpack.c.bf16 %v1086_v30, %v1082_v27 }
 0x163   :  { %v4065_v34 = vpack.c.bf16 %v1088_v32, %v1084_v31  ;;  %v5098_v27 = vld [vmem:[#allocation9 + $0x470] sm:$0xff]  ;;  %v200_v32 = vrot.slane %v5069_v0, %v5046_v55 }
 0x165   :  { %3534 = vmatpush1.bf16.msra.mxu0 %v3533_v40  ;;  %4046 = vmatpush1.bf16.msra.mxu1 %v4045_v41  ;;  %v1090_v40 = vld [vmem:[#allocation9 + $0x3c0] sm:$0xff] }
 0x166   :  { %3536 = vmatprep.subr.bf16.mxu0 %v3535_v44  ;;  %4048 = vmatprep.subr.bf16.mxu1 %v4047_v45  ;;  %v1094_v41 = vld [vmem:[#allocation9 + $0x3e0] sm:$0xff]  ;;  %v1092_v44 = vld [vmem:[#allocation9 + $0x3d0] sm:$0xff] }
 0x167   :  { %v3557_v43 = vpack.c.bf16 %v1094_v41, %v1090_v40  ;;  %v1096_v45 = vld [vmem:[#allocation9 + $0x3f0] sm:$0xff]  ;;  %v204_v40 = vrot.slane %v5069_v0, %v5052_v58  ;;  %v212_v41 = vrot.slane %v5069_v0, %v5055_v59 }
 0x168   :  { %v4069_v46 = vpack.c.bf16 %v1096_v45, %v1092_v44  ;;  %v5122_v44 = vld [vmem:[#allocation9 + $0x498] sm:$0xff] }
 0x169   :  { %3538 = vmatpush1.bf16.msra.mxu0 %v3537_v52  ;;  %4050 = vmatpush1.bf16.msra.mxu1 %v4049_v53  ;;  %v4071_v52 = vpack.c.bf16 %v1105_v51, %v1101_v49  ;;  %v4860_v53 = vmov 1983009808   ;;  %v5127_v51 = vld [vmem:[#allocation9 + $0x480] sm:$0xff] }
 0x16a   :  { %3540 = vmatprep.subr.bf16.mxu0 %v3539_v56  ;;  %4052 = vmatprep.subr.bf16.mxu1 %v4051_v57  ;;  %v897_v54 = vunpack.c.l.s4 %v4860_v53  ;;  %v5049_v56 = vsub.s32 2, %v5018_v26  ;;  %v161_v57 = vld [vmem:[#allocation8] sm:$0xff] }
 0x16b   :  { %v168_v4 = vrot.slane %v161_v57, %v5046_v55  ;;  %v172_v8 = vrot.slane %v161_v57, %v5052_v58  ;;  %v180_v9 = vrot.slane %v161_v57, %v5055_v59  ;;  %v188_v21 = vrot.slane %v161_v57, %v187_v63 }
 0x16c   :  { %v898_v62 = vunpack.c.0.s8 %v897_v54 }
 0x16d   :  { %3542 = vmatpush1.bf16.msra.mxu0 %v3541_v1  ;;  %4054 = vmatpush1.bf16.msra.mxu1 %v4053_v2  ;;  %v195_v1 = vsub.s32 7, %v5018_v26  ;;  %v5061_v2 = vld [vmem:[#allocation9 + $0x400] sm:$0xff] }
 0x16e   :  { %3544 = vmatprep.subr.bf16.mxu0 %v3543_v5  ;;  %4056 = vmatprep.subr.bf16.mxu1 %v4055_v6  ;;  %v176_v5 = vrot.slane %v161_v57, %v5049_v56  ;;  %v1100_v6 = vld [vmem:[#allocation9 + $0x410] sm:$0xff]  ;;  %v3561_v14 = vpack.c.bf16 %v5063_v3, %v5061_v2  ;;  %v5088_v20 = vsub.s32 %v898_v62, %v5018_v26 }
 0x16f   :  { %v196_v22 = vrot.slane %v161_v57, %v195_v1  ;;  %v4073_v23 = vpack.c.bf16 %v1104_v7, %v1100_v6  ;;  %v216_v2 = vrot.slane %v5069_v0, %v183_v60  ;;  %v224_v7 = vrot.slane %v5069_v0, %v191_v61 }
 0x171   :  { %3546 = vmatpush1.bf16.msra.mxu0 %v3545_v12  ;;  %4058 = vmatpush1.bf16.msra.mxu1 %v4057_v13  ;;  %v184_v12 = vrot.slane %v161_v57, %v183_v60  ;;  %v192_v13 = vrot.slane %v161_v57, %v191_v61  ;;  %v1127_v61 = vld [vmem:[#allocation9 + $0x4e8] sm:$0xff] }
 0x172   :  { %3548 = vmatprep.subr.bf16.mxu0 %v3547_v16  ;;  %4060 = vmatprep.subr.bf16.mxu1 %v4059_v17  ;;  %v5083_v16 = vld [vmem:[#allocation9 + $0x478] sm:$0xff]  ;;  %v5085_v17 = vld [vmem:[#allocation9 + $0x440] sm:$0xff] }
 0x173   :  { %v4075_v39 = vpack.c.bf16 %v5083_v16, %v5081_v15  ;;  %v1120_v15 = vld [vmem:[#allocation9 + $0x4b0] sm:$0xff]  ;;  %v1123_v16 = vld [vmem:[#allocation9 + $0x4c8] sm:$0xff] }
 0x174   :  { %v3571_v26 = vpack.c.bf16 %v1127_v61, %v1123_v16 }
 0x175   :  { %3550 = vmatpush1.bf16.msra.mxu0 %v3549_v24  ;;  %4062 = vmatpush1.bf16.msra.mxu1 %v4061_v25  ;;  %v5094_v24 = vld [vmem:[#allocation9 + $0x460] sm:$0xff]  ;;  %v5096_v25 = vld [vmem:[#allocation9 + $0x450] sm:$0xff] }
 0x176   :  { %3552 = vmatprep.subr.bf16.mxu0 %v3551_v28  ;;  %4064 = vmatprep.subr.bf16.mxu1 %v4063_v29 }
 0x179   :  { %3554 = vmatpush1.bf16.msra.mxu0 %v3553_v33  ;;  %4066 = vmatpush1.bf16.msra.mxu1 %v4065_v34  ;;  %v3563_v33 = vpack.c.bf16 %v5073_v11, %v5071_v10  ;;  %v5106_v34 = vld [vmem:[#allocation9 + $0x488] sm:$0xff] }
 0x17a   :  { %3556 = vmatprep.subr.bf16.mxu0 %v3555_v38  ;;  %4068 = vmatprep.subr.bf16.mxu1 %v4067_v42  ;;  %v208_v38 = vrot.slane %v5069_v0, %v5049_v56  ;;  %v3565_v42 = vpack.c.bf16 %v5094_v24, %v5085_v17  ;;  %v3567_v49 = vpack.c.bf16 %v5108_v35, %v5106_v34  ;;  %v1125_v24 = vld [vmem:[#allocation9 + $0x4d8] sm:$0xff]  ;;  %v1124_v34 = vld [vmem:[#allocation9 + $0x4d0] sm:$0xff] }
 0x17d   :  { %3558 = vmatpush1.bf16.msra.mxu0 %v3557_v43  ;;  %4070 = vmatpush1.bf16.msra.mxu1 %v4069_v46  ;;  %v4077_v43 = vpack.c.bf16 %v5098_v27, %v5096_v25  ;;  %v1129_v25 = vld [vmem:[#allocation9 + $0x4f8] sm:$0xff] }
 0x17e   :  { %3560 = vmatprep.subr.bf16.mxu0 %v3559_v50  ;;  %4072 = vmatprep.subr.bf16.mxu1 %v4071_v52  ;;  %v1121_v50 = vld [vmem:[#allocation9 + $0x4b8] sm:$0xff]  ;;  %v5129_v52 = vld [vmem:[#allocation9 + $0x4a0] sm:$0xff] }
 0x17f   :  { %v3569_v60 = vpack.c.bf16 %v5129_v52, %v5127_v51 }
 0x207   :  { %v376_v18 = vpop.f32.mrb[0].mxu0  ;;  %v447_v19 = vpop.f32.mrb[0].mxu1 }
 0x208   :  { %v377_v28 = vadd.f32 %v376_v18, %v168_v4  ;;  %v5100_v29 = vadd.f32 %v447_v19, %v176_v5  ;;  %v378_v30 = vpop.f32.mrb[1].mxu0  ;;  %v449_v31 = vpop.f32.mrb[1].mxu1 }
 0x209   :  { %v379_v36 = vadd.f32 %v378_v30, %v172_v8  ;;  %v450_v37 = vadd.f32 %v449_v31, %v180_v9  ;;  %v4079_v8 = vpack.c.bf16 %v1121_v50, %v5122_v44  ;;  %v1116_v9 = vld [vmem:[#allocation9 + $0x490] sm:$0xff] }
 0x20b   :  { %v894_v45 = vcombine.low %v377_v28, %v379_v36  ;;  %v895_v46 = vcombine.low %v5100_v29, %v450_v37  ;;  %v518_v47 = vpop.f32.mrb[2].mxu0  ;;  %v589_v48 = vpop.f32.mrb[2].mxu1  ;;  %2080 = vmatprep.mubr.f32.mxu0 %v379_v36  ;;  %2648 = vmatprep.mubr.f32.mxu1 %v379_v36 }
 0x20c   :  { %v5131_v53 = vadd.f32 %v518_v47, %v184_v12  ;;  %v5133_v54 = vadd.f32 %v589_v48, %v192_v13  ;;  %v520_v57 = vpop.f32.mrb[3].mxu0  ;;  %v591_v62 = vpop.f32.mrb[3].mxu1  ;;  %2081 = vmatmul.mubr.f32.vlgmr.msra.gmra.mrb[8].mxu0 %v377_v28  ;;  %2649 = vmatmul.mubr.f32.vlgmr.msra.gmra.mrb[8].mxu1 %v377_v28  ;;  %v1133_v47 = vld [vmem:[#allocation9 + $0x518] sm:$0xff] }
 0x20d   :  { %v902_v3 = vrot.slane %v894_v45, %v5088_v20  ;;  %v909_v4 = vrot.slane %v895_v46, %v5088_v20  ;;  %v5140_v5 = vadd.f32 %v520_v57, %v188_v21  ;;  %v5142_v6 = vadd.f32 %v591_v62, %v196_v22  ;;  %3562 = vmatpush1.bf16.msra.mxu0 %v3561_v14  ;;  %v1137_v48 = vld [vmem:[#allocation9 + $0x538] sm:$0xff] }
 0x20e   :  { %4074 = vmatpush1.bf16.msra.mxu1 %v4073_v23  ;;  %2151 = vmatprep.mubr.f32.mxu0 %v450_v37  ;;  %v220_v22 = vrot.slane %v5069_v0, %v187_v63  ;;  %v228_v23 = vrot.slane %v5069_v0, %v195_v1  ;;  %v4081_v63 = vpack.c.bf16 %v1120_v15, %v1116_v9 }
 0x20f   :  { %v910_v10 = vcombine.low %v902_v3, %v909_v4  ;;  %v911_v11 = vcombine.low %v5131_v53, %v5140_v5  ;;  %v912_v12 = vcombine.low %v5133_v54, %v5142_v6  ;;  %2719 = vmatprep.mubr.f32.mxu1 %v450_v37  ;;  %v660_v13 = vpop.f32.mrb[4].mxu0  ;;  %v731_v14 = vpop.f32.mrb[4].mxu1  ;;  %3564 = vmatprep.subr.bf16.mxu0 %v3563_v33  ;;  %v1126_v33 = vld [vmem:[#allocation9 + $0x4e0] sm:$0xff]  ;;  %v1132_v4 = vld [vmem:[#allocation9 + $0x510] sm:$0xff] }
 0x210   :  { %v5154_v17 = vadd.f32 %v660_v13, %v200_v32  ;;  %v5156_v18 = vadd.f32 %v731_v14, %v208_v38  ;;  %4076 = vmatprep.subr.bf16.mxu1 %v4075_v39  ;;  %v662_v19 = vpop.f32.mrb[5].mxu0  ;;  %v733_v21 = vpop.f32.mrb[5].mxu1  ;;  %v1122_v32 = vld [vmem:[#allocation9 + $0x4c0] sm:$0xff]  ;;  %v4083_v38 = vpack.c.bf16 %v1129_v25, %v1125_v24  ;;  %v1128_v39 = vld [vmem:[#allocation9 + $0x4f0] sm:$0xff]  ;;  %v1143_v13 = vld [vmem:[#allocation9 + $0x568] sm:$0xff] }
 0x211   :  { %966 = vst [vmem:[#allocation15] sm:$0xff] %v910_v10  ;;  %v919_v27 = vrot.slane %v911_v11, %v5088_v20  ;;  %v926_v28 = vrot.slane %v912_v12, %v5088_v20  ;;  %v5166_v30 = vadd.f32 %v662_v19, %v204_v40  ;;  %v5168_v31 = vadd.f32 %v733_v21, %v212_v41  ;;  %v1131_v40 = vld [vmem:[#allocation9 + $0x508] sm:$0xff]  ;;  %v1134_v3 = vld [vmem:[#allocation9 + $0x520] sm:$0xff]  ;;  %v1136_v11 = vld [vmem:[#allocation9 + $0x530] sm:$0xff] }
 0x212   :  { %3566 = vmatpush1.bf16.msra.mxu0 %v3565_v42  ;;  %4078 = vmatpush1.bf16.msra.mxu1 %v4077_v43  ;;  %v1135_v41 = vld [vmem:[#allocation9 + $0x528] sm:$0xff]  ;;  %v3573_v46 = vpack.c.bf16 %v1126_v33, %v1122_v32  ;;  %v4085_v57 = vpack.c.bf16 %v1128_v39, %v1124_v34  ;;  %v4087_v10 = vpack.c.bf16 %v1137_v48, %v1133_v47  ;;  %v1145_v14 = vld [vmem:[#allocation9 + $0x578] sm:$0xff]  ;;  %v1140_v24 = vld [vmem:[#allocation9 + $0x550] sm:$0xff] }
 0x213   :  { %3568 = vmatprep.subr.bf16.mxu0 %v3567_v49  ;;  %v927_v1 = vcombine.low %v919_v27, %v926_v28  ;;  %v928_v0 = vcombine.low %v5154_v17, %v5166_v30  ;;  %v929_v35 = vcombine.low %v5156_v18, %v5168_v31  ;;  %v802_v36 = vpop.f32.mrb[6].mxu0  ;;  %v873_v37 = vpop.f32.mrb[6].mxu1  ;;  %4080 = vmatprep.subr.bf16.mxu1 %v4079_v8  ;;  %v1139_v12 = vld [vmem:[#allocation9 + $0x548] sm:$0xff]  ;;  %v1144_v28 = vld [vmem:[#allocation9 + $0x570] sm:$0xff]  ;;  %v1154_v48 = vld [vmem:[#allocation9 + $0x5c0] sm:$0xff] }
 0x214   :  { %v5174_v42 = vadd.f32 %v802_v36, %v216_v2  ;;  %v5176_v43 = vadd.f32 %v873_v37, %v224_v7  ;;  %v804_v44 = vpop.f32.mrb[7].mxu0  ;;  %v875_v45 = vpop.f32.mrb[7].mxu1  ;;  %v3575_v62 = vpack.c.bf16 %v1135_v41, %v1131_v40  ;;  %v1130_v2 = vld [vmem:[#allocation9 + $0x500] sm:$0xff]  ;;  %v4089_v19 = vpack.c.bf16 %v1136_v11, %v1132_v4  ;;  %v1147_v32 = vld [vmem:[#allocation9 + $0x588] sm:$0xff]  ;;  %v1148_v36 = vld [vmem:[#allocation9 + $0x590] sm:$0xff] }
 0x215   :  { %967 = vst [vmem:[#allocation15 + $0x8] sm:$0xff] %v927_v1  ;;  %v936_v49 = vrot.slane %v928_v0, %v5088_v20  ;;  %v943_v50 = vrot.slane %v929_v35, %v5088_v20  ;;  %v5180_v51 = vadd.f32 %v804_v44, %v220_v22  ;;  %v5182_v52 = vadd.f32 %v875_v45, %v228_v23  ;;  %v1138_v22 = vld [vmem:[#allocation9 + $0x540] sm:$0xff]  ;;  %v1151_v33 = vld [vmem:[#allocation9 + $0x5a8] sm:$0xff]  ;;  %v1157_v41 = vld [vmem:[#allocation9 + $0x5d8] sm:$0xff] }
 0x216   :  { %3570 = vmatpush1.bf16.msra.mxu0 %v3569_v60  ;;  %4082 = vmatpush1.bf16.msra.mxu1 %v4081_v63  ;;  %v1141_v60 = vld [vmem:[#allocation9 + $0x558] sm:$0xff]  ;;  %v3577_v61 = vpack.c.bf16 %v1134_v3, %v1130_v2  ;;  %v3579_v21 = vpack.c.bf16 %v1143_v13, %v1139_v12  ;;  %v1142_v23 = vld [vmem:[#allocation9 + $0x560] sm:$0xff]  ;;  %v4093_v34 = vpack.c.bf16 %v1144_v28, %v1140_v24  ;;  %v1155_v39 = vld [vmem:[#allocation9 + $0x5c8] sm:$0xff] }
 0x217   :  { %3572 = vmatprep.subr.bf16.mxu0 %v3571_v26  ;;  %v944_v7 = vcombine.low %v936_v49, %v943_v50  ;;  %v945_v8 = vcombine.low %v5174_v42, %v5180_v51  ;;  %v946_v9 = vcombine.low %v5176_v43, %v5182_v52  ;;  %4084 = vmatprep.subr.bf16.mxu1 %v4083_v38  ;;  %v1149_v63 = vld [vmem:[#allocation9 + $0x598] sm:$0xff]  ;;  %v1146_v0 = vld [vmem:[#allocation9 + $0x580] sm:$0xff]  ;;  %v1152_v38 = vld [vmem:[#allocation9 + $0x5b0] sm:$0xff] }
 0x218   :  { %v4091_v27 = vpack.c.bf16 %v1145_v14, %v1141_v60  ;;  %v1153_v26 = vld [vmem:[#allocation9 + $0x5b8] sm:$0xff]  ;;  %v3583_v1 = vpack.c.bf16 %v1151_v33, %v1147_v32  ;;  %v1150_v35 = vld [vmem:[#allocation9 + $0x5a0] sm:$0xff]  ;;  %v1159_v40 = vld [vmem:[#allocation9 + $0x5e8] sm:$0xff] }
 0x219   :  { %968 = vst [vmem:[#allocation15 + $0x10] sm:$0xff] %v944_v7  ;;  %v953_v15 = vrot.slane %v945_v8, %v5088_v20  ;;  %v960_v16 = vrot.slane %v946_v9, %v5088_v20  ;;  %v3581_v20 = vpack.c.bf16 %v1142_v23, %v1138_v22  ;;  %v4095_v37 = vpack.c.bf16 %v1153_v26, %v1149_v63  ;;  %v1161_v44 = vld [vmem:[#allocation9 + $0x5f8] sm:$0xff]  ;;  %v1158_v49 = vld [vmem:[#allocation9 + $0x5e0] sm:$0xff]  ;;  %v1156_v50 = vld [vmem:[#allocation9 + $0x5d0] sm:$0xff] }
 0x21a   :  { %3574 = vmatpush1.bf16.msra.mxu0 %v3573_v46  ;;  %4086 = vmatpush1.bf16.msra.mxu1 %v4085_v57  ;;  %v3585_v45 = vpack.c.bf16 %v1150_v35, %v1146_v0  ;;  %v4097_v46 = vpack.c.bf16 %v1152_v38, %v1148_v36  ;;  %v3587_v47 = vpack.c.bf16 %v1159_v40, %v1155_v39  ;;  %v1163_v2 = vld [vmem:[#allocation9 + $0x608] sm:$0xff]  ;;  %v1165_v4 = vld [vmem:[#allocation9 + $0x618] sm:$0xff]  ;;  %v1162_v11 = vld [vmem:[#allocation9 + $0x600] sm:$0xff] }
 0x21b   :  { %3576 = vmatprep.subr.bf16.mxu0 %v3575_v62  ;;  %v961_v25 = vcombine.low %v953_v15, %v960_v16  ;;  %4088 = vmatprep.subr.bf16.mxu1 %v4087_v10  ;;  %v4099_v57 = vpack.c.bf16 %v1161_v44, %v1157_v41  ;;  %v1160_v62 = vld [vmem:[#allocation9 + $0x5f0] sm:$0xff]  ;;  %v1167_v3 = vld [vmem:[#allocation9 + $0x628] sm:$0xff]  ;;  %v1169_v7 = vld [vmem:[#allocation9 + $0x638] sm:$0xff]  ;;  %v3589_v8 = vpack.c.bf16 %v1158_v49, %v1154_v48 }
 0x21c   :  { %v4101_v9 = vpack.c.bf16 %v1160_v62, %v1156_v50  ;;  %v3591_v10 = vpack.c.bf16 %v1167_v3, %v1163_v2  ;;  %v1166_v12 = vld [vmem:[#allocation9 + $0x620] sm:$0xff]  ;;  %v1164_v13 = vld [vmem:[#allocation9 + $0x610] sm:$0xff]  ;;  %v4103_v60 = vpack.c.bf16 %v1169_v7, %v1165_v4  ;;  %v1171_v15 = vld [vmem:[#allocation9 + $0x648] sm:$0xff] }
 0x21d   :  { %969 = vst [vmem:[#allocation15 + $0x18] sm:$0xff] %v961_v25  ;;  %v1168_v14 = vld [vmem:[#allocation9 + $0x630] sm:$0xff]  ;;  %v1175_v16 = vld [vmem:[#allocation9 + $0x668] sm:$0xff]  ;;  %v1170_v24 = vld [vmem:[#allocation9 + $0x640] sm:$0xff] }
 0x21e   :  { %3578 = vmatpush1.bf16.msra.mxu0 %v3577_v61  ;;  %4090 = vmatpush1.bf16.msra.mxu1 %v4089_v19  ;;  %v1173_v61 = vld [vmem:[#allocation9 + $0x658] sm:$0xff]  ;;  %v4105_v22 = vpack.c.bf16 %v1168_v14, %v1164_v13  ;;  %v3595_v23 = vpack.c.bf16 %v1175_v16, %v1171_v15  ;;  %v1174_v25 = vld [vmem:[#allocation9 + $0x660] sm:$0xff]  ;;  %v1176_v32 = vld [vmem:[#allocation9 + $0x670] sm:$0xff] }
 0x21f   :  { %3580 = vmatprep.subr.bf16.mxu0 %v3579_v21  ;;  %4092 = vmatprep.subr.bf16.mxu1 %v4091_v27  ;;  %v1177_v19 = vld [vmem:[#allocation9 + $0x678] sm:$0xff]  ;;  %v3593_v21 = vpack.c.bf16 %v1166_v12, %v1162_v11  ;;  %v1172_v27 = vld [vmem:[#allocation9 + $0x650] sm:$0xff]  ;;  %v1179_v33 = vld [vmem:[#allocation9 + $0x688] sm:$0xff] }
 0x220   :  { %v4107_v28 = vpack.c.bf16 %v1177_v19, %v1173_v61  ;;  %v1183_v63 = vld [vmem:[#allocation9 + $0x6a8] sm:$0xff]  ;;  %v1181_v26 = vld [vmem:[#allocation9 + $0x698] sm:$0xff]  ;;  %v1178_v35 = vld [vmem:[#allocation9 + $0x680] sm:$0xff] }
 0x221   :  { %v3599_v0 = vpack.c.bf16 %v1183_v63, %v1179_v33  ;;  %v1182_v36 = vld [vmem:[#allocation9 + $0x6a0] sm:$0xff]  ;;  %v1184_v39 = vld [vmem:[#allocation9 + $0x6b0] sm:$0xff]  ;;  %v1187_v40 = vld [vmem:[#allocation9 + $0x6c8] sm:$0xff] }
 0x222   :  { %3582 = vmatpush1.bf16.msra.mxu0 %v3581_v20  ;;  %4094 = vmatpush1.bf16.msra.mxu1 %v4093_v34  ;;  %v1185_v20 = vld [vmem:[#allocation9 + $0x6b8] sm:$0xff]  ;;  %v3597_v34 = vpack.c.bf16 %v1174_v25, %v1170_v24  ;;  %v1191_v41 = vld [vmem:[#allocation9 + $0x6e8] sm:$0xff]  ;;  %v1186_v49 = vld [vmem:[#allocation9 + $0x6c0] sm:$0xff] }
 0x223   :  { %3584 = vmatprep.subr.bf16.mxu0 %v3583_v1  ;;  %4096 = vmatprep.subr.bf16.mxu1 %v4095_v37  ;;  %v4109_v1 = vpack.c.bf16 %v1176_v32, %v1172_v27  ;;  %v1180_v37 = vld [vmem:[#allocation9 + $0x690] sm:$0xff]  ;;  %v4111_v38 = vpack.c.bf16 %v1185_v20, %v1181_v26  ;;  %v1189_v44 = vld [vmem:[#allocation9 + $0x6d8] sm:$0xff]  ;;  %v3603_v48 = vpack.c.bf16 %v1191_v41, %v1187_v40  ;;  %v1190_v50 = vld [vmem:[#allocation9 + $0x6e0] sm:$0xff] }
 0x224   :  { %v1192_v2 = vld [vmem:[#allocation9 + $0x6f0] sm:$0xff]  ;;  %v1195_v3 = vld [vmem:[#allocation9 + $0x708] sm:$0xff]  ;;  %v1197_v7 = vld [vmem:[#allocation9 + $0x718] sm:$0xff] }
 0x225   :  { %v1199_v4 = vld [vmem:[#allocation9 + $0x728] sm:$0xff]  ;;  %v1194_v12 = vld [vmem:[#allocation9 + $0x700] sm:$0xff]  ;;  %v1200_v15 = vld [vmem:[#allocation9 + $0x730] sm:$0xff] }
 0x226   :  { %3586 = vmatpush1.bf16.msra.mxu0 %v3585_v45  ;;  %4098 = vmatpush1.bf16.msra.mxu1 %v4097_v46  ;;  %v1193_v45 = vld [vmem:[#allocation9 + $0x6f8] sm:$0xff]  ;;  %v3601_v46 = vpack.c.bf16 %v1182_v36, %v1178_v35  ;;  %v3607_v11 = vpack.c.bf16 %v1199_v4, %v1195_v3  ;;  %v1198_v13 = vld [vmem:[#allocation9 + $0x720] sm:$0xff]  ;;  %v1203_v16 = vld [vmem:[#allocation9 + $0x748] sm:$0xff] }
 0x227   :  { %3588 = vmatprep.subr.bf16.mxu0 %v3587_v47  ;;  %4100 = vmatprep.subr.bf16.mxu1 %v4099_v57  ;;  %v4113_v47 = vpack.c.bf16 %v1184_v39, %v1180_v37  ;;  %v1188_v57 = vld [vmem:[#allocation9 + $0x6d0] sm:$0xff]  ;;  %v4115_v62 = vpack.c.bf16 %v1193_v45, %v1189_v44  ;;  %v1207_v61 = vld [vmem:[#allocation9 + $0x768] sm:$0xff]  ;;  %v1205_v19 = vld [vmem:[#allocation9 + $0x758] sm:$0xff] }
 0x228   :  { %v3611_v24 = vpack.c.bf16 %v1207_v61, %v1203_v16  ;;  %v1202_v25 = vld [vmem:[#allocation9 + $0x740] sm:$0xff]  ;;  %v1208_v33 = vld [vmem:[#allocation9 + $0x770] sm:$0xff]  ;;  %v1211_v63 = vld [vmem:[#allocation9 + $0x788] sm:$0xff] }
 0x229   :  { %v1206_v27 = vld [vmem:[#allocation9 + $0x760] sm:$0xff]  ;;  %v1215_v26 = vld [vmem:[#allocation9 + $0x7a8] sm:$0xff]  ;;  %v1213_v20 = vld [vmem:[#allocation9 + $0x798] sm:$0xff] }
 0x22a   :  { %3590 = vmatpush1.bf16.msra.mxu0 %v3589_v8  ;;  %4102 = vmatpush1.bf16.msra.mxu1 %v4101_v9  ;;  %v1201_v8 = vld [vmem:[#allocation9 + $0x738] sm:$0xff]  ;;  %v3605_v9 = vpack.c.bf16 %v1190_v50, %v1186_v49  ;;  %v3615_v35 = vpack.c.bf16 %v1215_v26, %v1211_v63  ;;  %v1210_v36 = vld [vmem:[#allocation9 + $0x780] sm:$0xff]  ;;  %v1216_v40 = vld [vmem:[#allocation9 + $0x7b0] sm:$0xff] }
 0x22b   :  { %3592 = vmatprep.subr.bf16.mxu0 %v3591_v10  ;;  %4104 = vmatprep.subr.bf16.mxu1 %v4103_v60  ;;  %v4117_v10 = vpack.c.bf16 %v1192_v2, %v1188_v57  ;;  %v1196_v60 = vld [vmem:[#allocation9 + $0x710] sm:$0xff]  ;;  %v4119_v14 = vpack.c.bf16 %v1201_v8, %v1197_v7  ;;  %v1214_v37 = vld [vmem:[#allocation9 + $0x7a0] sm:$0xff]  ;;  %v1219_v41 = vld [vmem:[#allocation9 + $0x7c8] sm:$0xff] }
 0x22c   :  { %v1223_v44 = vld [vmem:[#allocation9 + $0x7e8] sm:$0xff]  ;;  %v1221_v45 = vld [vmem:[#allocation9 + $0x7d8] sm:$0xff]  ;;  %v1218_v50 = vld [vmem:[#allocation9 + $0x7c0] sm:$0xff] }
 0x22d   :  { %v3619_v49 = vpack.c.bf16 %v1223_v44, %v1219_v41  ;;  %v1222_v57 = vld [vmem:[#allocation9 + $0x7e0] sm:$0xff]  ;;  %v1224_v3 = vld [vmem:[#allocation9 + $0x7f0] sm:$0xff]  ;;  %v1227_v4 = vld [vmem:[#allocation9 + $0x808] sm:$0xff] }
 0x22e   :  { %3594 = vmatpush1.bf16.msra.mxu0 %v3593_v21  ;;  %4106 = vmatpush1.bf16.msra.mxu1 %v4105_v22  ;;  %v1209_v21 = vld [vmem:[#allocation9 + $0x778] sm:$0xff]  ;;  %v3609_v22 = vpack.c.bf16 %v1198_v13, %v1194_v12  ;;  %v1231_v7 = vld [vmem:[#allocation9 + $0x828] sm:$0xff]  ;;  %v1226_v13 = vld [vmem:[#allocation9 + $0x800] sm:$0xff] }
 0x22f   :  { %3596 = vmatprep.subr.bf16.mxu0 %v3595_v23  ;;  %4108 = vmatprep.subr.bf16.mxu1 %v4107_v28  ;;  %v4121_v23 = vpack.c.bf16 %v1200_v15, %v1196_v60  ;;  %v1204_v28 = vld [vmem:[#allocation9 + $0x750] sm:$0xff]  ;;  %v4123_v32 = vpack.c.bf16 %v1209_v21, %v1205_v19  ;;  %v1229_v8 = vld [vmem:[#allocation9 + $0x818] sm:$0xff]  ;;  %v3623_v12 = vpack.c.bf16 %v1231_v7, %v1227_v4  ;;  %v1230_v60 = vld [vmem:[#allocation9 + $0x820] sm:$0xff] }
 0x230   :  { %v1228_v15 = vld [vmem:[#allocation9 + $0x810] sm:$0xff]  ;;  %v1235_v61 = vld [vmem:[#allocation9 + $0x848] sm:$0xff]  ;;  %v3625_v21 = vpack.c.bf16 %v1230_v60, %v1226_v13  ;;  %v1261_v7 = vld [vmem:[#allocation9 + $0x918] sm:$0xff] }
 0x231   :  { %v1232_v16 = vld [vmem:[#allocation9 + $0x830] sm:$0xff]  ;;  %v1239_v19 = vld [vmem:[#allocation9 + $0x868] sm:$0xff]  ;;  %v1262_v13 = vld [vmem:[#allocation9 + $0x920] sm:$0xff] }
 0x232   :  { %3598 = vmatpush1.bf16.msra.mxu0 %v3597_v34  ;;  %4110 = vmatpush1.bf16.msra.mxu1 %v4109_v1  ;;  %v1217_v34 = vld [vmem:[#allocation9 + $0x7b8] sm:$0xff]  ;;  %v3613_v1 = vpack.c.bf16 %v1206_v27, %v1202_v25  ;;  %v1234_v25 = vld [vmem:[#allocation9 + $0x840] sm:$0xff]  ;;  %v1243_v63 = vld [vmem:[#allocation9 + $0x888] sm:$0xff] }
 0x233   :  { %3600 = vmatprep.subr.bf16.mxu0 %v3599_v0  ;;  %4112 = vmatprep.subr.bf16.mxu1 %v4111_v38  ;;  %v4125_v0 = vpack.c.bf16 %v1208_v33, %v1204_v28  ;;  %v1212_v38 = vld [vmem:[#allocation9 + $0x790] sm:$0xff]  ;;  %v4127_v39 = vpack.c.bf16 %v1217_v34, %v1213_v20  ;;  %v1238_v27 = vld [vmem:[#allocation9 + $0x860] sm:$0xff]  ;;  %v1247_v26 = vld [vmem:[#allocation9 + $0x8a8] sm:$0xff] }
 0x234   :  { %v1236_v28 = vld [vmem:[#allocation9 + $0x850] sm:$0xff]  ;;  %v1245_v34 = vld [vmem:[#allocation9 + $0x898] sm:$0xff]  ;;  %v1251_v44 = vld [vmem:[#allocation9 + $0x8c8] sm:$0xff] }
 0x235   :  { %v1240_v33 = vld [vmem:[#allocation9 + $0x870] sm:$0xff]  ;;  %v1263_v4 = vld [vmem:[#allocation9 + $0x928] sm:$0xff] }
 0x236   :  { %3602 = vmatpush1.bf16.msra.mxu0 %v3601_v46  ;;  %4114 = vmatpush1.bf16.msra.mxu1 %v4113_v47  ;;  %v1225_v46 = vld [vmem:[#allocation9 + $0x7f8] sm:$0xff]  ;;  %v3617_v47 = vpack.c.bf16 %v1214_v37, %v1210_v36  ;;  %v3631_v36 = vpack.c.bf16 %v1247_v26, %v1243_v63  ;;  %v1242_v37 = vld [vmem:[#allocation9 + $0x880] sm:$0xff]  ;;  %v1248_v41 = vld [vmem:[#allocation9 + $0x8b0] sm:$0xff] }
 0x237   :  { %3604 = vmatprep.subr.bf16.mxu0 %v3603_v48  ;;  %4116 = vmatprep.subr.bf16.mxu1 %v4115_v62  ;;  %v4129_v48 = vpack.c.bf16 %v1216_v40, %v1212_v38  ;;  %v1220_v62 = vld [vmem:[#allocation9 + $0x7d0] sm:$0xff]  ;;  %v4131_v2 = vpack.c.bf16 %v1225_v46, %v1221_v45  ;;  %v1246_v38 = vld [vmem:[#allocation9 + $0x8a0] sm:$0xff]  ;;  %v1255_v45 = vld [vmem:[#allocation9 + $0x8e8] sm:$0xff] }
 0x238   :  { %v1253_v46 = vld [vmem:[#allocation9 + $0x8d8] sm:$0xff]  ;;  %v1260_v60 = vld [vmem:[#allocation9 + $0x910] sm:$0xff]  ;;  %v1275_v63 = vld [vmem:[#allocation9 + $0x988] sm:$0xff] }
 0x239   :  { %v1279_v26 = vld [vmem:[#allocation9 + $0x9a8] sm:$0xff] }
 0x23a   :  { %3606 = vmatpush1.bf16.msra.mxu0 %v3605_v9  ;;  %4118 = vmatpush1.bf16.msra.mxu1 %v4117_v10  ;;  %v1233_v9 = vld [vmem:[#allocation9 + $0x838] sm:$0xff]  ;;  %v3621_v10 = vpack.c.bf16 %v1222_v57, %v1218_v50  ;;  %v1250_v50 = vld [vmem:[#allocation9 + $0x8c0] sm:$0xff] }
 0x23b   :  { %3608 = vmatprep.subr.bf16.mxu0 %v3607_v11  ;;  %4120 = vmatprep.subr.bf16.mxu1 %v4119_v14  ;;  %v4133_v11 = vpack.c.bf16 %v1224_v3, %v1220_v62  ;;  %v4135_v14 = vpack.c.bf16 %v1233_v9, %v1229_v8  ;;  %v1254_v57 = vld [vmem:[#allocation9 + $0x8e0] sm:$0xff]  ;;  %v1252_v62 = vld [vmem:[#allocation9 + $0x8d0] sm:$0xff]  ;;  %v1259_v3 = vld [vmem:[#allocation9 + $0x908] sm:$0xff] }
 0x23c   :  { %v1265_v8 = vld [vmem:[#allocation9 + $0x938] sm:$0xff]  ;;  %v3637_v9 = vpack.c.bf16 %v1254_v57, %v1250_v50  ;;  %v1286_v50 = vld [vmem:[#allocation9 + $0x9e0] sm:$0xff]  ;;  %v1284_v57 = vld [vmem:[#allocation9 + $0x9d0] sm:$0xff] }
 0x23e   :  { %3610 = vmatpush1.bf16.msra.mxu0 %v3609_v22  ;;  %4122 = vmatpush1.bf16.msra.mxu1 %v4121_v23  ;;  %v1237_v22 = vld [vmem:[#allocation9 + $0x858] sm:$0xff] }
 0x23f   :  { %3612 = vmatprep.subr.bf16.mxu0 %v3611_v24  ;;  %4124 = vmatprep.subr.bf16.mxu1 %v4123_v32  ;;  %v1241_v23 = vld [vmem:[#allocation9 + $0x878] sm:$0xff]  ;;  %v4137_v24 = vpack.c.bf16 %v1232_v16, %v1228_v15  ;;  %v3627_v32 = vpack.c.bf16 %v1239_v19, %v1235_v61  ;;  %v1264_v15 = vld [vmem:[#allocation9 + $0x930] sm:$0xff]  ;;  %v1267_v16 = vld [vmem:[#allocation9 + $0x948] sm:$0xff] }
 0x240   :  { %v4139_v20 = vpack.c.bf16 %v1241_v23, %v1237_v22  ;;  %v1271_v61 = vld [vmem:[#allocation9 + $0x968] sm:$0xff]  ;;  %v1269_v19 = vld [vmem:[#allocation9 + $0x958] sm:$0xff]  ;;  %v4153_v23 = vpack.c.bf16 %v1264_v15, %v1260_v60 }
 0x241   :  { %v1299_v15 = vld [vmem:[#allocation9 + $0xa48] sm:$0xff] }
 0x242   :  { %3614 = vmatpush1.bf16.msra.mxu0 %v3613_v1  ;;  %4126 = vmatpush1.bf16.msra.mxu1 %v4125_v0  ;;  %v1249_v1 = vld [vmem:[#allocation9 + $0x8b8] sm:$0xff]  ;;  %v3629_v0 = vpack.c.bf16 %v1238_v27, %v1234_v25  ;;  %v1266_v25 = vld [vmem:[#allocation9 + $0x940] sm:$0xff] }
 0x243   :  { %3616 = vmatprep.subr.bf16.mxu0 %v3615_v35  ;;  %4128 = vmatprep.subr.bf16.mxu1 %v4127_v39  ;;  %v4141_v35 = vpack.c.bf16 %v1240_v33, %v1236_v28  ;;  %v1244_v39 = vld [vmem:[#allocation9 + $0x890] sm:$0xff]  ;;  %v4143_v40 = vpack.c.bf16 %v1249_v1, %v1245_v34  ;;  %v1270_v27 = vld [vmem:[#allocation9 + $0x960] sm:$0xff]  ;;  %v1281_v34 = vld [vmem:[#allocation9 + $0x9b8] sm:$0xff] }
 0x244   :  { %v1268_v28 = vld [vmem:[#allocation9 + $0x950] sm:$0xff]  ;;  %v3645_v1 = vpack.c.bf16 %v1270_v27, %v1266_v25  ;;  %v1302_v25 = vld [vmem:[#allocation9 + $0xa60] sm:$0xff] }
 0x245   :  { %v1272_v33 = vld [vmem:[#allocation9 + $0x970] sm:$0xff] }
 0x246   :  { %3618 = vmatpush1.bf16.msra.mxu0 %v3617_v47  ;;  %4130 = vmatpush1.bf16.msra.mxu1 %v4129_v48  ;;  %v3633_v47 = vpack.c.bf16 %v1246_v38, %v1242_v37  ;;  %v4145_v48 = vpack.c.bf16 %v1248_v41, %v1244_v39  ;;  %v1278_v37 = vld [vmem:[#allocation9 + $0x9a0] sm:$0xff]  ;;  %v1276_v38 = vld [vmem:[#allocation9 + $0x990] sm:$0xff]  ;;  %v1283_v41 = vld [vmem:[#allocation9 + $0x9c8] sm:$0xff] }
 0x247   :  { %3620 = vmatprep.subr.bf16.mxu0 %v3619_v49  ;;  %4132 = vmatprep.subr.bf16.mxu1 %v4131_v2  ;;  %v3635_v49 = vpack.c.bf16 %v1255_v45, %v1251_v44  ;;  %v1287_v44 = vld [vmem:[#allocation9 + $0x9e8] sm:$0xff]  ;;  %v1285_v45 = vld [vmem:[#allocation9 + $0x9d8] sm:$0xff]  ;;  %v1300_v27 = vld [vmem:[#allocation9 + $0xa50] sm:$0xff] }
 0x24a   :  { %3622 = vmatpush1.bf16.msra.mxu0 %v3621_v10  ;;  %4134 = vmatpush1.bf16.msra.mxu1 %v4133_v11  ;;  %v3639_v11 = vpack.c.bf16 %v1263_v4, %v1259_v3  ;;  %v1295_v3 = vld [vmem:[#allocation9 + $0xa28] sm:$0xff]  ;;  %v1293_v4 = vld [vmem:[#allocation9 + $0xa18] sm:$0xff] }
 0x24b   :  { %3624 = vmatprep.subr.bf16.mxu0 %v3623_v12  ;;  %4136 = vmatprep.subr.bf16.mxu1 %v4135_v14  ;;  %v1258_v12 = vld [vmem:[#allocation9 + $0x900] sm:$0xff]  ;;  %v4151_v14 = vpack.c.bf16 %v1265_v8, %v1261_v7  ;;  %v1297_v7 = vld [vmem:[#allocation9 + $0xa38] sm:$0xff] }
 0x24c   :  { %v3641_v22 = vpack.c.bf16 %v1262_v13, %v1258_v12  ;;  %v1294_v12 = vld [vmem:[#allocation9 + $0xa20] sm:$0xff]  ;;  %v1292_v13 = vld [vmem:[#allocation9 + $0xa10] sm:$0xff]  ;;  %v4167_v60 = vpack.c.bf16 %v1297_v7, %v1293_v4  ;;  %v1329_v4 = vld [vmem:[#allocation9 + $0xb38] sm:$0xff] }
 0x24d   :  { %2152 = vmatmul.mubr.f32.vlgmr.msra.gmra.mrb[8].mxu0 %v5100_v29  ;;  %2720 = vmatmul.mubr.f32.vlgmr.msra.gmra.mrb[8].mxu1 %v5100_v29  ;;  %v1257_v29 = vld [vmem:[#allocation9 + $0x8f8] sm:$0xff] }
 0x24e   :  { %3626 = vmatpush1.bf16.msra.mxu0 %v3625_v21  ;;  %2222 = vmatprep.mubr.f32.mxu0 %v5140_v5  ;;  %v4147_v2 = vpack.c.bf16 %v1257_v29, %v1253_v46  ;;  %v1273_v21 = vld [vmem:[#allocation9 + $0x978] sm:$0xff] }
 0x24f   :  { %4138 = vmatpush1.bf16.msra.mxu1 %v4137_v24  ;;  %2790 = vmatprep.mubr.f32.mxu1 %v5140_v5  ;;  %v1256_v5 = vld [vmem:[#allocation9 + $0x8f0] sm:$0xff]  ;;  %v3643_v24 = vpack.c.bf16 %v1271_v61, %v1267_v16  ;;  %v1289_v46 = vld [vmem:[#allocation9 + $0x9f8] sm:$0xff]  ;;  %v1303_v16 = vld [vmem:[#allocation9 + $0xa68] sm:$0xff] }
 0x250   :  { %3628 = vmatprep.subr.bf16.mxu0 %v3627_v32  ;;  %4140 = vmatprep.subr.bf16.mxu1 %v4139_v20  ;;  %v4149_v10 = vpack.c.bf16 %v1256_v5, %v1252_v62  ;;  %v4155_v32 = vpack.c.bf16 %v1273_v21, %v1269_v19  ;;  %v1277_v20 = vld [vmem:[#allocation9 + $0x998] sm:$0xff]  ;;  %v4163_v62 = vpack.c.bf16 %v1289_v46, %v1285_v45  ;;  %v1291_v5 = vld [vmem:[#allocation9 + $0xa08] sm:$0xff] }
 0x251   :  { %v4159_v39 = vpack.c.bf16 %v1281_v34, %v1277_v20  ;;  %v1301_v61 = vld [vmem:[#allocation9 + $0xa58] sm:$0xff] }
 0x252   :  { %3630 = vmatpush1.bf16.msra.mxu0 %v3629_v0  ;;  %v4157_v0 = vpack.c.bf16 %v1272_v33, %v1268_v28  ;;  %v1305_v19 = vld [vmem:[#allocation9 + $0xa78] sm:$0xff]  ;;  %v1307_v33 = vld [vmem:[#allocation9 + $0xa88] sm:$0xff] }
 0x253   :  { %4142 = vmatpush1.bf16.msra.mxu1 %v4141_v35  ;;  %3632 = vmatprep.subr.bf16.mxu0 %v3631_v36  ;;  %v3647_v35 = vpack.c.bf16 %v1279_v26, %v1275_v63  ;;  %v1274_v36 = vld [vmem:[#allocation9 + $0x980] sm:$0xff]  ;;  %v4171_v28 = vpack.c.bf16 %v1305_v19, %v1301_v61  ;;  %v1311_v63 = vld [vmem:[#allocation9 + $0xaa8] sm:$0xff]  ;;  %v1309_v26 = vld [vmem:[#allocation9 + $0xa98] sm:$0xff] }
 0x254   :  { %4144 = vmatprep.subr.bf16.mxu1 %v4143_v40  ;;  %v1280_v40 = vld [vmem:[#allocation9 + $0x9b0] sm:$0xff]  ;;  %v3649_v29 = vpack.c.bf16 %v1278_v37, %v1274_v36  ;;  %v1313_v20 = vld [vmem:[#allocation9 + $0xab8] sm:$0xff]  ;;  %v1310_v36 = vld [vmem:[#allocation9 + $0xaa0] sm:$0xff] }
 0x255   :  { %v1308_v37 = vld [vmem:[#allocation9 + $0xa90] sm:$0xff]  ;;  %v1321_v45 = vld [vmem:[#allocation9 + $0xaf8] sm:$0xff] }
 0x256   :  { %3634 = vmatpush1.bf16.msra.mxu0 %v3633_v47  ;;  %v4161_v47 = vpack.c.bf16 %v1280_v40, %v1276_v38  ;;  %v4175_v38 = vpack.c.bf16 %v1313_v20, %v1309_v26  ;;  %v1315_v40 = vld [vmem:[#allocation9 + $0xac8] sm:$0xff]  ;;  %v1337_v61 = vld [vmem:[#allocation9 + $0xb78] sm:$0xff] }
 0x257   :  { %4146 = vmatpush1.bf16.msra.mxu1 %v4145_v48  ;;  %3636 = vmatprep.subr.bf16.mxu0 %v3635_v49  ;;  %v3651_v48 = vpack.c.bf16 %v1287_v44, %v1283_v41  ;;  %v1282_v49 = vld [vmem:[#allocation9 + $0x9c0] sm:$0xff]  ;;  %v1319_v41 = vld [vmem:[#allocation9 + $0xae8] sm:$0xff]  ;;  %v1317_v44 = vld [vmem:[#allocation9 + $0xad8] sm:$0xff] }
 0x258   :  { %4148 = vmatprep.subr.bf16.mxu1 %v4147_v2  ;;  %v1288_v2 = vld [vmem:[#allocation9 + $0x9f0] sm:$0xff]  ;;  %v3653_v8 = vpack.c.bf16 %v1286_v50, %v1282_v49  ;;  %v1318_v49 = vld [vmem:[#allocation9 + $0xae0] sm:$0xff]  ;;  %v1345_v26 = vld [vmem:[#allocation9 + $0xbb8] sm:$0xff] }
 0x259   :  { %v1316_v50 = vld [vmem:[#allocation9 + $0xad0] sm:$0xff] }
 0x25a   :  { %3638 = vmatpush1.bf16.msra.mxu0 %v3637_v9  ;;  %v4165_v9 = vpack.c.bf16 %v1288_v2, %v1284_v57  ;;  %v4179_v57 = vpack.c.bf16 %v1321_v45, %v1317_v44  ;;  %v1323_v2 = vld [vmem:[#allocation9 + $0xb08] sm:$0xff]  ;;  %v1353_v44 = vld [vmem:[#allocation9 + $0xbf8] sm:$0xff] }
 0x25b   :  { %4150 = vmatpush1.bf16.msra.mxu1 %v4149_v10  ;;  %3640 = vmatprep.subr.bf16.mxu0 %v3639_v11  ;;  %v3655_v10 = vpack.c.bf16 %v1295_v3, %v1291_v5  ;;  %v1290_v11 = vld [vmem:[#allocation9 + $0xa00] sm:$0xff]  ;;  %v1327_v5 = vld [vmem:[#allocation9 + $0xb28] sm:$0xff]  ;;  %v1325_v3 = vld [vmem:[#allocation9 + $0xb18] sm:$0xff] }
 0x25c   :  { %4152 = vmatprep.subr.bf16.mxu1 %v4151_v14  ;;  %v1296_v14 = vld [vmem:[#allocation9 + $0xa30] sm:$0xff]  ;;  %v3657_v21 = vpack.c.bf16 %v1294_v12, %v1290_v11  ;;  %v1326_v11 = vld [vmem:[#allocation9 + $0xb20] sm:$0xff] }
 0x25d   :  { %v1324_v12 = vld [vmem:[#allocation9 + $0xb10] sm:$0xff] }
 0x25e   :  { %3642 = vmatpush1.bf16.msra.mxu0 %v3641_v22  ;;  %v4169_v22 = vpack.c.bf16 %v1296_v14, %v1292_v13  ;;  %v4183_v13 = vpack.c.bf16 %v1329_v4, %v1325_v3  ;;  %v1331_v14 = vld [vmem:[#allocation9 + $0xb48] sm:$0xff]  ;;  %v1361_v3 = vld [vmem:[#allocation9 + $0xc38] sm:$0xff] }
 0x25f   :  { %4154 = vmatpush1.bf16.msra.mxu1 %v4153_v23  ;;  %3644 = vmatprep.subr.bf16.mxu0 %v3643_v24  ;;  %v3659_v23 = vpack.c.bf16 %v1303_v16, %v1299_v15  ;;  %v1298_v24 = vld [vmem:[#allocation9 + $0xa40] sm:$0xff]  ;;  %v1335_v15 = vld [vmem:[#allocation9 + $0xb68] sm:$0xff]  ;;  %v1333_v16 = vld [vmem:[#allocation9 + $0xb58] sm:$0xff] }
 0x260   :  { %4156 = vmatprep.subr.bf16.mxu1 %v4155_v32  ;;  %v1304_v32 = vld [vmem:[#allocation9 + $0xa70] sm:$0xff]  ;;  %v3661_v34 = vpack.c.bf16 %v1302_v25, %v1298_v24  ;;  %v1334_v24 = vld [vmem:[#allocation9 + $0xb60] sm:$0xff] }
 0x261   :  { %v1332_v25 = vld [vmem:[#allocation9 + $0xb50] sm:$0xff] }
 0x262   :  { %3646 = vmatpush1.bf16.msra.mxu0 %v3645_v1  ;;  %v4173_v1 = vpack.c.bf16 %v1304_v32, %v1300_v27  ;;  %v4187_v27 = vpack.c.bf16 %v1337_v61, %v1333_v16  ;;  %v1339_v32 = vld [vmem:[#allocation9 + $0xb88] sm:$0xff]  ;;  %v1365_v16 = vld [vmem:[#allocation9 + $0xc58] sm:$0xff] }
 0x263   :  { %4158 = vmatpush1.bf16.msra.mxu1 %v4157_v0  ;;  %3648 = vmatprep.subr.bf16.mxu0 %v3647_v35  ;;  %v3663_v0 = vpack.c.bf16 %v1311_v63, %v1307_v33  ;;  %v1306_v35 = vld [vmem:[#allocation9 + $0xa80] sm:$0xff]  ;;  %v1343_v33 = vld [vmem:[#allocation9 + $0xba8] sm:$0xff]  ;;  %v1341_v63 = vld [vmem:[#allocation9 + $0xb98] sm:$0xff] }
 0x264   :  { %4160 = vmatprep.subr.bf16.mxu1 %v4159_v39  ;;  %v1312_v39 = vld [vmem:[#allocation9 + $0xab0] sm:$0xff]  ;;  %v3665_v46 = vpack.c.bf16 %v1310_v36, %v1306_v35  ;;  %v1342_v35 = vld [vmem:[#allocation9 + $0xba0] sm:$0xff]  ;;  %v1369_v61 = vld [vmem:[#allocation9 + $0xc78] sm:$0xff] }
 0x265   :  { %v1340_v36 = vld [vmem:[#allocation9 + $0xb90] sm:$0xff] }
 0x266   :  { %3650 = vmatpush1.bf16.msra.mxu0 %v3649_v29  ;;  %v4177_v29 = vpack.c.bf16 %v1312_v39, %v1308_v37  ;;  %v4191_v37 = vpack.c.bf16 %v1345_v26, %v1341_v63  ;;  %v1347_v39 = vld [vmem:[#allocation9 + $0xbc8] sm:$0xff]  ;;  %v1377_v63 = vld [vmem:[#allocation9 + $0xcb8] sm:$0xff] }
 0x267   :  { %4162 = vmatpush1.bf16.msra.mxu1 %v4161_v47  ;;  %3652 = vmatprep.subr.bf16.mxu0 %v3651_v48  ;;  %v3667_v47 = vpack.c.bf16 %v1319_v41, %v1315_v40  ;;  %v1314_v48 = vld [vmem:[#allocation9 + $0xac0] sm:$0xff]  ;;  %v1351_v40 = vld [vmem:[#allocation9 + $0xbe8] sm:$0xff]  ;;  %v1349_v41 = vld [vmem:[#allocation9 + $0xbd8] sm:$0xff] }
 0x268   :  { %4164 = vmatprep.subr.bf16.mxu1 %v4163_v62  ;;  %v1320_v62 = vld [vmem:[#allocation9 + $0xaf0] sm:$0xff]  ;;  %v3669_v7 = vpack.c.bf16 %v1318_v49, %v1314_v48  ;;  %v1350_v48 = vld [vmem:[#allocation9 + $0xbe0] sm:$0xff] }
 0x269   :  { %v1348_v49 = vld [vmem:[#allocation9 + $0xbd0] sm:$0xff] }
 0x26a   :  { %3654 = vmatpush1.bf16.msra.mxu0 %v3653_v8  ;;  %v4181_v8 = vpack.c.bf16 %v1320_v62, %v1316_v50  ;;  %v4195_v50 = vpack.c.bf16 %v1353_v44, %v1349_v41  ;;  %v1355_v62 = vld [vmem:[#allocation9 + $0xc08] sm:$0xff] }
 0x26b   :  { %4166 = vmatpush1.bf16.msra.mxu1 %v4165_v9  ;;  %3656 = vmatprep.subr.bf16.mxu0 %v3655_v10  ;;  %v3671_v9 = vpack.c.bf16 %v1327_v5, %v1323_v2  ;;  %v1322_v10 = vld [vmem:[#allocation9 + $0xb00] sm:$0xff]  ;;  %v1359_v2 = vld [vmem:[#allocation9 + $0xc28] sm:$0xff]  ;;  %v1357_v5 = vld [vmem:[#allocation9 + $0xc18] sm:$0xff] }
 0x26c   :  { %4168 = vmatprep.subr.bf16.mxu1 %v4167_v60  ;;  %v1328_v60 = vld [vmem:[#allocation9 + $0xb30] sm:$0xff]  ;;  %v3673_v19 = vpack.c.bf16 %v1326_v11, %v1322_v10  ;;  %v1358_v10 = vld [vmem:[#allocation9 + $0xc20] sm:$0xff]  ;;  %v4199_v11 = vpack.c.bf16 %v1361_v3, %v1357_v5 }
 0x26e   :  { %3658 = vmatpush1.bf16.msra.mxu0 %v3657_v21  ;;  %v4185_v21 = vpack.c.bf16 %v1328_v60, %v1324_v12  ;;  %v1356_v12 = vld [vmem:[#allocation9 + $0xc10] sm:$0xff]  ;;  %v1363_v60 = vld [vmem:[#allocation9 + $0xc48] sm:$0xff] }
 0x26f   :  { %4170 = vmatpush1.bf16.msra.mxu1 %v4169_v22  ;;  %3660 = vmatprep.subr.bf16.mxu0 %v3659_v23  ;;  %v3675_v22 = vpack.c.bf16 %v1335_v15, %v1331_v14  ;;  %v1330_v23 = vld [vmem:[#allocation9 + $0xb40] sm:$0xff]  ;;  %v1367_v14 = vld [vmem:[#allocation9 + $0xc68] sm:$0xff] }
 0x270   :  { %4172 = vmatprep.subr.bf16.mxu1 %v4171_v28  ;;  %v1336_v28 = vld [vmem:[#allocation9 + $0xb70] sm:$0xff]  ;;  %v3677_v20 = vpack.c.bf16 %v1334_v24, %v1330_v23  ;;  %v3691_v24 = vpack.c.bf16 %v1367_v14, %v1363_v60  ;;  %v1401_v60 = vld [vmem:[#allocation9 + $0xd78] sm:$0xff] }
 0x271   :  { %v1364_v23 = vld [vmem:[#allocation9 + $0xc50] sm:$0xff] }
 0x272   :  { %3662 = vmatpush1.bf16.msra.mxu0 %v3661_v34  ;;  %v4189_v34 = vpack.c.bf16 %v1336_v28, %v1332_v25  ;;  %v1368_v25 = vld [vmem:[#allocation9 + $0xc70] sm:$0xff]  ;;  %v1375_v28 = vld [vmem:[#allocation9 + $0xca8] sm:$0xff] }
 0x273   :  { %4174 = vmatpush1.bf16.msra.mxu1 %v4173_v1  ;;  %3664 = vmatprep.subr.bf16.mxu0 %v3663_v0  ;;  %v3679_v1 = vpack.c.bf16 %v1343_v33, %v1339_v32  ;;  %v1338_v0 = vld [vmem:[#allocation9 + $0xb80] sm:$0xff]  ;;  %v4203_v32 = vpack.c.bf16 %v1369_v61, %v1365_v16  ;;  %v1373_v33 = vld [vmem:[#allocation9 + $0xc98] sm:$0xff] }
 0x274   :  { %4176 = vmatprep.subr.bf16.mxu1 %v4175_v38  ;;  %v1344_v38 = vld [vmem:[#allocation9 + $0xbb0] sm:$0xff]  ;;  %v3681_v45 = vpack.c.bf16 %v1342_v35, %v1338_v0  ;;  %v1374_v0 = vld [vmem:[#allocation9 + $0xca0] sm:$0xff] }
 0x275   :  { %v1372_v35 = vld [vmem:[#allocation9 + $0xc90] sm:$0xff]  ;;  %v1394_v61 = vld [vmem:[#allocation9 + $0xd40] sm:$0xff] }
 0x276   :  { %3666 = vmatpush1.bf16.msra.mxu0 %v3665_v46  ;;  %v4193_v46 = vpack.c.bf16 %v1344_v38, %v1340_v36  ;;  %v4207_v36 = vpack.c.bf16 %v1377_v63, %v1373_v33  ;;  %v1379_v38 = vld [vmem:[#allocation9 + $0xcc8] sm:$0xff] }
 0x277   :  { %4178 = vmatpush1.bf16.msra.mxu1 %v4177_v29  ;;  %3668 = vmatprep.subr.bf16.mxu0 %v3667_v47  ;;  %v3683_v29 = vpack.c.bf16 %v1351_v40, %v1347_v39  ;;  %v1346_v47 = vld [vmem:[#allocation9 + $0xbc0] sm:$0xff]  ;;  %v1383_v39 = vld [vmem:[#allocation9 + $0xce8] sm:$0xff]  ;;  %v1381_v40 = vld [vmem:[#allocation9 + $0xcd8] sm:$0xff] }
 0x278   :  { %4180 = vmatprep.subr.bf16.mxu1 %v4179_v57  ;;  %v1352_v57 = vld [vmem:[#allocation9 + $0xbf0] sm:$0xff]  ;;  %v3685_v4 = vpack.c.bf16 %v1350_v48, %v1346_v47 }
 0x279   :  { %v1380_v47 = vld [vmem:[#allocation9 + $0xcd0] sm:$0xff] }
 0x27a   :  { %3670 = vmatpush1.bf16.msra.mxu0 %v3669_v7  ;;  %v4197_v7 = vpack.c.bf16 %v1352_v57, %v1348_v49  ;;  %v1387_v49 = vld [vmem:[#allocation9 + $0xd08] sm:$0xff]  ;;  %v1389_v57 = vld [vmem:[#allocation9 + $0xd18] sm:$0xff] }
 0x27b   :  { %4182 = vmatpush1.bf16.msra.mxu1 %v4181_v8  ;;  %3672 = vmatprep.subr.bf16.mxu0 %v3671_v9  ;;  %v3687_v8 = vpack.c.bf16 %v1359_v2, %v1355_v62  ;;  %v1354_v9 = vld [vmem:[#allocation9 + $0xc00] sm:$0xff]  ;;  %v1393_v62 = vld [vmem:[#allocation9 + $0xd38] sm:$0xff] }
 0x27c   :  { %4184 = vmatprep.subr.bf16.mxu1 %v4183_v13  ;;  %v1360_v13 = vld [vmem:[#allocation9 + $0xc30] sm:$0xff]  ;;  %v3689_v15 = vpack.c.bf16 %v1358_v10, %v1354_v9  ;;  %v4215_v9 = vpack.c.bf16 %v1393_v62, %v1389_v57 }
 0x27d   :  { %v1392_v10 = vld [vmem:[#allocation9 + $0xd30] sm:$0xff] }
 0x27e   :  { %3674 = vmatpush1.bf16.msra.mxu0 %v3673_v19  ;;  %v4201_v19 = vpack.c.bf16 %v1360_v13, %v1356_v12  ;;  %v1399_v12 = vld [vmem:[#allocation9 + $0xd68] sm:$0xff]  ;;  %v1397_v13 = vld [vmem:[#allocation9 + $0xd58] sm:$0xff] }
 0x27f   :  { %4186 = vmatpush1.bf16.msra.mxu1 %v4185_v21  ;;  %3676 = vmatprep.subr.bf16.mxu0 %v3675_v22  ;;  %v1362_v21 = vld [vmem:[#allocation9 + $0xc40] sm:$0xff] }
 0x280   :  { %4188 = vmatprep.subr.bf16.mxu1 %v4187_v27  ;;  %v1366_v22 = vld [vmem:[#allocation9 + $0xc60] sm:$0xff]  ;;  %v1371_v27 = vld [vmem:[#allocation9 + $0xc88] sm:$0xff] }
 0x281   :  { %v3693_v26 = vpack.c.bf16 %v1366_v22, %v1362_v21  ;;  %v1396_v21 = vld [vmem:[#allocation9 + $0xd50] sm:$0xff]  ;;  %v4219_v22 = vpack.c.bf16 %v1401_v60, %v1397_v13 }
 0x282   :  { %3678 = vmatpush1.bf16.msra.mxu0 %v3677_v20  ;;  %v4205_v20 = vpack.c.bf16 %v1368_v25, %v1364_v23  ;;  %v1400_v23 = vld [vmem:[#allocation9 + $0xd70] sm:$0xff]  ;;  %v1407_v25 = vld [vmem:[#allocation9 + $0xda8] sm:$0xff] }
 0x283   :  { %4190 = vmatpush1.bf16.msra.mxu1 %v4189_v34  ;;  %3680 = vmatprep.subr.bf16.mxu0 %v3679_v1  ;;  %v3695_v34 = vpack.c.bf16 %v1375_v28, %v1371_v27  ;;  %v1370_v1 = vld [vmem:[#allocation9 + $0xc80] sm:$0xff]  ;;  %v1405_v27 = vld [vmem:[#allocation9 + $0xd98] sm:$0xff]  ;;  %v4221_v33 = vpack.c.bf16 %v1400_v23, %v1396_v21  ;;  %v1435_v21 = vld [vmem:[#allocation9 + $0xe88] sm:$0xff] }
 0x284   :  { %4192 = vmatprep.subr.bf16.mxu1 %v4191_v37  ;;  %v1376_v37 = vld [vmem:[#allocation9 + $0xcb0] sm:$0xff]  ;;  %v3697_v41 = vpack.c.bf16 %v1374_v0, %v1370_v1  ;;  %v1409_v28 = vld [vmem:[#allocation9 + $0xdb8] sm:$0xff] }
 0x285   :  { %v4209_v44 = vpack.c.bf16 %v1376_v37, %v1372_v35  ;;  %v4223_v1 = vpack.c.bf16 %v1409_v28, %v1405_v27  ;;  %v1408_v0 = vld [vmem:[#allocation9 + $0xdb0] sm:$0xff]  ;;  %v1411_v35 = vld [vmem:[#allocation9 + $0xdc8] sm:$0xff]  ;;  %v1413_v37 = vld [vmem:[#allocation9 + $0xdd8] sm:$0xff] }
 0x286   :  { %3682 = vmatpush1.bf16.msra.mxu0 %v3681_v45  ;;  %v3699_v45 = vpack.c.bf16 %v1383_v39, %v1379_v38  ;;  %v1417_v38 = vld [vmem:[#allocation9 + $0xdf8] sm:$0xff] }
 0x287   :  { %4194 = vmatpush1.bf16.msra.mxu1 %v4193_v46  ;;  %3684 = vmatprep.subr.bf16.mxu0 %v3683_v29  ;;  %v1378_v46 = vld [vmem:[#allocation9 + $0xcc0] sm:$0xff]  ;;  %v1437_v23 = vld [vmem:[#allocation9 + $0xe98] sm:$0xff] }
 0x288   :  { %4196 = vmatprep.subr.bf16.mxu1 %v4195_v50  ;;  %v1382_v29 = vld [vmem:[#allocation9 + $0xce0] sm:$0xff]  ;;  %v1391_v50 = vld [vmem:[#allocation9 + $0xd28] sm:$0xff] }
 0x289   :  { %v3701_v2 = vpack.c.bf16 %v1382_v29, %v1378_v46  ;;  %v3703_v3 = vpack.c.bf16 %v1391_v50, %v1387_v49  ;;  %v4227_v46 = vpack.c.bf16 %v1417_v38, %v1413_v37  ;;  %v1416_v29 = vld [vmem:[#allocation9 + $0xdf0] sm:$0xff]  ;;  %v1425_v49 = vld [vmem:[#allocation9 + $0xe38] sm:$0xff] }
 0x28a   :  { %3686 = vmatpush1.bf16.msra.mxu0 %v3685_v4  ;;  %v1386_v4 = vld [vmem:[#allocation9 + $0xd00] sm:$0xff] }
 0x28b   :  { %4198 = vmatpush1.bf16.msra.mxu1 %v4197_v7  ;;  %3688 = vmatprep.subr.bf16.mxu0 %v3687_v8  ;;  %v1390_v7 = vld [vmem:[#allocation9 + $0xd20] sm:$0xff]  ;;  %v1388_v8 = vld [vmem:[#allocation9 + $0xd10] sm:$0xff] }
 0x28c   :  { %4200 = vmatprep.subr.bf16.mxu1 %v4199_v11  ;;  %v1395_v11 = vld [vmem:[#allocation9 + $0xd48] sm:$0xff]  ;;  %v3705_v14 = vpack.c.bf16 %v1390_v7, %v1386_v4  ;;  %v1424_v7 = vld [vmem:[#allocation9 + $0xe30] sm:$0xff] }
 0x28d   :  { %2223 = vmatmul.mubr.f32.vlgmr.msra.gmra.mrb[8].mxu0 %v5131_v53  ;;  %v3707_v16 = vpack.c.bf16 %v1399_v12, %v1395_v11  ;;  %v1433_v11 = vld [vmem:[#allocation9 + $0xe78] sm:$0xff] }
 0x28e   :  { %2791 = vmatmul.mubr.f32.vlgmr.msra.gmra.mrb[8].mxu1 %v5131_v53  ;;  %3690 = vmatpush1.bf16.msra.mxu0 %v3689_v15  ;;  %v1385_v53 = vld [vmem:[#allocation9 + $0xcf8] sm:$0xff]  ;;  %v4217_v15 = vpack.c.bf16 %v1392_v10, %v1388_v8  ;;  %v1427_v8 = vld [vmem:[#allocation9 + $0xe48] sm:$0xff] }
 0x28f   :  { %2293 = vmatprep.mubr.f32.mxu0 %v5142_v6  ;;  %4202 = vmatpush1.bf16.msra.mxu1 %v4201_v19  ;;  %v4211_v48 = vpack.c.bf16 %v1385_v53, %v1381_v40  ;;  %v1398_v19 = vld [vmem:[#allocation9 + $0xd60] sm:$0xff]  ;;  %v1429_v10 = vld [vmem:[#allocation9 + $0xe58] sm:$0xff] }
 0x290   :  { %2861 = vmatprep.mubr.f32.mxu1 %v5142_v6  ;;  %3692 = vmatprep.subr.bf16.mxu0 %v3691_v24  ;;  %v1384_v6 = vld [vmem:[#allocation9 + $0xcf0] sm:$0xff]  ;;  %v1403_v24 = vld [vmem:[#allocation9 + $0xd88] sm:$0xff] }
 0x291   :  { %4204 = vmatprep.subr.bf16.mxu1 %v4203_v32  ;;  %v4213_v5 = vpack.c.bf16 %v1384_v6, %v1380_v47  ;;  %v3709_v32 = vpack.c.bf16 %v1398_v19, %v1394_v61  ;;  %v3711_v63 = vpack.c.bf16 %v1407_v25, %v1403_v24  ;;  %v1419_v47 = vld [vmem:[#allocation9 + $0xe08] sm:$0xff]  ;;  %v1421_v6 = vld [vmem:[#allocation9 + $0xe18] sm:$0xff]  ;;  %v4235_v61 = vpack.c.bf16 %v1433_v11, %v1429_v10  ;;  %v1432_v19 = vld [vmem:[#allocation9 + $0xe70] sm:$0xff] }
 0x292   :  { %3694 = vmatpush1.bf16.msra.mxu0 %v3693_v26  ;;  %v1402_v26 = vld [vmem:[#allocation9 + $0xd80] sm:$0xff]  ;;  %v4231_v4 = vpack.c.bf16 %v1425_v49, %v1421_v6  ;;  %v1441_v24 = vld [vmem:[#allocation9 + $0xeb8] sm:$0xff] }
 0x293   :  { %4206 = vmatpush1.bf16.msra.mxu1 %v4205_v20  ;;  %3696 = vmatprep.subr.bf16.mxu0 %v3695_v34  ;;  %v1406_v20 = vld [vmem:[#allocation9 + $0xda0] sm:$0xff]  ;;  %v1404_v34 = vld [vmem:[#allocation9 + $0xd90] sm:$0xff] }
 0x294   :  { %4208 = vmatprep.subr.bf16.mxu1 %v4207_v36  ;;  %v1415_v36 = vld [vmem:[#allocation9 + $0xde8] sm:$0xff]  ;;  %v3713_v39 = vpack.c.bf16 %v1406_v20, %v1402_v26  ;;  %v4225_v40 = vpack.c.bf16 %v1408_v0, %v1404_v34  ;;  %v4239_v26 = vpack.c.bf16 %v1441_v24, %v1437_v23  ;;  %v1440_v20 = vld [vmem:[#allocation9 + $0xeb0] sm:$0xff]  ;;  %v1445_v0 = vld [vmem:[#allocation9 + $0xed8] sm:$0xff] }
 0x295   :  { %v3715_v53 = vpack.c.bf16 %v1415_v36, %v1411_v35  ;;  %v1443_v34 = vld [vmem:[#allocation9 + $0xec8] sm:$0xff]  ;;  %v1449_v35 = vld [vmem:[#allocation9 + $0xef8] sm:$0xff] }
 0x296   :  { %3698 = vmatpush1.bf16.msra.mxu0 %v3697_v41  ;;  %v1410_v41 = vld [vmem:[#allocation9 + $0xdc0] sm:$0xff] }
 0x297   :  { %4210 = vmatpush1.bf16.msra.mxu1 %v4209_v44  ;;  %3700 = vmatprep.subr.bf16.mxu0 %v3699_v45  ;;  %v1414_v44 = vld [vmem:[#allocation9 + $0xde0] sm:$0xff]  ;;  %v1412_v45 = vld [vmem:[#allocation9 + $0xdd0] sm:$0xff] }
 0x298   :  { %4212 = vmatprep.subr.bf16.mxu1 %v4211_v48  ;;  %v1423_v48 = vld [vmem:[#allocation9 + $0xe28] sm:$0xff]  ;;  %v3717_v50 = vpack.c.bf16 %v1414_v44, %v1410_v41  ;;  %v4229_v57 = vpack.c.bf16 %v1416_v29, %v1412_v45  ;;  %v4243_v41 = vpack.c.bf16 %v1449_v35, %v1445_v0  ;;  %v1448_v44 = vld [vmem:[#allocation9 + $0xef0] sm:$0xff]  ;;  %v1453_v29 = vld [vmem:[#allocation9 + $0xf18] sm:$0xff] }
 0x299   :  { %v3719_v62 = vpack.c.bf16 %v1423_v48, %v1419_v47  ;;  %v1451_v45 = vld [vmem:[#allocation9 + $0xf08] sm:$0xff]  ;;  %v1457_v47 = vld [vmem:[#allocation9 + $0xf38] sm:$0xff] }
 0x29a   :  { %3702 = vmatpush1.bf16.msra.mxu0 %v3701_v2  ;;  %v1418_v2 = vld [vmem:[#allocation9 + $0xe00] sm:$0xff] }
 0x29b   :  { %4214 = vmatpush1.bf16.msra.mxu1 %v4213_v5  ;;  %3704 = vmatprep.subr.bf16.mxu0 %v3703_v3  ;;  %v1422_v5 = vld [vmem:[#allocation9 + $0xe20] sm:$0xff]  ;;  %v1420_v3 = vld [vmem:[#allocation9 + $0xe10] sm:$0xff] }
 0x29c   :  { %4216 = vmatprep.subr.bf16.mxu1 %v4215_v9  ;;  %v1431_v9 = vld [vmem:[#allocation9 + $0xe68] sm:$0xff]  ;;  %v3721_v12 = vpack.c.bf16 %v1422_v5, %v1418_v2  ;;  %v4233_v13 = vpack.c.bf16 %v1424_v7, %v1420_v3  ;;  %v4247_v2 = vpack.c.bf16 %v1457_v47, %v1453_v29  ;;  %v1456_v5 = vld [vmem:[#allocation9 + $0xf30] sm:$0xff]  ;;  %v1461_v7 = vld [vmem:[#allocation9 + $0xf58] sm:$0xff] }
 0x29d   :  { %v3723_v60 = vpack.c.bf16 %v1431_v9, %v1427_v8  ;;  %v1459_v3 = vld [vmem:[#allocation9 + $0xf48] sm:$0xff]  ;;  %v1465_v8 = vld [vmem:[#allocation9 + $0xf78] sm:$0xff] }
 0x29e   :  { %3706 = vmatpush1.bf16.msra.mxu0 %v3705_v14  ;;  %v1426_v14 = vld [vmem:[#allocation9 + $0xe40] sm:$0xff] }
 0x29f   :  { %4218 = vmatpush1.bf16.msra.mxu1 %v4217_v15  ;;  %3708 = vmatprep.subr.bf16.mxu0 %v3707_v16  ;;  %v1430_v15 = vld [vmem:[#allocation9 + $0xe60] sm:$0xff]  ;;  %v1428_v16 = vld [vmem:[#allocation9 + $0xe50] sm:$0xff] }
 0x2a0   :  { %4220 = vmatprep.subr.bf16.mxu1 %v4219_v22  ;;  %v1439_v22 = vld [vmem:[#allocation9 + $0xea8] sm:$0xff]  ;;  %v3725_v25 = vpack.c.bf16 %v1430_v15, %v1426_v14  ;;  %v4237_v27 = vpack.c.bf16 %v1432_v19, %v1428_v16  ;;  %v4251_v14 = vpack.c.bf16 %v1465_v8, %v1461_v7  ;;  %v1464_v15 = vld [vmem:[#allocation9 + $0xf70] sm:$0xff]  ;;  %v1469_v19 = vld [vmem:[#allocation9 + $0xf98] sm:$0xff] }
 0x2a1   :  { %v3727_v28 = vpack.c.bf16 %v1439_v22, %v1435_v21  ;;  %v1467_v16 = vld [vmem:[#allocation9 + $0xf88] sm:$0xff]  ;;  %v1473_v21 = vld [vmem:[#allocation9 + $0xfb8] sm:$0xff]  ;;  %v1490_v8 = vld [vmem:[#allocation9 + $0x1040] sm:$0xff] }
 0x2a2   :  { %3710 = vmatpush1.bf16.msra.mxu0 %v3709_v32  ;;  %v1434_v32 = vld [vmem:[#allocation9 + $0xe80] sm:$0xff] }
 0x2a3   :  { %4222 = vmatpush1.bf16.msra.mxu1 %v4221_v33  ;;  %3712 = vmatprep.subr.bf16.mxu0 %v3711_v63  ;;  %v1438_v33 = vld [vmem:[#allocation9 + $0xea0] sm:$0xff]  ;;  %v1436_v63 = vld [vmem:[#allocation9 + $0xe90] sm:$0xff] }
 0x2a4   :  { %4224 = vmatprep.subr.bf16.mxu1 %v4223_v1  ;;  %v1447_v1 = vld [vmem:[#allocation9 + $0xee8] sm:$0xff]  ;;  %v3729_v36 = vpack.c.bf16 %v1438_v33, %v1434_v32  ;;  %v4241_v37 = vpack.c.bf16 %v1440_v20, %v1436_v63  ;;  %v4255_v32 = vpack.c.bf16 %v1473_v21, %v1469_v19  ;;  %v1472_v33 = vld [vmem:[#allocation9 + $0xfb0] sm:$0xff]  ;;  %v1477_v20 = vld [vmem:[#allocation9 + $0xfd8] sm:$0xff] }
 0x2a5   :  { %v3731_v38 = vpack.c.bf16 %v1447_v1, %v1443_v34  ;;  %v1475_v63 = vld [vmem:[#allocation9 + $0xfc8] sm:$0xff]  ;;  %v1481_v34 = vld [vmem:[#allocation9 + $0xff8] sm:$0xff] }
 0x2a6   :  { %3714 = vmatpush1.bf16.msra.mxu0 %v3713_v39  ;;  %v1442_v39 = vld [vmem:[#allocation9 + $0xec0] sm:$0xff] }
 0x2a7   :  { %4226 = vmatpush1.bf16.msra.mxu1 %v4225_v40  ;;  %3716 = vmatprep.subr.bf16.mxu0 %v3715_v53  ;;  %v1446_v40 = vld [vmem:[#allocation9 + $0xee0] sm:$0xff]  ;;  %v1444_v53 = vld [vmem:[#allocation9 + $0xed0] sm:$0xff] }
 0x2a8   :  { %4228 = vmatprep.subr.bf16.mxu1 %v4227_v46  ;;  %v1455_v46 = vld [vmem:[#allocation9 + $0xf28] sm:$0xff]  ;;  %v3733_v48 = vpack.c.bf16 %v1446_v40, %v1442_v39  ;;  %v4245_v6 = vpack.c.bf16 %v1448_v44, %v1444_v53  ;;  %v4259_v39 = vpack.c.bf16 %v1481_v34, %v1477_v20  ;;  %v1480_v40 = vld [vmem:[#allocation9 + $0xff0] sm:$0xff]  ;;  %v1485_v44 = vld [vmem:[#allocation9 + $0x1018] sm:$0xff] }
 0x2a9   :  { %v3735_v49 = vpack.c.bf16 %v1455_v46, %v1451_v45  ;;  %v1483_v53 = vld [vmem:[#allocation9 + $0x1008] sm:$0xff]  ;;  %v1489_v45 = vld [vmem:[#allocation9 + $0x1038] sm:$0xff]  ;;  %v1506_v34 = vld [vmem:[#allocation9 + $0x10c0] sm:$0xff] }
 0x2aa   :  { %3718 = vmatpush1.bf16.msra.mxu0 %v3717_v50  ;;  %v1450_v50 = vld [vmem:[#allocation9 + $0xf00] sm:$0xff] }
 0x2ab   :  { %4230 = vmatpush1.bf16.msra.mxu1 %v4229_v57  ;;  %3720 = vmatprep.subr.bf16.mxu0 %v3719_v62  ;;  %v1454_v57 = vld [vmem:[#allocation9 + $0xf20] sm:$0xff]  ;;  %v1452_v62 = vld [vmem:[#allocation9 + $0xf10] sm:$0xff] }
 0x2ac   :  { %4232 = vmatprep.subr.bf16.mxu1 %v4231_v4  ;;  %v1463_v4 = vld [vmem:[#allocation9 + $0xf68] sm:$0xff]  ;;  %v3737_v9 = vpack.c.bf16 %v1454_v57, %v1450_v50  ;;  %v4249_v10 = vpack.c.bf16 %v1456_v5, %v1452_v62  ;;  %v1484_v50 = vld [vmem:[#allocation9 + $0x1010] sm:$0xff] }
 0x2ad   :  { %v3739_v11 = vpack.c.bf16 %v1463_v4, %v1459_v3  ;;  %v1488_v57 = vld [vmem:[#allocation9 + $0x1030] sm:$0xff]  ;;  %v1491_v62 = vld [vmem:[#allocation9 + $0x1048] sm:$0xff]  ;;  %v1493_v3 = vld [vmem:[#allocation9 + $0x1058] sm:$0xff] }
 0x2ae   :  { %3722 = vmatpush1.bf16.msra.mxu0 %v3721_v12  ;;  %v1458_v12 = vld [vmem:[#allocation9 + $0xf40] sm:$0xff]  ;;  %v1497_v4 = vld [vmem:[#allocation9 + $0x1078] sm:$0xff]  ;;  %v4265_v7 = vpack.c.bf16 %v1488_v57, %v1484_v50 }
 0x2af   :  { %4234 = vmatpush1.bf16.msra.mxu1 %v4233_v13  ;;  %3724 = vmatprep.subr.bf16.mxu0 %v3723_v60  ;;  %v1462_v13 = vld [vmem:[#allocation9 + $0xf60] sm:$0xff]  ;;  %v1460_v60 = vld [vmem:[#allocation9 + $0xf50] sm:$0xff]  ;;  %v1529_v50 = vld [vmem:[#allocation9 + $0x1178] sm:$0xff] }
 0x2b0   :  { %4236 = vmatprep.subr.bf16.mxu1 %v4235_v61  ;;  %v1471_v61 = vld [vmem:[#allocation9 + $0xfa8] sm:$0xff]  ;;  %v3741_v22 = vpack.c.bf16 %v1462_v13, %v1458_v12  ;;  %v4253_v23 = vpack.c.bf16 %v1464_v15, %v1460_v60  ;;  %v1496_v12 = vld [vmem:[#allocation9 + $0x1070] sm:$0xff]  ;;  %v1501_v15 = vld [vmem:[#allocation9 + $0x1098] sm:$0xff] }
 0x2b1   :  { %v3743_v24 = vpack.c.bf16 %v1471_v61, %v1467_v16  ;;  %v1499_v13 = vld [vmem:[#allocation9 + $0x1088] sm:$0xff]  ;;  %v1505_v16 = vld [vmem:[#allocation9 + $0x10b8] sm:$0xff] }
 0x2b2   :  { %3726 = vmatpush1.bf16.msra.mxu0 %v3725_v25  ;;  %v1466_v25 = vld [vmem:[#allocation9 + $0xf80] sm:$0xff]  ;;  %v1503_v60 = vld [vmem:[#allocation9 + $0x10a8] sm:$0xff] }
 0x2b3   :  { %4238 = vmatpush1.bf16.msra.mxu1 %v4237_v27  ;;  %3728 = vmatprep.subr.bf16.mxu0 %v3727_v28  ;;  %v1470_v27 = vld [vmem:[#allocation9 + $0xfa0] sm:$0xff]  ;;  %v1468_v28 = vld [vmem:[#allocation9 + $0xf90] sm:$0xff]  ;;  %v3759_v21 = vpack.c.bf16 %v1503_v60, %v1499_v13 }
 0x2b4   :  { %4240 = vmatprep.subr.bf16.mxu1 %v4239_v26  ;;  %v1479_v26 = vld [vmem:[#allocation9 + $0xfe8] sm:$0xff]  ;;  %v3745_v1 = vpack.c.bf16 %v1470_v27, %v1466_v25  ;;  %v4257_v0 = vpack.c.bf16 %v1472_v33, %v1468_v28  ;;  %v4271_v25 = vpack.c.bf16 %v1505_v16, %v1501_v15  ;;  %v1504_v27 = vld [vmem:[#allocation9 + $0x10b0] sm:$0xff]  ;;  %v1509_v33 = vld [vmem:[#allocation9 + $0x10d8] sm:$0xff] }
 0x2b5   :  { %v3747_v35 = vpack.c.bf16 %v1479_v26, %v1475_v63  ;;  %v1507_v28 = vld [vmem:[#allocation9 + $0x10c8] sm:$0xff]  ;;  %v1530_v15 = vld [vmem:[#allocation9 + $0x1180] sm:$0xff] }
 0x2b6   :  { %3730 = vmatpush1.bf16.msra.mxu0 %v3729_v36  ;;  %v1474_v36 = vld [vmem:[#allocation9 + $0xfc0] sm:$0xff] }
 0x2b7   :  { %4242 = vmatpush1.bf16.msra.mxu1 %v4241_v37  ;;  %3732 = vmatprep.subr.bf16.mxu0 %v3731_v38  ;;  %v1478_v37 = vld [vmem:[#allocation9 + $0xfe0] sm:$0xff]  ;;  %v1476_v38 = vld [vmem:[#allocation9 + $0xfd0] sm:$0xff] }
 0x2b8   :  { %4244 = vmatprep.subr.bf16.mxu1 %v4243_v41  ;;  %v1487_v41 = vld [vmem:[#allocation9 + $0x1028] sm:$0xff]  ;;  %v3749_v46 = vpack.c.bf16 %v1478_v37, %v1474_v36  ;;  %v4261_v29 = vpack.c.bf16 %v1480_v40, %v1476_v38  ;;  %v1517_v38 = vld [vmem:[#allocation9 + $0x1118] sm:$0xff]  ;;  %v1534_v16 = vld [vmem:[#allocation9 + $0x11a0] sm:$0xff] }
 0x2b9   :  { %v3751_v47 = vpack.c.bf16 %v1487_v41, %v1483_v53  ;;  %v1515_v36 = vld [vmem:[#allocation9 + $0x1108] sm:$0xff] }
 0x2ba   :  { %3734 = vmatpush1.bf16.msra.mxu0 %v3733_v48  ;;  %v1482_v48 = vld [vmem:[#allocation9 + $0x1000] sm:$0xff]  ;;  %v1519_v37 = vld [vmem:[#allocation9 + $0x1128] sm:$0xff] }
 0x2bb   :  { %4246 = vmatpush1.bf16.msra.mxu1 %v4245_v6  ;;  %3736 = vmatprep.subr.bf16.mxu0 %v3735_v49  ;;  %v1486_v6 = vld [vmem:[#allocation9 + $0x1020] sm:$0xff]  ;;  %v4263_v49 = vpack.c.bf16 %v1489_v45, %v1485_v44  ;;  %v3767_v41 = vpack.c.bf16 %v1519_v37, %v1515_v36 }
 0x2bc   :  { %4248 = vmatprep.subr.bf16.mxu1 %v4247_v2  ;;  %v1495_v2 = vld [vmem:[#allocation9 + $0x1068] sm:$0xff]  ;;  %v3753_v5 = vpack.c.bf16 %v1486_v6, %v1482_v48  ;;  %v1514_v44 = vld [vmem:[#allocation9 + $0x1100] sm:$0xff] }
 0x2bd   :  { %v1518_v45 = vld [vmem:[#allocation9 + $0x1120] sm:$0xff]  ;;  %v1523_v48 = vld [vmem:[#allocation9 + $0x1148] sm:$0xff] }
 0x2be   :  { %3738 = vmatpush1.bf16.msra.mxu0 %v3737_v9  ;;  %v1494_v9 = vld [vmem:[#allocation9 + $0x1060] sm:$0xff]  ;;  %v1527_v6 = vld [vmem:[#allocation9 + $0x1168] sm:$0xff]  ;;  %v3769_v57 = vpack.c.bf16 %v1518_v45, %v1514_v44 }
 0x2bf   :  { %4250 = vmatpush1.bf16.msra.mxu1 %v4249_v10  ;;  %3740 = vmatprep.subr.bf16.mxu0 %v3739_v11  ;;  %v1492_v10 = vld [vmem:[#allocation9 + $0x1050] sm:$0xff]  ;;  %v3755_v11 = vpack.c.bf16 %v1495_v2, %v1491_v62  ;;  %v3757_v61 = vpack.c.bf16 %v1494_v9, %v1490_v8  ;;  %v3771_v2 = vpack.c.bf16 %v1527_v6, %v1523_v48  ;;  %v1531_v9 = vld [vmem:[#allocation9 + $0x1188] sm:$0xff] }
 0x2c0   :  { %4252 = vmatprep.subr.bf16.mxu1 %v4251_v14  ;;  %v4267_v14 = vpack.c.bf16 %v1497_v4, %v1493_v3  ;;  %v4269_v19 = vpack.c.bf16 %v1496_v12, %v1492_v10  ;;  %v1526_v3 = vld [vmem:[#allocation9 + $0x1160] sm:$0xff]  ;;  %v1524_v4 = vld [vmem:[#allocation9 + $0x1150] sm:$0xff]  ;;  %v1535_v10 = vld [vmem:[#allocation9 + $0x11a8] sm:$0xff] }
 0x2c1   :  { %v1528_v8 = vld [vmem:[#allocation9 + $0x1170] sm:$0xff]  ;;  %v1537_v12 = vld [vmem:[#allocation9 + $0x11b8] sm:$0xff]  ;;  %v1555_v44 = vld [vmem:[#allocation9 + $0x1248] sm:$0xff] }
 0x2c2   :  { %3742 = vmatpush1.bf16.msra.mxu0 %v3741_v22  ;;  %v1498_v22 = vld [vmem:[#allocation9 + $0x1080] sm:$0xff]  ;;  %v4285_v60 = vpack.c.bf16 %v1528_v8, %v1524_v4  ;;  %v1559_v45 = vld [vmem:[#allocation9 + $0x1268] sm:$0xff]  ;;  %v1565_v4 = vld [vmem:[#allocation9 + $0x1298] sm:$0xff] }
 0x2c3   :  { %4254 = vmatpush1.bf16.msra.mxu1 %v4253_v23  ;;  %3744 = vmatprep.subr.bf16.mxu0 %v3743_v24  ;;  %v1502_v23 = vld [vmem:[#allocation9 + $0x10a0] sm:$0xff]  ;;  %v1500_v24 = vld [vmem:[#allocation9 + $0x1090] sm:$0xff]  ;;  %v3787_v6 = vpack.c.bf16 %v1559_v45, %v1555_v44 }
 0x2c4   :  { %4256 = vmatprep.subr.bf16.mxu1 %v4255_v32  ;;  %v1511_v32 = vld [vmem:[#allocation9 + $0x10e8] sm:$0xff]  ;;  %v3761_v63 = vpack.c.bf16 %v1502_v23, %v1498_v22  ;;  %v4273_v26 = vpack.c.bf16 %v1504_v27, %v1500_v24  ;;  %v1541_v24 = vld [vmem:[#allocation9 + $0x11d8] sm:$0xff]  ;;  %v3777_v27 = vpack.c.bf16 %v1534_v16, %v1530_v15 }
 0x2c5   :  { %v3763_v20 = vpack.c.bf16 %v1511_v32, %v1507_v28  ;;  %v1539_v22 = vld [vmem:[#allocation9 + $0x11c8] sm:$0xff] }
 0x2c6   :  { %3746 = vmatpush1.bf16.msra.mxu0 %v3745_v1  ;;  %v1510_v1 = vld [vmem:[#allocation9 + $0x10e0] sm:$0xff]  ;;  %v1543_v23 = vld [vmem:[#allocation9 + $0x11e8] sm:$0xff] }
 0x2c7   :  { %4258 = vmatpush1.bf16.msra.mxu1 %v4257_v0  ;;  %3748 = vmatprep.subr.bf16.mxu0 %v3747_v35  ;;  %v1508_v0 = vld [vmem:[#allocation9 + $0x10d0] sm:$0xff]  ;;  %v3765_v40 = vpack.c.bf16 %v1510_v1, %v1506_v34  ;;  %v3779_v32 = vpack.c.bf16 %v1543_v23, %v1539_v22  ;;  %v1547_v34 = vld [vmem:[#allocation9 + $0x1208] sm:$0xff] }
 0x2c8   :  { %4260 = vmatprep.subr.bf16.mxu1 %v4259_v39  ;;  %v1521_v39 = vld [vmem:[#allocation9 + $0x1138] sm:$0xff]  ;;  %v1551_v1 = vld [vmem:[#allocation9 + $0x1228] sm:$0xff] }
 0x2c9   :  { %v3783_v37 = vpack.c.bf16 %v1551_v1, %v1547_v34  ;;  %v1571_v15 = vld [vmem:[#allocation9 + $0x12c8] sm:$0xff] }
 0x2ca   :  { %3750 = vmatpush1.bf16.msra.mxu0 %v3749_v46  ;;  %v1516_v46 = vld [vmem:[#allocation9 + $0x1110] sm:$0xff]  ;;  %v1575_v16 = vld [vmem:[#allocation9 + $0x12e8] sm:$0xff] }
 0x2cb   :  { %4262 = vmatpush1.bf16.msra.mxu1 %v4261_v29  ;;  %3752 = vmatprep.subr.bf16.mxu0 %v3751_v47  ;;  %v4279_v29 = vpack.c.bf16 %v1521_v39, %v1517_v38  ;;  %v1520_v47 = vld [vmem:[#allocation9 + $0x1130] sm:$0xff]  ;;  %v1546_v38 = vld [vmem:[#allocation9 + $0x1200] sm:$0xff]  ;;  %v3795_v23 = vpack.c.bf16 %v1575_v16, %v1571_v15 }
 0x2cc   :  { %4264 = vmatprep.subr.bf16.mxu1 %v4263_v49  ;;  %v1525_v49 = vld [vmem:[#allocation9 + $0x1158] sm:$0xff]  ;;  %v4281_v62 = vpack.c.bf16 %v1520_v47, %v1516_v46  ;;  %v1550_v39 = vld [vmem:[#allocation9 + $0x1220] sm:$0xff] }
 0x2cd   :  { %2294 = vmatmul.mubr.f32.vlgmr.msra.gmra.mrb[8].mxu0 %v5133_v54  ;;  %v1557_v46 = vld [vmem:[#allocation9 + $0x1258] sm:$0xff]  ;;  %v3785_v47 = vpack.c.bf16 %v1550_v39, %v1546_v38  ;;  %v1587_v38 = vld [vmem:[#allocation9 + $0x1348] sm:$0xff] }
 0x2ce   :  { %2862 = vmatmul.mubr.f32.vlgmr.msra.gmra.mrb[8].mxu1 %v5133_v54  ;;  %3754 = vmatpush1.bf16.msra.mxu0 %v3753_v5  ;;  %v1513_v54 = vld [vmem:[#allocation9 + $0x10f8] sm:$0xff]  ;;  %v1522_v5 = vld [vmem:[#allocation9 + $0x1140] sm:$0xff]  ;;  %v1591_v39 = vld [vmem:[#allocation9 + $0x1368] sm:$0xff] }
 0x2cf   :  { %2364 = vmatprep.mubr.f32.mxu0 %v5166_v30  ;;  %4266 = vmatpush1.bf16.msra.mxu1 %v4265_v7  ;;  %v4275_v35 = vpack.c.bf16 %v1513_v54, %v1509_v33  ;;  %v4283_v7 = vpack.c.bf16 %v1529_v50, %v1525_v49  ;;  %v3773_v13 = vpack.c.bf16 %v1526_v3, %v1522_v5  ;;  %v1538_v33 = vld [vmem:[#allocation9 + $0x11c0] sm:$0xff]  ;;  %v1563_v5 = vld [vmem:[#allocation9 + $0x1288] sm:$0xff] }
 0x2d0   :  { %2932 = vmatprep.mubr.f32.mxu1 %v5166_v30  ;;  %3756 = vmatprep.subr.bf16.mxu0 %v3755_v11  ;;  %v1512_v30 = vld [vmem:[#allocation9 + $0x10f0] sm:$0xff]  ;;  %v1533_v11 = vld [vmem:[#allocation9 + $0x1198] sm:$0xff]  ;;  %v1542_v54 = vld [vmem:[#allocation9 + $0x11e0] sm:$0xff]  ;;  %v3803_v45 = vpack.c.bf16 %v1591_v39, %v1587_v38 }
 0x2d1   :  { %4268 = vmatprep.subr.bf16.mxu1 %v4267_v14  ;;  %v4277_v53 = vpack.c.bf16 %v1512_v30, %v1508_v0  ;;  %v3775_v14 = vpack.c.bf16 %v1535_v10, %v1531_v9  ;;  %v1549_v0 = vld [vmem:[#allocation9 + $0x1218] sm:$0xff]  ;;  %v3781_v30 = vpack.c.bf16 %v1542_v54, %v1538_v33  ;;  %v1554_v49 = vld [vmem:[#allocation9 + $0x1240] sm:$0xff]  ;;  %v1567_v3 = vld [vmem:[#allocation9 + $0x12a8] sm:$0xff] }
 0x2d2   :  { %3758 = vmatpush1.bf16.msra.mxu0 %v3757_v61  ;;  %v1532_v61 = vld [vmem:[#allocation9 + $0x1190] sm:$0xff]  ;;  %v1558_v50 = vld [vmem:[#allocation9 + $0x1260] sm:$0xff]  ;;  %v3791_v10 = vpack.c.bf16 %v1567_v3, %v1563_v5  ;;  %v1579_v33 = vld [vmem:[#allocation9 + $0x1308] sm:$0xff] }
 0x2d3   :  { %4270 = vmatpush1.bf16.msra.mxu1 %v4269_v19  ;;  %3760 = vmatprep.subr.bf16.mxu0 %v3759_v21  ;;  %v4287_v19 = vpack.c.bf16 %v1537_v12, %v1533_v11  ;;  %v1536_v21 = vld [vmem:[#allocation9 + $0x11b0] sm:$0xff]  ;;  %v3789_v8 = vpack.c.bf16 %v1558_v50, %v1554_v49  ;;  %v1562_v11 = vld [vmem:[#allocation9 + $0x1280] sm:$0xff]  ;;  %v1583_v54 = vld [vmem:[#allocation9 + $0x1328] sm:$0xff] }
 0x2d4   :  { %4272 = vmatprep.subr.bf16.mxu1 %v4271_v25  ;;  %v1545_v25 = vld [vmem:[#allocation9 + $0x11f8] sm:$0xff]  ;;  %v4289_v28 = vpack.c.bf16 %v1536_v21, %v1532_v61  ;;  %v1566_v12 = vld [vmem:[#allocation9 + $0x12a0] sm:$0xff]  ;;  %v3799_v1 = vpack.c.bf16 %v1583_v54, %v1579_v33  ;;  %v1595_v49 = vld [vmem:[#allocation9 + $0x1388] sm:$0xff] }
 0x2d5   :  { %v1573_v61 = vld [vmem:[#allocation9 + $0x12d8] sm:$0xff]  ;;  %v3793_v21 = vpack.c.bf16 %v1566_v12, %v1562_v11  ;;  %v1599_v50 = vld [vmem:[#allocation9 + $0x13a8] sm:$0xff]  ;;  %v1618_v39 = vld [vmem:[#allocation9 + $0x1440] sm:$0xff] }
 0x2d6   :  { %3762 = vmatpush1.bf16.msra.mxu0 %v3761_v63  ;;  %v1540_v63 = vld [vmem:[#allocation9 + $0x11d0] sm:$0xff]  ;;  %v3807_v3 = vpack.c.bf16 %v1599_v50, %v1595_v49  ;;  %v1603_v11 = vld [vmem:[#allocation9 + $0x13c8] sm:$0xff] }
 0x2d7   :  { %4274 = vmatpush1.bf16.msra.mxu1 %v4273_v26  ;;  %3764 = vmatprep.subr.bf16.mxu0 %v3763_v20  ;;  %v4291_v26 = vpack.c.bf16 %v1545_v25, %v1541_v24  ;;  %v1544_v20 = vld [vmem:[#allocation9 + $0x11f0] sm:$0xff]  ;;  %v1570_v24 = vld [vmem:[#allocation9 + $0x12c0] sm:$0xff]  ;;  %v1607_v12 = vld [vmem:[#allocation9 + $0x13e8] sm:$0xff] }
 0x2d8   :  { %4276 = vmatprep.subr.bf16.mxu1 %v4275_v35  ;;  %v1553_v35 = vld [vmem:[#allocation9 + $0x1238] sm:$0xff]  ;;  %v4293_v36 = vpack.c.bf16 %v1544_v20, %v1540_v63  ;;  %v1574_v25 = vld [vmem:[#allocation9 + $0x12e0] sm:$0xff]  ;;  %v3811_v16 = vpack.c.bf16 %v1607_v12, %v1603_v11 }
 0x2d9   :  { %v1581_v63 = vld [vmem:[#allocation9 + $0x1318] sm:$0xff]  ;;  %v3797_v20 = vpack.c.bf16 %v1574_v25, %v1570_v24  ;;  %v1611_v24 = vld [vmem:[#allocation9 + $0x1408] sm:$0xff]  ;;  %v1634_v12 = vld [vmem:[#allocation9 + $0x14c0] sm:$0xff] }
 0x2da   :  { %3766 = vmatpush1.bf16.msra.mxu0 %v3765_v40  ;;  %v1548_v40 = vld [vmem:[#allocation9 + $0x1210] sm:$0xff]  ;;  %v1615_v25 = vld [vmem:[#allocation9 + $0x1428] sm:$0xff] }
 0x2db   :  { %4278 = vmatpush1.bf16.msra.mxu1 %v4277_v53  ;;  %3768 = vmatprep.subr.bf16.mxu0 %v3767_v41  ;;  %v4295_v53 = vpack.c.bf16 %v1553_v35, %v1549_v0  ;;  %v1552_v41 = vld [vmem:[#allocation9 + $0x1230] sm:$0xff]  ;;  %v1578_v0 = vld [vmem:[#allocation9 + $0x1300] sm:$0xff]  ;;  %v3815_v54 = vpack.c.bf16 %v1615_v25, %v1611_v24 }
 0x2dc   :  { %4280 = vmatprep.subr.bf16.mxu1 %v4279_v29  ;;  %v1561_v29 = vld [vmem:[#allocation9 + $0x1278] sm:$0xff]  ;;  %v4297_v48 = vpack.c.bf16 %v1552_v41, %v1548_v40  ;;  %v1582_v35 = vld [vmem:[#allocation9 + $0x1320] sm:$0xff] }
 0x2dd   :  { %v1589_v40 = vld [vmem:[#allocation9 + $0x1358] sm:$0xff]  ;;  %v3801_v41 = vpack.c.bf16 %v1582_v35, %v1578_v0  ;;  %v1619_v0 = vld [vmem:[#allocation9 + $0x1448] sm:$0xff]  ;;  %v1642_v24 = vld [vmem:[#allocation9 + $0x1500] sm:$0xff] }
 0x2de   :  { %3770 = vmatpush1.bf16.msra.mxu0 %v3769_v57  ;;  %v1556_v57 = vld [vmem:[#allocation9 + $0x1250] sm:$0xff]  ;;  %v1623_v35 = vld [vmem:[#allocation9 + $0x1468] sm:$0xff]  ;;  %v1646_v25 = vld [vmem:[#allocation9 + $0x1520] sm:$0xff] }
 0x2df   :  { %4282 = vmatpush1.bf16.msra.mxu1 %v4281_v62  ;;  %3772 = vmatprep.subr.bf16.mxu0 %v3771_v2  ;;  %v4299_v62 = vpack.c.bf16 %v1561_v29, %v1557_v46  ;;  %v1560_v2 = vld [vmem:[#allocation9 + $0x1270] sm:$0xff]  ;;  %v1586_v46 = vld [vmem:[#allocation9 + $0x1340] sm:$0xff] }
 0x2e0   :  { %4284 = vmatprep.subr.bf16.mxu1 %v4283_v7  ;;  %v1569_v7 = vld [vmem:[#allocation9 + $0x12b8] sm:$0xff]  ;;  %v4301_v9 = vpack.c.bf16 %v1560_v2, %v1556_v57  ;;  %v1590_v29 = vld [vmem:[#allocation9 + $0x1360] sm:$0xff] }
 0x2e1   :  { %v1597_v57 = vld [vmem:[#allocation9 + $0x1398] sm:$0xff]  ;;  %v3805_v2 = vpack.c.bf16 %v1590_v29, %v1586_v46  ;;  %v1631_v46 = vld [vmem:[#allocation9 + $0x14a8] sm:$0xff] }
 0x2e2   :  { %3774 = vmatpush1.bf16.msra.mxu0 %v3773_v13  ;;  %v1564_v13 = vld [vmem:[#allocation9 + $0x1290] sm:$0xff] }
 0x2e3   :  { %4286 = vmatpush1.bf16.msra.mxu1 %v4285_v60  ;;  %3776 = vmatprep.subr.bf16.mxu0 %v3775_v14  ;;  %v4303_v60 = vpack.c.bf16 %v1569_v7, %v1565_v4  ;;  %v1568_v14 = vld [vmem:[#allocation9 + $0x12b0] sm:$0xff]  ;;  %v1594_v4 = vld [vmem:[#allocation9 + $0x1380] sm:$0xff] }
 0x2e4   :  { %4288 = vmatprep.subr.bf16.mxu1 %v4287_v19  ;;  %v1577_v19 = vld [vmem:[#allocation9 + $0x12f8] sm:$0xff]  ;;  %v4305_v22 = vpack.c.bf16 %v1568_v14, %v1564_v13  ;;  %v1598_v7 = vld [vmem:[#allocation9 + $0x13a0] sm:$0xff] }
 0x2e5   :  { %v1605_v13 = vld [vmem:[#allocation9 + $0x13d8] sm:$0xff]  ;;  %v3809_v14 = vpack.c.bf16 %v1598_v7, %v1594_v4  ;;  %v1635_v4 = vld [vmem:[#allocation9 + $0x14c8] sm:$0xff] }
 0x2e6   :  { %3778 = vmatpush1.bf16.msra.mxu0 %v3777_v27  ;;  %v1572_v27 = vld [vmem:[#allocation9 + $0x12d0] sm:$0xff]  ;;  %v1639_v7 = vld [vmem:[#allocation9 + $0x14e8] sm:$0xff] }
 0x2e7   :  { %4290 = vmatpush1.bf16.msra.mxu1 %v4289_v28  ;;  %3780 = vmatprep.subr.bf16.mxu0 %v3779_v32  ;;  %v4307_v28 = vpack.c.bf16 %v1577_v19, %v1573_v61  ;;  %v1576_v32 = vld [vmem:[#allocation9 + $0x12f0] sm:$0xff]  ;;  %v1602_v61 = vld [vmem:[#allocation9 + $0x13c0] sm:$0xff]  ;;  %v3827_v11 = vpack.c.bf16 %v1639_v7, %v1635_v4 }
 0x2e8   :  { %4292 = vmatprep.subr.bf16.mxu1 %v4291_v26  ;;  %v1585_v26 = vld [vmem:[#allocation9 + $0x1338] sm:$0xff]  ;;  %v4309_v34 = vpack.c.bf16 %v1576_v32, %v1572_v27  ;;  %v1606_v19 = vld [vmem:[#allocation9 + $0x13e0] sm:$0xff] }
 0x2e9   :  { %v1613_v27 = vld [vmem:[#allocation9 + $0x1418] sm:$0xff]  ;;  %v3813_v32 = vpack.c.bf16 %v1606_v19, %v1602_v61  ;;  %v1666_v4 = vld [vmem:[#allocation9 + $0x15c0] sm:$0xff] }
 0x2ea   :  { %3782 = vmatpush1.bf16.msra.mxu0 %v3781_v30  ;;  %v1580_v30 = vld [vmem:[#allocation9 + $0x1310] sm:$0xff]  ;;  %v1645_v61 = vld [vmem:[#allocation9 + $0x1518] sm:$0xff]  ;;  %v1670_v7 = vld [vmem:[#allocation9 + $0x15e0] sm:$0xff] }
 0x2eb   :  { %4294 = vmatpush1.bf16.msra.mxu1 %v4293_v36  ;;  %3784 = vmatprep.subr.bf16.mxu0 %v3783_v37  ;;  %v4311_v36 = vpack.c.bf16 %v1585_v26, %v1581_v63  ;;  %v1584_v37 = vld [vmem:[#allocation9 + $0x1330] sm:$0xff]  ;;  %v1610_v63 = vld [vmem:[#allocation9 + $0x1400] sm:$0xff]  ;;  %v1649_v19 = vld [vmem:[#allocation9 + $0x1538] sm:$0xff] }
 0x2ec   :  { %4296 = vmatprep.subr.bf16.mxu1 %v4295_v53  ;;  %v1593_v53 = vld [vmem:[#allocation9 + $0x1378] sm:$0xff]  ;;  %v4313_v44 = vpack.c.bf16 %v1584_v37, %v1580_v30  ;;  %v1614_v26 = vld [vmem:[#allocation9 + $0x1420] sm:$0xff] }
 0x2ed   :  { %v3817_v30 = vpack.c.bf16 %v1614_v26, %v1610_v63  ;;  %v1625_v37 = vld [vmem:[#allocation9 + $0x1478] sm:$0xff] }
 0x2ee   :  { %3786 = vmatpush1.bf16.msra.mxu0 %v3785_v47  ;;  %v1588_v47 = vld [vmem:[#allocation9 + $0x1350] sm:$0xff]  ;;  %v1653_v63 = vld [vmem:[#allocation9 + $0x1558] sm:$0xff] }
 0x2ef   :  { %4298 = vmatpush1.bf16.msra.mxu1 %v4297_v48  ;;  %3788 = vmatprep.subr.bf16.mxu0 %v3787_v6  ;;  %v4315_v48 = vpack.c.bf16 %v1593_v53, %v1589_v40  ;;  %v1592_v6 = vld [vmem:[#allocation9 + $0x1370] sm:$0xff]  ;;  %v1622_v40 = vld [vmem:[#allocation9 + $0x1460] sm:$0xff]  ;;  %v1657_v26 = vld [vmem:[#allocation9 + $0x1578] sm:$0xff] }
 0x2f0   :  { %4300 = vmatprep.subr.bf16.mxu1 %v4299_v62  ;;  %v1601_v62 = vld [vmem:[#allocation9 + $0x13b8] sm:$0xff]  ;;  %v4317_v5 = vpack.c.bf16 %v1592_v6, %v1588_v47  ;;  %v1620_v53 = vld [vmem:[#allocation9 + $0x1450] sm:$0xff]  ;;  %v3821_v6 = vpack.c.bf16 %v1622_v40, %v1618_v39  ;;  %v1663_v39 = vld [vmem:[#allocation9 + $0x15a8] sm:$0xff] }
 0x2f1   :  { %v1629_v47 = vld [vmem:[#allocation9 + $0x1498] sm:$0xff] }
 0x2f2   :  { %3790 = vmatpush1.bf16.msra.mxu0 %v3789_v8  ;;  %v1596_v8 = vld [vmem:[#allocation9 + $0x1390] sm:$0xff]  ;;  %v1661_v40 = vld [vmem:[#allocation9 + $0x1598] sm:$0xff] }
 0x2f3   :  { %4302 = vmatpush1.bf16.msra.mxu1 %v4301_v9  ;;  %3792 = vmatprep.subr.bf16.mxu0 %v3791_v10  ;;  %v4319_v9 = vpack.c.bf16 %v1601_v62, %v1597_v57  ;;  %v1600_v10 = vld [vmem:[#allocation9 + $0x13b0] sm:$0xff]  ;;  %v1626_v57 = vld [vmem:[#allocation9 + $0x1480] sm:$0xff] }
 0x2f4   :  { %4304 = vmatprep.subr.bf16.mxu1 %v4303_v60  ;;  %v1609_v60 = vld [vmem:[#allocation9 + $0x13f8] sm:$0xff]  ;;  %v4321_v15 = vpack.c.bf16 %v1600_v10, %v1596_v8  ;;  %v1630_v62 = vld [vmem:[#allocation9 + $0x14a0] sm:$0xff] }
 0x2f5   :  { %v1637_v8 = vld [vmem:[#allocation9 + $0x14d8] sm:$0xff] }
 0x2f6   :  { %3794 = vmatpush1.bf16.msra.mxu0 %v3793_v21  ;;  %v1604_v21 = vld [vmem:[#allocation9 + $0x13d0] sm:$0xff] }
 0x2f7   :  { %4306 = vmatpush1.bf16.msra.mxu1 %v4305_v22  ;;  %3796 = vmatprep.subr.bf16.mxu0 %v3795_v23  ;;  %v4323_v22 = vpack.c.bf16 %v1609_v60, %v1605_v13  ;;  %v1608_v23 = vld [vmem:[#allocation9 + $0x13f0] sm:$0xff]  ;;  %v1638_v13 = vld [vmem:[#allocation9 + $0x14e0] sm:$0xff] }
 0x2f8   :  { %4308 = vmatprep.subr.bf16.mxu1 %v4307_v28  ;;  %v1617_v28 = vld [vmem:[#allocation9 + $0x1438] sm:$0xff]  ;;  %v4325_v33 = vpack.c.bf16 %v1608_v23, %v1604_v21  ;;  %v1636_v60 = vld [vmem:[#allocation9 + $0x14d0] sm:$0xff]  ;;  %v3829_v21 = vpack.c.bf16 %v1638_v13, %v1634_v12 }
 0x2f9   :  { %v1677_v12 = vld [vmem:[#allocation9 + $0x1618] sm:$0xff] }
 0x2fa   :  { %3798 = vmatpush1.bf16.msra.mxu0 %v3797_v20  ;;  %v4327_v20 = vpack.c.bf16 %v1617_v28, %v1613_v27  ;;  %v1644_v27 = vld [vmem:[#allocation9 + $0x1510] sm:$0xff]  ;;  %v4343_v28 = vpack.c.bf16 %v1649_v19, %v1645_v61  ;;  %v1681_v13 = vld [vmem:[#allocation9 + $0x1638] sm:$0xff] }
 0x2fb   :  { %4310 = vmatpush1.bf16.msra.mxu1 %v4309_v34  ;;  %3800 = vmatprep.subr.bf16.mxu0 %v3799_v1  ;;  %v1612_v34 = vld [vmem:[#allocation9 + $0x1410] sm:$0xff]  ;;  %v4359_v19 = vpack.c.bf16 %v1681_v13, %v1677_v12 }
 0x2fc   :  { %4312 = vmatprep.subr.bf16.mxu1 %v4311_v36  ;;  %v1616_v1 = vld [vmem:[#allocation9 + $0x1430] sm:$0xff]  ;;  %v1621_v36 = vld [vmem:[#allocation9 + $0x1458] sm:$0xff] }
 0x2fd   :  { %v4329_v38 = vpack.c.bf16 %v1616_v1, %v1612_v34  ;;  %v4331_v29 = vpack.c.bf16 %v1625_v37, %v1621_v36  ;;  %v4347_v36 = vpack.c.bf16 %v1657_v26, %v1653_v63  ;;  %v1656_v37 = vld [vmem:[#allocation9 + $0x1570] sm:$0xff] }
 0x2fe   :  { %3802 = vmatpush1.bf16.msra.mxu0 %v3801_v41  ;;  %v3819_v41 = vpack.c.bf16 %v1623_v35, %v1619_v0  ;;  %v1650_v0 = vld [vmem:[#allocation9 + $0x1540] sm:$0xff]  ;;  %v1676_v61 = vld [vmem:[#allocation9 + $0x1610] sm:$0xff] }
 0x2ff   :  { %4314 = vmatpush1.bf16.msra.mxu1 %v4313_v44  ;;  %3804 = vmatprep.subr.bf16.mxu0 %v3803_v45  ;;  %v1624_v44 = vld [vmem:[#allocation9 + $0x1470] sm:$0xff]  ;;  %v1627_v45 = vld [vmem:[#allocation9 + $0x1488] sm:$0xff]  ;;  %v1654_v35 = vld [vmem:[#allocation9 + $0x1560] sm:$0xff] }
 0x300   :  { %4316 = vmatprep.subr.bf16.mxu1 %v4315_v48  ;;  %v1633_v48 = vld [vmem:[#allocation9 + $0x14b8] sm:$0xff]  ;;  %v4333_v49 = vpack.c.bf16 %v1624_v44, %v1620_v53  ;;  %v3823_v50 = vpack.c.bf16 %v1631_v46, %v1627_v45  ;;  %v1658_v46 = vld [vmem:[#allocation9 + $0x1580] sm:$0xff]  ;;  %v1684_v63 = vld [vmem:[#allocation9 + $0x1650] sm:$0xff] }
 0x301   :  { %v1665_v53 = vld [vmem:[#allocation9 + $0x15b8] sm:$0xff]  ;;  %v1708_v12 = vld [vmem:[#allocation9 + $0x1710] sm:$0xff] }
 0x302   :  { %3806 = vmatpush1.bf16.msra.mxu0 %v3805_v2  ;;  %v1628_v2 = vld [vmem:[#allocation9 + $0x1490] sm:$0xff] }
 0x303   :  { %4318 = vmatpush1.bf16.msra.mxu1 %v4317_v5  ;;  %3808 = vmatprep.subr.bf16.mxu0 %v3807_v3  ;;  %v4335_v5 = vpack.c.bf16 %v1633_v48, %v1629_v47  ;;  %v1632_v3 = vld [vmem:[#allocation9 + $0x14b0] sm:$0xff]  ;;  %v4351_v48 = vpack.c.bf16 %v1665_v53, %v1661_v40 }
 0x304   :  { %4320 = vmatprep.subr.bf16.mxu1 %v4319_v9  ;;  %v3825_v9 = vpack.c.bf16 %v1630_v62, %v1626_v57  ;;  %v4337_v10 = vpack.c.bf16 %v1632_v3, %v1628_v2  ;;  %v1660_v47 = vld [vmem:[#allocation9 + $0x1590] sm:$0xff]  ;;  %v1669_v57 = vld [vmem:[#allocation9 + $0x15d8] sm:$0xff] }
 0x305   :  { %v1673_v62 = vld [vmem:[#allocation9 + $0x15f8] sm:$0xff]  ;;  %v1692_v40 = vld [vmem:[#allocation9 + $0x1690] sm:$0xff] }
 0x306   :  { %3810 = vmatpush1.bf16.msra.mxu0 %v3809_v14 }
 0x307   :  { %4322 = vmatpush1.bf16.msra.mxu1 %v4321_v15  ;;  %3812 = vmatprep.subr.bf16.mxu0 %v3811_v16  ;;  %v1643_v15 = vld [vmem:[#allocation9 + $0x1508] sm:$0xff] }
 0x308   :  { %4324 = vmatprep.subr.bf16.mxu1 %v4323_v22  ;;  %v1647_v16 = vld [vmem:[#allocation9 + $0x1528] sm:$0xff] }
 0x309   :  { %v3831_v23 = vpack.c.bf16 %v1647_v16, %v1643_v15  ;;  %v1674_v15 = vld [vmem:[#allocation9 + $0x1600] sm:$0xff] }
 0x30a   :  { %3814 = vmatpush1.bf16.msra.mxu0 %v3813_v32  ;;  %v1648_v32 = vld [vmem:[#allocation9 + $0x1530] sm:$0xff]  ;;  %v1678_v16 = vld [vmem:[#allocation9 + $0x1620] sm:$0xff] }
 0x30b   :  { %4326 = vmatpush1.bf16.msra.mxu1 %v4325_v33  ;;  %3816 = vmatprep.subr.bf16.mxu0 %v3815_v54  ;;  %v1651_v33 = vld [vmem:[#allocation9 + $0x1548] sm:$0xff]  ;;  %v4345_v34 = vpack.c.bf16 %v1648_v32, %v1644_v27  ;;  %v3849_v27 = vpack.c.bf16 %v1678_v16, %v1674_v15  ;;  %v1717_v15 = vld [vmem:[#allocation9 + $0x1758] sm:$0xff] }
 0x30c   :  { %4328 = vmatprep.subr.bf16.mxu1 %v4327_v20  ;;  %v1655_v54 = vld [vmem:[#allocation9 + $0x1568] sm:$0xff]  ;;  %v3833_v20 = vpack.c.bf16 %v1646_v25, %v1642_v24  ;;  %v1685_v24 = vld [vmem:[#allocation9 + $0x1658] sm:$0xff] }
 0x30d   :  { %2365 = vmatmul.mubr.f32.vlgmr.msra.gmra.mrb[8].mxu0 %v5154_v17  ;;  %v3835_v1 = vpack.c.bf16 %v1655_v54, %v1651_v33  ;;  %v1689_v25 = vld [vmem:[#allocation9 + $0x1678] sm:$0xff]  ;;  %v1682_v33 = vld [vmem:[#allocation9 + $0x1640] sm:$0xff] }
 0x30e   :  { %2933 = vmatmul.mubr.f32.vlgmr.msra.gmra.mrb[8].mxu1 %v5154_v17  ;;  %3818 = vmatpush1.bf16.msra.mxu0 %v3817_v30  ;;  %v1641_v17 = vld [vmem:[#allocation9 + $0x14f8] sm:$0xff]  ;;  %v1652_v30 = vld [vmem:[#allocation9 + $0x1550] sm:$0xff]  ;;  %v1686_v54 = vld [vmem:[#allocation9 + $0x1660] sm:$0xff]  ;;  %v4363_v26 = vpack.c.bf16 %v1689_v25, %v1685_v24 }
 0x30f   :  { %2435 = vmatprep.mubr.f32.mxu0 %v5168_v31  ;;  %4330 = vmatpush1.bf16.msra.mxu1 %v4329_v38  ;;  %v4339_v14 = vpack.c.bf16 %v1641_v17, %v1637_v8  ;;  %v1659_v38 = vld [vmem:[#allocation9 + $0x1588] sm:$0xff]  ;;  %v4349_v44 = vpack.c.bf16 %v1656_v37, %v1652_v30  ;;  %v1668_v8 = vld [vmem:[#allocation9 + $0x15d0] sm:$0xff]  ;;  %v4355_v17 = vpack.c.bf16 %v1673_v62, %v1669_v57  ;;  %v1721_v16 = vld [vmem:[#allocation9 + $0x1778] sm:$0xff] }
 0x310   :  { %3003 = vmatprep.mubr.f32.mxu1 %v5168_v31  ;;  %3820 = vmatprep.subr.bf16.mxu0 %v3819_v41  ;;  %v1640_v31 = vld [vmem:[#allocation9 + $0x14f0] sm:$0xff]  ;;  %v3837_v41 = vpack.c.bf16 %v1654_v35, %v1650_v0  ;;  %v3839_v45 = vpack.c.bf16 %v1663_v39, %v1659_v38  ;;  %v1693_v0 = vld [vmem:[#allocation9 + $0x1698] sm:$0xff]  ;;  %v3853_v30 = vpack.c.bf16 %v1686_v54, %v1682_v33  ;;  %v1690_v38 = vld [vmem:[#allocation9 + $0x1680] sm:$0xff] }
 0x311   :  { %4332 = vmatprep.subr.bf16.mxu1 %v4331_v29  ;;  %v4341_v22 = vpack.c.bf16 %v1640_v31, %v1636_v60  ;;  %v1662_v29 = vld [vmem:[#allocation9 + $0x15a0] sm:$0xff]  ;;  %v3845_v60 = vpack.c.bf16 %v1670_v7, %v1666_v4  ;;  %v1697_v35 = vld [vmem:[#allocation9 + $0x16b8] sm:$0xff]  ;;  %v1700_v57 = vld [vmem:[#allocation9 + $0x16d0] sm:$0xff]  ;;  %v4379_v25 = vpack.c.bf16 %v1721_v16, %v1717_v15 }
 0x312   :  { %3822 = vmatpush1.bf16.msra.mxu0 %v3821_v6  ;;  %v1664_v6 = vld [vmem:[#allocation9 + $0x15b0] sm:$0xff]  ;;  %v3841_v2 = vpack.c.bf16 %v1662_v29, %v1658_v46  ;;  %v1694_v39 = vld [vmem:[#allocation9 + $0x16a0] sm:$0xff]  ;;  %v4367_v53 = vpack.c.bf16 %v1697_v35, %v1693_v0  ;;  %v1701_v46 = vld [vmem:[#allocation9 + $0x16d8] sm:$0xff] }
 0x313   :  { %4334 = vmatpush1.bf16.msra.mxu1 %v4333_v49  ;;  %3824 = vmatprep.subr.bf16.mxu0 %v3823_v50  ;;  %v1667_v49 = vld [vmem:[#allocation9 + $0x15c8] sm:$0xff]  ;;  %v1705_v29 = vld [vmem:[#allocation9 + $0x16f8] sm:$0xff]  ;;  %v1716_v24 = vld [vmem:[#allocation9 + $0x1750] sm:$0xff] }
 0x314   :  { %4336 = vmatprep.subr.bf16.mxu1 %v4335_v5  ;;  %v1671_v50 = vld [vmem:[#allocation9 + $0x15e8] sm:$0xff]  ;;  %v4353_v5 = vpack.c.bf16 %v1664_v6, %v1660_v47  ;;  %v3857_v47 = vpack.c.bf16 %v1694_v39, %v1690_v38  ;;  %v4371_v62 = vpack.c.bf16 %v1705_v29, %v1701_v46  ;;  %v1709_v4 = vld [vmem:[#allocation9 + $0x1718] sm:$0xff]  ;;  %v1724_v0 = vld [vmem:[#allocation9 + $0x1790] sm:$0xff] }
 0x315   :  { %v3843_v3 = vpack.c.bf16 %v1671_v50, %v1667_v49  ;;  %v1698_v49 = vld [vmem:[#allocation9 + $0x16c0] sm:$0xff]  ;;  %v1713_v7 = vld [vmem:[#allocation9 + $0x1738] sm:$0xff]  ;;  %v1732_v46 = vld [vmem:[#allocation9 + $0x17d0] sm:$0xff] }
 0x316   :  { %3826 = vmatpush1.bf16.msra.mxu0 %v3825_v9  ;;  %v1672_v9 = vld [vmem:[#allocation9 + $0x15f0] sm:$0xff]  ;;  %v1702_v50 = vld [vmem:[#allocation9 + $0x16e0] sm:$0xff]  ;;  %v4375_v13 = vpack.c.bf16 %v1713_v7, %v1709_v4  ;;  %v1725_v33 = vld [vmem:[#allocation9 + $0x1798] sm:$0xff] }
 0x317   :  { %4338 = vmatpush1.bf16.msra.mxu1 %v4337_v10  ;;  %3828 = vmatprep.subr.bf16.mxu0 %v3827_v11  ;;  %v1675_v10 = vld [vmem:[#allocation9 + $0x1608] sm:$0xff]  ;;  %v1729_v54 = vld [vmem:[#allocation9 + $0x17b8] sm:$0xff]  ;;  %v1740_v7 = vld [vmem:[#allocation9 + $0x1810] sm:$0xff] }
 0x318   :  { %4340 = vmatprep.subr.bf16.mxu1 %v4339_v14  ;;  %v1679_v11 = vld [vmem:[#allocation9 + $0x1628] sm:$0xff]  ;;  %v4357_v14 = vpack.c.bf16 %v1672_v9, %v1668_v8  ;;  %v3861_v8 = vpack.c.bf16 %v1702_v50, %v1698_v49  ;;  %v4383_v35 = vpack.c.bf16 %v1729_v54, %v1725_v33  ;;  %v1733_v38 = vld [vmem:[#allocation9 + $0x17d8] sm:$0xff]  ;;  %v1752_v16 = vld [vmem:[#allocation9 + $0x1870] sm:$0xff] }
 0x319   :  { %v3847_v31 = vpack.c.bf16 %v1679_v11, %v1675_v10  ;;  %v1706_v10 = vld [vmem:[#allocation9 + $0x1700] sm:$0xff]  ;;  %v1737_v39 = vld [vmem:[#allocation9 + $0x17f8] sm:$0xff]  ;;  %v1756_v33 = vld [vmem:[#allocation9 + $0x1890] sm:$0xff] }
 0x31a   :  { %3830 = vmatpush1.bf16.msra.mxu0 %v3829_v21  ;;  %v1680_v21 = vld [vmem:[#allocation9 + $0x1630] sm:$0xff]  ;;  %v1710_v11 = vld [vmem:[#allocation9 + $0x1720] sm:$0xff]  ;;  %v4387_v29 = vpack.c.bf16 %v1737_v39, %v1733_v38  ;;  %v1741_v49 = vld [vmem:[#allocation9 + $0x1818] sm:$0xff] }
 0x31b   :  { %4342 = vmatpush1.bf16.msra.mxu1 %v4341_v22  ;;  %3832 = vmatprep.subr.bf16.mxu0 %v3831_v23  ;;  %v1683_v22 = vld [vmem:[#allocation9 + $0x1648] sm:$0xff]  ;;  %v1745_v50 = vld [vmem:[#allocation9 + $0x1838] sm:$0xff] }
 0x31c   :  { %4344 = vmatprep.subr.bf16.mxu1 %v4343_v28  ;;  %v1687_v23 = vld [vmem:[#allocation9 + $0x1668] sm:$0xff]  ;;  %v4361_v28 = vpack.c.bf16 %v1680_v21, %v1676_v61  ;;  %v3865_v61 = vpack.c.bf16 %v1710_v11, %v1706_v10  ;;  %v4391_v4 = vpack.c.bf16 %v1745_v50, %v1741_v49  ;;  %v1749_v11 = vld [vmem:[#allocation9 + $0x1858] sm:$0xff]  ;;  %v1776_v49 = vld [vmem:[#allocation9 + $0x1930] sm:$0xff] }
 0x31d   :  { %v3851_v32 = vpack.c.bf16 %v1687_v23, %v1683_v22  ;;  %v1714_v22 = vld [vmem:[#allocation9 + $0x1740] sm:$0xff]  ;;  %v1771_v39 = vld [vmem:[#allocation9 + $0x1908] sm:$0xff] }
 0x31e   :  { %3834 = vmatpush1.bf16.msra.mxu0 %v3833_v20  ;;  %v1688_v20 = vld [vmem:[#allocation9 + $0x1670] sm:$0xff]  ;;  %v1718_v23 = vld [vmem:[#allocation9 + $0x1760] sm:$0xff]  ;;  %v1779_v50 = vld [vmem:[#allocation9 + $0x1948] sm:$0xff] }
 0x31f   :  { %4346 = vmatpush1.bf16.msra.mxu1 %v4345_v34  ;;  %3836 = vmatprep.subr.bf16.mxu0 %v3835_v1  ;;  %v1691_v34 = vld [vmem:[#allocation9 + $0x1688] sm:$0xff] }
 0x320   :  { %4348 = vmatprep.subr.bf16.mxu1 %v4347_v36  ;;  %v1695_v1 = vld [vmem:[#allocation9 + $0x16a8] sm:$0xff]  ;;  %v4365_v36 = vpack.c.bf16 %v1688_v20, %v1684_v63  ;;  %v3869_v63 = vpack.c.bf16 %v1718_v23, %v1714_v22  ;;  %v1757_v22 = vld [vmem:[#allocation9 + $0x1898] sm:$0xff] }
 0x321   :  { %v3855_v37 = vpack.c.bf16 %v1695_v1, %v1691_v34  ;;  %v1722_v34 = vld [vmem:[#allocation9 + $0x1780] sm:$0xff]  ;;  %v1761_v23 = vld [vmem:[#allocation9 + $0x18b8] sm:$0xff] }
 0x322   :  { %3838 = vmatpush1.bf16.msra.mxu0 %v3837_v41  ;;  %v1696_v41 = vld [vmem:[#allocation9 + $0x16b0] sm:$0xff]  ;;  %v1726_v1 = vld [vmem:[#allocation9 + $0x17a0] sm:$0xff]  ;;  %v4399_v54 = vpack.c.bf16 %v1761_v23, %v1757_v22  ;;  %v1795_v23 = vld [vmem:[#allocation9 + $0x19c8] sm:$0xff] }
 0x323   :  { %4350 = vmatpush1.bf16.msra.mxu1 %v4349_v44  ;;  %3840 = vmatprep.subr.bf16.mxu0 %v3839_v45  ;;  %v1699_v44 = vld [vmem:[#allocation9 + $0x16c8] sm:$0xff]  ;;  %v1792_v22 = vld [vmem:[#allocation9 + $0x19b0] sm:$0xff] }
 0x324   :  { %4352 = vmatprep.subr.bf16.mxu1 %v4351_v48  ;;  %v1703_v45 = vld [vmem:[#allocation9 + $0x16e8] sm:$0xff]  ;;  %v4369_v48 = vpack.c.bf16 %v1696_v41, %v1692_v40  ;;  %v3873_v40 = vpack.c.bf16 %v1726_v1, %v1722_v34  ;;  %v1765_v34 = vld [vmem:[#allocation9 + $0x18d8] sm:$0xff] }
 0x325   :  { %v3859_v6 = vpack.c.bf16 %v1703_v45, %v1699_v44  ;;  %v1730_v44 = vld [vmem:[#allocation9 + $0x17c0] sm:$0xff] }
 0x326   :  { %3842 = vmatpush1.bf16.msra.mxu0 %v3841_v2  ;;  %v1704_v2 = vld [vmem:[#allocation9 + $0x16f0] sm:$0xff]  ;;  %v1734_v45 = vld [vmem:[#allocation9 + $0x17e0] sm:$0xff] }
 0x327   :  { %4354 = vmatpush1.bf16.msra.mxu1 %v4353_v5  ;;  %3844 = vmatprep.subr.bf16.mxu0 %v3843_v3  ;;  %v1707_v5 = vld [vmem:[#allocation9 + $0x1708] sm:$0xff] }
 0x328   :  { %4356 = vmatprep.subr.bf16.mxu1 %v4355_v17  ;;  %v1711_v3 = vld [vmem:[#allocation9 + $0x1728] sm:$0xff]  ;;  %v4373_v17 = vpack.c.bf16 %v1704_v2, %v1700_v57  ;;  %v3877_v57 = vpack.c.bf16 %v1734_v45, %v1730_v44 }
 0x329   :  { %v3863_v9 = vpack.c.bf16 %v1711_v3, %v1707_v5  ;;  %v1738_v5 = vld [vmem:[#allocation9 + $0x1800] sm:$0xff] }
 0x32a   :  { %3846 = vmatpush1.bf16.msra.mxu0 %v3845_v60  ;;  %v1712_v60 = vld [vmem:[#allocation9 + $0x1730] sm:$0xff]  ;;  %v1742_v3 = vld [vmem:[#allocation9 + $0x1820] sm:$0xff] }
 0x32b   :  { %4358 = vmatpush1.bf16.msra.mxu1 %v4357_v14  ;;  %3848 = vmatprep.subr.bf16.mxu0 %v3847_v31  ;;  %v1715_v14 = vld [vmem:[#allocation9 + $0x1748] sm:$0xff]  ;;  %v3881_v10 = vpack.c.bf16 %v1742_v3, %v1738_v5 }
 0x32c   :  { %4360 = vmatprep.subr.bf16.mxu1 %v4359_v19  ;;  %v1719_v31 = vld [vmem:[#allocation9 + $0x1768] sm:$0xff]  ;;  %v4377_v19 = vpack.c.bf16 %v1712_v60, %v1708_v12  ;;  %v1753_v12 = vld [vmem:[#allocation9 + $0x1878] sm:$0xff]  ;;  %v1746_v60 = vld [vmem:[#allocation9 + $0x1840] sm:$0xff] }
 0x32d   :  { %v3867_v21 = vpack.c.bf16 %v1719_v31, %v1715_v14  ;;  %v1750_v14 = vld [vmem:[#allocation9 + $0x1860] sm:$0xff]  ;;  %v1748_v31 = vld [vmem:[#allocation9 + $0x1850] sm:$0xff] }
 0x32e   :  { %3850 = vmatpush1.bf16.msra.mxu0 %v3849_v27  ;;  %v1720_v27 = vld [vmem:[#allocation9 + $0x1770] sm:$0xff] }
 0x32f   :  { %4362 = vmatpush1.bf16.msra.mxu1 %v4361_v28  ;;  %3852 = vmatprep.subr.bf16.mxu0 %v3851_v32  ;;  %v1723_v28 = vld [vmem:[#allocation9 + $0x1788] sm:$0xff] }
 0x330   :  { %4364 = vmatprep.subr.bf16.mxu1 %v4363_v26  ;;  %v1727_v32 = vld [vmem:[#allocation9 + $0x17a8] sm:$0xff]  ;;  %v4381_v26 = vpack.c.bf16 %v1720_v27, %v1716_v24  ;;  %v3885_v24 = vpack.c.bf16 %v1750_v14, %v1746_v60  ;;  %v1793_v60 = vld [vmem:[#allocation9 + $0x19b8] sm:$0xff] }
 0x331   :  { %v3871_v20 = vpack.c.bf16 %v1727_v32, %v1723_v28  ;;  %v1754_v28 = vld [vmem:[#allocation9 + $0x1880] sm:$0xff] }
 0x332   :  { %3854 = vmatpush1.bf16.msra.mxu0 %v3853_v30  ;;  %v1728_v30 = vld [vmem:[#allocation9 + $0x17b0] sm:$0xff]  ;;  %v1758_v32 = vld [vmem:[#allocation9 + $0x18a0] sm:$0xff] }
 0x333   :  { %4366 = vmatpush1.bf16.msra.mxu1 %v4365_v36  ;;  %3856 = vmatprep.subr.bf16.mxu0 %v3855_v37  ;;  %v1731_v36 = vld [vmem:[#allocation9 + $0x17c8] sm:$0xff]  ;;  %v3889_v1 = vpack.c.bf16 %v1758_v32, %v1754_v28 }
 0x334   :  { %4368 = vmatprep.subr.bf16.mxu1 %v4367_v53  ;;  %v1735_v37 = vld [vmem:[#allocation9 + $0x17e8] sm:$0xff]  ;;  %v4385_v53 = vpack.c.bf16 %v1728_v30, %v1724_v0  ;;  %v1762_v30 = vld [vmem:[#allocation9 + $0x18c0] sm:$0xff] }
 0x335   :  { %v3875_v41 = vpack.c.bf16 %v1735_v37, %v1731_v36  ;;  %v1766_v36 = vld [vmem:[#allocation9 + $0x18e0] sm:$0xff]  ;;  %v1764_v37 = vld [vmem:[#allocation9 + $0x18d0] sm:$0xff] }
 0x336   :  { %3858 = vmatpush1.bf16.msra.mxu0 %v3857_v47  ;;  %v1736_v47 = vld [vmem:[#allocation9 + $0x17f0] sm:$0xff]  ;;  %v3893_v44 = vpack.c.bf16 %v1766_v36, %v1762_v30 }
 0x337   :  { %4370 = vmatpush1.bf16.msra.mxu1 %v4369_v48  ;;  %3860 = vmatprep.subr.bf16.mxu0 %v3859_v6  ;;  %v1739_v48 = vld [vmem:[#allocation9 + $0x1808] sm:$0xff] }
 0x338   :  { %4372 = vmatprep.subr.bf16.mxu1 %v4371_v62  ;;  %v1743_v6 = vld [vmem:[#allocation9 + $0x1828] sm:$0xff]  ;;  %v4389_v62 = vpack.c.bf16 %v1736_v47, %v1732_v46  ;;  %v1774_v47 = vld [vmem:[#allocation9 + $0x1920] sm:$0xff] }
 0x339   :  { %v3879_v2 = vpack.c.bf16 %v1743_v6, %v1739_v48  ;;  %v1772_v48 = vld [vmem:[#allocation9 + $0x1910] sm:$0xff] }
 0x33a   :  { %3862 = vmatpush1.bf16.msra.mxu0 %v3861_v8  ;;  %v1744_v8 = vld [vmem:[#allocation9 + $0x1830] sm:$0xff]  ;;  %v4409_v3 = vpack.c.bf16 %v1776_v49, %v1772_v48  ;;  %v1814_v49 = vld [vmem:[#allocation9 + $0x1a60] sm:$0xff] }
 0x33b   :  { %4374 = vmatpush1.bf16.msra.mxu1 %v4373_v17  ;;  %3864 = vmatprep.subr.bf16.mxu0 %v3863_v9  ;;  %v1747_v17 = vld [vmem:[#allocation9 + $0x1848] sm:$0xff] }
 0x33c   :  { %4376 = vmatprep.subr.bf16.mxu1 %v4375_v13  ;;  %v1751_v9 = vld [vmem:[#allocation9 + $0x1868] sm:$0xff]  ;;  %v4393_v13 = vpack.c.bf16 %v1744_v8, %v1740_v7  ;;  %v1778_v7 = vld [vmem:[#allocation9 + $0x1940] sm:$0xff] }
 0x33d   :  { %v3883_v15 = vpack.c.bf16 %v1751_v9, %v1747_v17  ;;  %v1782_v8 = vld [vmem:[#allocation9 + $0x1960] sm:$0xff]  ;;  %v1780_v17 = vld [vmem:[#allocation9 + $0x1950] sm:$0xff] }
 0x33e   :  { %3866 = vmatpush1.bf16.msra.mxu0 %v3865_v61  ;;  %v1755_v61 = vld [vmem:[#allocation9 + $0x1888] sm:$0xff]  ;;  %v3901_v14 = vpack.c.bf16 %v1782_v8, %v1778_v7 }
 0x33f   :  { %4378 = vmatpush1.bf16.msra.mxu1 %v4377_v19  ;;  %3868 = vmatprep.subr.bf16.mxu0 %v3867_v21  ;;  %v1759_v19 = vld [vmem:[#allocation9 + $0x18a8] sm:$0xff]  ;;  %v4395_v21 = vpack.c.bf16 %v1753_v12, %v1749_v11 }
 0x340   :  { %4380 = vmatprep.subr.bf16.mxu1 %v4379_v25  ;;  %v4397_v25 = vpack.c.bf16 %v1752_v16, %v1748_v31  ;;  %v3887_v27 = vpack.c.bf16 %v1759_v19, %v1755_v61  ;;  %v1787_v11 = vld [vmem:[#allocation9 + $0x1988] sm:$0xff]  ;;  %v1786_v16 = vld [vmem:[#allocation9 + $0x1980] sm:$0xff]  ;;  %v1788_v19 = vld [vmem:[#allocation9 + $0x1990] sm:$0xff] }
 0x341   :  { %v1791_v12 = vld [vmem:[#allocation9 + $0x19a8] sm:$0xff]  ;;  %v1790_v61 = vld [vmem:[#allocation9 + $0x19a0] sm:$0xff]  ;;  %v4417_v32 = vpack.c.bf16 %v1792_v22, %v1788_v19 }
 0x342   :  { %3870 = vmatpush1.bf16.msra.mxu0 %v3869_v63  ;;  %v1760_v63 = vld [vmem:[#allocation9 + $0x18b0] sm:$0xff]  ;;  %v3905_v28 = vpack.c.bf16 %v1790_v61, %v1786_v16  ;;  %v1830_v22 = vld [vmem:[#allocation9 + $0x1ae0] sm:$0xff] }
 0x343   :  { %4382 = vmatpush1.bf16.msra.mxu1 %v4381_v26  ;;  %3872 = vmatprep.subr.bf16.mxu0 %v3871_v20  ;;  %v1763_v26 = vld [vmem:[#allocation9 + $0x18c8] sm:$0xff]  ;;  %v4401_v0 = vpack.c.bf16 %v1760_v63, %v1756_v33  ;;  %v1798_v63 = vld [vmem:[#allocation9 + $0x19e0] sm:$0xff] }
 0x344   :  { %4384 = vmatprep.subr.bf16.mxu1 %v4383_v35  ;;  %v1767_v20 = vld [vmem:[#allocation9 + $0x18e8] sm:$0xff] }
 0x345   :  { %v3891_v35 = vpack.c.bf16 %v1767_v20, %v1763_v26  ;;  %v1796_v26 = vld [vmem:[#allocation9 + $0x19d0] sm:$0xff] }
 0x346   :  { %3874 = vmatpush1.bf16.msra.mxu0 %v3873_v40  ;;  %v1775_v40 = vld [vmem:[#allocation9 + $0x1928] sm:$0xff] }
 0x347   :  { %4386 = vmatpush1.bf16.msra.mxu1 %v4385_v53  ;;  %3876 = vmatprep.subr.bf16.mxu0 %v3875_v41  ;;  %v1773_v53 = vld [vmem:[#allocation9 + $0x1918] sm:$0xff]  ;;  %v3895_v46 = vpack.c.bf16 %v1775_v40, %v1771_v39  ;;  %v1804_v39 = vld [vmem:[#allocation9 + $0x1a10] sm:$0xff] }
 0x348   :  { %4388 = vmatprep.subr.bf16.mxu1 %v4387_v29  ;;  %v1777_v41 = vld [vmem:[#allocation9 + $0x1938] sm:$0xff]  ;;  %v1770_v29 = vld [vmem:[#allocation9 + $0x1900] sm:$0xff] }
 0x349   :  { %v4407_v6 = vpack.c.bf16 %v1777_v41, %v1773_v53  ;;  %v3897_v5 = vpack.c.bf16 %v1774_v47, %v1770_v29  ;;  %v1808_v53 = vld [vmem:[#allocation9 + $0x1a30] sm:$0xff]  ;;  %v1811_v41 = vld [vmem:[#allocation9 + $0x1a48] sm:$0xff] }
 0x34a   :  { %3878 = vmatpush1.bf16.msra.mxu0 %v3877_v57  ;;  %v1783_v57 = vld [vmem:[#allocation9 + $0x1968] sm:$0xff]  ;;  %v4425_v47 = vpack.c.bf16 %v1808_v53, %v1804_v39  ;;  %v1846_v53 = vld [vmem:[#allocation9 + $0x1b60] sm:$0xff] }
 0x34b   :  { %4390 = vmatpush1.bf16.msra.mxu1 %v4389_v62  ;;  %3880 = vmatprep.subr.bf16.mxu0 %v3879_v2  ;;  %v1781_v62 = vld [vmem:[#allocation9 + $0x1958] sm:$0xff] }
 0x34c   :  { %4392 = vmatprep.subr.bf16.mxu1 %v4391_v4  ;;  %v1785_v2 = vld [vmem:[#allocation9 + $0x1978] sm:$0xff]  ;;  %v3899_v4 = vpack.c.bf16 %v1783_v57, %v1779_v50  ;;  %v1812_v50 = vld [vmem:[#allocation9 + $0x1a50] sm:$0xff] }
 0x34d   :  { %2436 = vmatmul.mubr.f32.vlgmr.msra.gmra.mrb[8].mxu0 %v5156_v18  ;;  %v4411_v9 = vpack.c.bf16 %v1785_v2, %v1781_v62  ;;  %v1816_v62 = vld [vmem:[#allocation9 + $0x1a70] sm:$0xff]  ;;  %v1819_v2 = vld [vmem:[#allocation9 + $0x1a88] sm:$0xff] }
 0x34e   :  { %3004 = vmatmul.mubr.f32.vlgmr.msra.gmra.mrb[8].mxu1 %v5156_v18  ;;  %3882 = vmatpush1.bf16.msra.mxu0 %v3881_v10  ;;  %v1769_v18 = vld [vmem:[#allocation9 + $0x18f8] sm:$0xff]  ;;  %v1784_v10 = vld [vmem:[#allocation9 + $0x1970] sm:$0xff]  ;;  %v4429_v8 = vpack.c.bf16 %v1816_v62, %v1812_v50  ;;  %v1854_v62 = vld [vmem:[#allocation9 + $0x1ba0] sm:$0xff] }
 0x34f   :  { %2506 = vmatprep.mubr.f32.mxu0 %v5180_v51  ;;  %4394 = vmatpush1.bf16.msra.mxu1 %v4393_v13  ;;  %v4403_v38 = vpack.c.bf16 %v1769_v18, %v1765_v34  ;;  %v1789_v13 = vld [vmem:[#allocation9 + $0x1998] sm:$0xff]  ;;  %v4413_v31 = vpack.c.bf16 %v1784_v10, %v1780_v17  ;;  %v1800_v34 = vld [vmem:[#allocation9 + $0x19f0] sm:$0xff]  ;;  %v1803_v18 = vld [vmem:[#allocation9 + $0x1a08] sm:$0xff] }
 0x350   :  { %3074 = vmatprep.mubr.f32.mxu1 %v5180_v51  ;;  %3884 = vmatprep.subr.bf16.mxu0 %v3883_v15  ;;  %v1768_v51 = vld [vmem:[#allocation9 + $0x18f0] sm:$0xff]  ;;  %v3903_v15 = vpack.c.bf16 %v1791_v12, %v1787_v11  ;;  %v4421_v36 = vpack.c.bf16 %v1800_v34, %v1796_v26  ;;  %v1822_v10 = vld [vmem:[#allocation9 + $0x1aa0] sm:$0xff] }
 0x351   :  { %4396 = vmatprep.subr.bf16.mxu1 %v4395_v21  ;;  %v4405_v45 = vpack.c.bf16 %v1768_v51, %v1764_v37  ;;  %v4415_v21 = vpack.c.bf16 %v1793_v60, %v1789_v13  ;;  %v1806_v51 = vld [vmem:[#allocation9 + $0x1a20] sm:$0xff]  ;;  %v1820_v11 = vld [vmem:[#allocation9 + $0x1a90] sm:$0xff]  ;;  %v1827_v60 = vld [vmem:[#allocation9 + $0x1ac8] sm:$0xff] }
 0x352   :  { %3886 = vmatpush1.bf16.msra.mxu0 %v3885_v24  ;;  %v1799_v24 = vld [vmem:[#allocation9 + $0x19e8] sm:$0xff]  ;;  %v1824_v13 = vld [vmem:[#allocation9 + $0x1ab0] sm:$0xff]  ;;  %v1838_v34 = vld [vmem:[#allocation9 + $0x1b20] sm:$0xff] }
 0x353   :  { %4398 = vmatpush1.bf16.msra.mxu1 %v4397_v25  ;;  %3888 = vmatprep.subr.bf16.mxu0 %v3887_v27  ;;  %v1797_v25 = vld [vmem:[#allocation9 + $0x19d8] sm:$0xff]  ;;  %v3907_v33 = vpack.c.bf16 %v1799_v24, %v1795_v23  ;;  %v4433_v61 = vpack.c.bf16 %v1824_v13, %v1820_v11  ;;  %v1828_v23 = vld [vmem:[#allocation9 + $0x1ad0] sm:$0xff]  ;;  %v1862_v13 = vld [vmem:[#allocation9 + $0x1be0] sm:$0xff] }
 0x354   :  { %4400 = vmatprep.subr.bf16.mxu1 %v4399_v54  ;;  %v1801_v27 = vld [vmem:[#allocation9 + $0x19f8] sm:$0xff]  ;;  %v1794_v54 = vld [vmem:[#allocation9 + $0x19c0] sm:$0xff] }
 0x355   :  { %v4419_v20 = vpack.c.bf16 %v1801_v27, %v1797_v25  ;;  %v3909_v30 = vpack.c.bf16 %v1798_v63, %v1794_v54  ;;  %v1832_v25 = vld [vmem:[#allocation9 + $0x1af0] sm:$0xff]  ;;  %v1835_v27 = vld [vmem:[#allocation9 + $0x1b08] sm:$0xff] }
 0x356   :  { %3890 = vmatpush1.bf16.msra.mxu0 %v3889_v1  ;;  %v1807_v1 = vld [vmem:[#allocation9 + $0x1a28] sm:$0xff]  ;;  %v4437_v63 = vpack.c.bf16 %v1832_v25, %v1828_v23  ;;  %v1870_v25 = vld [vmem:[#allocation9 + $0x1c20] sm:$0xff] }
 0x357   :  { %4402 = vmatpush1.bf16.msra.mxu1 %v4401_v0  ;;  %3892 = vmatprep.subr.bf16.mxu0 %v3891_v35  ;;  %v1805_v0 = vld [vmem:[#allocation9 + $0x1a18] sm:$0xff]  ;;  %v3911_v37 = vpack.c.bf16 %v1807_v1, %v1803_v18  ;;  %v1836_v18 = vld [vmem:[#allocation9 + $0x1b10] sm:$0xff] }
 0x358   :  { %4404 = vmatprep.subr.bf16.mxu1 %v4403_v38  ;;  %v1809_v35 = vld [vmem:[#allocation9 + $0x1a38] sm:$0xff]  ;;  %v1802_v38 = vld [vmem:[#allocation9 + $0x1a00] sm:$0xff] }
 0x359   :  { %v4423_v40 = vpack.c.bf16 %v1809_v35, %v1805_v0  ;;  %v3913_v29 = vpack.c.bf16 %v1806_v51, %v1802_v38  ;;  %v1840_v0 = vld [vmem:[#allocation9 + $0x1b30] sm:$0xff]  ;;  %v1843_v35 = vld [vmem:[#allocation9 + $0x1b48] sm:$0xff] }
 0x35a   :  { %3894 = vmatpush1.bf16.msra.mxu0 %v3893_v44  ;;  %v1815_v44 = vld [vmem:[#allocation9 + $0x1a68] sm:$0xff]  ;;  %v4441_v51 = vpack.c.bf16 %v1840_v0, %v1836_v18  ;;  %v1874_v18 = vld [vmem:[#allocation9 + $0x1c40] sm:$0xff]  ;;  %v1876_v0 = vld [vmem:[#allocation9 + $0x1c50] sm:$0xff] }
 0x35b   :  { %4406 = vmatpush1.bf16.msra.mxu1 %v4405_v45  ;;  %3896 = vmatprep.subr.bf16.mxu0 %v3895_v46  ;;  %v1813_v45 = vld [vmem:[#allocation9 + $0x1a58] sm:$0xff]  ;;  %v3915_v48 = vpack.c.bf16 %v1815_v44, %v1811_v41  ;;  %v1844_v41 = vld [vmem:[#allocation9 + $0x1b50] sm:$0xff] }
 0x35c   :  { %4408 = vmatprep.subr.bf16.mxu1 %v4407_v6  ;;  %v1817_v46 = vld [vmem:[#allocation9 + $0x1a78] sm:$0xff]  ;;  %v1810_v6 = vld [vmem:[#allocation9 + $0x1a40] sm:$0xff] }
 0x35d   :  { %v4427_v57 = vpack.c.bf16 %v1817_v46, %v1813_v45  ;;  %v3917_v7 = vpack.c.bf16 %v1814_v49, %v1810_v6  ;;  %v1848_v45 = vld [vmem:[#allocation9 + $0x1b70] sm:$0xff]  ;;  %v1851_v46 = vld [vmem:[#allocation9 + $0x1b88] sm:$0xff] }
 0x35e   :  { %3898 = vmatpush1.bf16.msra.mxu0 %v3897_v5  ;;  %v1823_v5 = vld [vmem:[#allocation9 + $0x1aa8] sm:$0xff]  ;;  %v4445_v49 = vpack.c.bf16 %v1848_v45, %v1844_v41  ;;  %v1886_v45 = vld [vmem:[#allocation9 + $0x1ca0] sm:$0xff] }
 0x35f   :  { %4410 = vmatpush1.bf16.msra.mxu1 %v4409_v3  ;;  %3900 = vmatprep.subr.bf16.mxu0 %v3899_v4  ;;  %v1821_v3 = vld [vmem:[#allocation9 + $0x1a98] sm:$0xff]  ;;  %v3919_v17 = vpack.c.bf16 %v1823_v5, %v1819_v2  ;;  %v1852_v2 = vld [vmem:[#allocation9 + $0x1b90] sm:$0xff] }
 0x360   :  { %4412 = vmatprep.subr.bf16.mxu1 %v4411_v9  ;;  %v1825_v4 = vld [vmem:[#allocation9 + $0x1ab8] sm:$0xff]  ;;  %v1818_v9 = vld [vmem:[#allocation9 + $0x1a80] sm:$0xff] }
 0x361   :  { %v4431_v12 = vpack.c.bf16 %v1825_v4, %v1821_v3  ;;  %v3921_v16 = vpack.c.bf16 %v1822_v10, %v1818_v9  ;;  %v1856_v3 = vld [vmem:[#allocation9 + $0x1bb0] sm:$0xff]  ;;  %v1859_v4 = vld [vmem:[#allocation9 + $0x1bc8] sm:$0xff] }
 0x362   :  { %3902 = vmatpush1.bf16.msra.mxu0 %v3901_v14  ;;  %v1831_v14 = vld [vmem:[#allocation9 + $0x1ae8] sm:$0xff]  ;;  %v4449_v10 = vpack.c.bf16 %v1856_v3, %v1852_v2  ;;  %v1890_v2 = vld [vmem:[#allocation9 + $0x1cc0] sm:$0xff]  ;;  %v1892_v3 = vld [vmem:[#allocation9 + $0x1cd0] sm:$0xff] }
 0x363   :  { %4414 = vmatpush1.bf16.msra.mxu1 %v4413_v31  ;;  %3904 = vmatprep.subr.bf16.mxu0 %v3903_v15  ;;  %v1829_v31 = vld [vmem:[#allocation9 + $0x1ad8] sm:$0xff]  ;;  %v3923_v19 = vpack.c.bf16 %v1831_v14, %v1827_v60  ;;  %v1860_v60 = vld [vmem:[#allocation9 + $0x1bd0] sm:$0xff] }
 0x364   :  { %4416 = vmatprep.subr.bf16.mxu1 %v4415_v21  ;;  %v1833_v15 = vld [vmem:[#allocation9 + $0x1af8] sm:$0xff]  ;;  %v1826_v21 = vld [vmem:[#allocation9 + $0x1ac0] sm:$0xff] }
 0x365   :  { %v4435_v24 = vpack.c.bf16 %v1833_v15, %v1829_v31  ;;  %v3925_v54 = vpack.c.bf16 %v1830_v22, %v1826_v21  ;;  %v1864_v31 = vld [vmem:[#allocation9 + $0x1bf0] sm:$0xff]  ;;  %v1867_v15 = vld [vmem:[#allocation9 + $0x1c08] sm:$0xff] }
 0x366   :  { %3906 = vmatpush1.bf16.msra.mxu0 %v3905_v28  ;;  %v1839_v28 = vld [vmem:[#allocation9 + $0x1b28] sm:$0xff]  ;;  %v4453_v22 = vpack.c.bf16 %v1864_v31, %v1860_v60  ;;  %v1902_v60 = vld [vmem:[#allocation9 + $0x1d20] sm:$0xff] }
 0x367   :  { %4418 = vmatpush1.bf16.msra.mxu1 %v4417_v32  ;;  %3908 = vmatprep.subr.bf16.mxu0 %v3907_v33  ;;  %v1837_v32 = vld [vmem:[#allocation9 + $0x1b18] sm:$0xff]  ;;  %v3927_v26 = vpack.c.bf16 %v1839_v28, %v1835_v27  ;;  %v1868_v28 = vld [vmem:[#allocation9 + $0x1c10] sm:$0xff] }
 0x368   :  { %4420 = vmatprep.subr.bf16.mxu1 %v4419_v20  ;;  %v1841_v33 = vld [vmem:[#allocation9 + $0x1b38] sm:$0xff]  ;;  %v1834_v20 = vld [vmem:[#allocation9 + $0x1b00] sm:$0xff] }
 0x369   :  { %v4439_v1 = vpack.c.bf16 %v1841_v33, %v1837_v32  ;;  %v3929_v38 = vpack.c.bf16 %v1838_v34, %v1834_v20  ;;  %v1872_v32 = vld [vmem:[#allocation9 + $0x1c30] sm:$0xff]  ;;  %v1875_v33 = vld [vmem:[#allocation9 + $0x1c48] sm:$0xff]  ;;  %v1881_v20 = vld [vmem:[#allocation9 + $0x1c78] sm:$0xff] }
 0x36a   :  { %3910 = vmatpush1.bf16.msra.mxu0 %v3909_v30  ;;  %v1847_v30 = vld [vmem:[#allocation9 + $0x1b68] sm:$0xff]  ;;  %v4457_v34 = vpack.c.bf16 %v1872_v32, %v1868_v28  ;;  %v1908_v28 = vld [vmem:[#allocation9 + $0x1d50] sm:$0xff] }
 0x36b   :  { %4422 = vmatpush1.bf16.msra.mxu1 %v4421_v36  ;;  %3912 = vmatprep.subr.bf16.mxu0 %v3911_v37  ;;  %v1845_v36 = vld [vmem:[#allocation9 + $0x1b58] sm:$0xff]  ;;  %v3931_v39 = vpack.c.bf16 %v1847_v30, %v1843_v35  ;;  %v1880_v30 = vld [vmem:[#allocation9 + $0x1c70] sm:$0xff] }
 0x36c   :  { %4424 = vmatprep.subr.bf16.mxu1 %v4423_v40  ;;  %v1849_v37 = vld [vmem:[#allocation9 + $0x1b78] sm:$0xff]  ;;  %v1842_v40 = vld [vmem:[#allocation9 + $0x1b40] sm:$0xff] }
 0x36d   :  { %v4443_v44 = vpack.c.bf16 %v1849_v37, %v1845_v36  ;;  %v3933_v6 = vpack.c.bf16 %v1846_v53, %v1842_v40  ;;  %v1883_v36 = vld [vmem:[#allocation9 + $0x1c88] sm:$0xff]  ;;  %v4461_v53 = vpack.c.bf16 %v1880_v30, %v1876_v0  ;;  %v1914_v0 = vld [vmem:[#allocation9 + $0x1d80] sm:$0xff]  ;;  %v1916_v30 = vld [vmem:[#allocation9 + $0x1d90] sm:$0xff] }
 0x36e   :  { %3914 = vmatpush1.bf16.msra.mxu0 %v3913_v29  ;;  %v1855_v29 = vld [vmem:[#allocation9 + $0x1ba8] sm:$0xff] }
 0x36f   :  { %4426 = vmatpush1.bf16.msra.mxu1 %v4425_v47  ;;  %3916 = vmatprep.subr.bf16.mxu0 %v3915_v48  ;;  %v1853_v47 = vld [vmem:[#allocation9 + $0x1b98] sm:$0xff]  ;;  %v3935_v50 = vpack.c.bf16 %v1855_v29, %v1851_v46  ;;  %v1887_v37 = vld [vmem:[#allocation9 + $0x1ca8] sm:$0xff]  ;;  %v1884_v46 = vld [vmem:[#allocation9 + $0x1c90] sm:$0xff] }
 0x370   :  { %4428 = vmatprep.subr.bf16.mxu1 %v4427_v57  ;;  %v1857_v48 = vld [vmem:[#allocation9 + $0x1bb8] sm:$0xff]  ;;  %v1850_v57 = vld [vmem:[#allocation9 + $0x1b80] sm:$0xff]  ;;  %v3951_v41 = vpack.c.bf16 %v1887_v37, %v1883_v36  ;;  %v1920_v37 = vld [vmem:[#allocation9 + $0x1db0] sm:$0xff] }
 0x371   :  { %v4447_v5 = vpack.c.bf16 %v1857_v48, %v1853_v47  ;;  %v3937_v9 = vpack.c.bf16 %v1854_v62, %v1850_v57  ;;  %v1888_v47 = vld [vmem:[#allocation9 + $0x1cb0] sm:$0xff]  ;;  %v1891_v48 = vld [vmem:[#allocation9 + $0x1cc8] sm:$0xff] }
 0x372   :  { %3918 = vmatpush1.bf16.msra.mxu0 %v3917_v7  ;;  %v1863_v7 = vld [vmem:[#allocation9 + $0x1be8] sm:$0xff]  ;;  %v4465_v57 = vpack.c.bf16 %v1888_v47, %v1884_v46  ;;  %v1926_v46 = vld [vmem:[#allocation9 + $0x1de0] sm:$0xff] }
 0x373   :  { %4430 = vmatpush1.bf16.msra.mxu1 %v4429_v8  ;;  %3920 = vmatprep.subr.bf16.mxu0 %v3919_v17  ;;  %v1861_v8 = vld [vmem:[#allocation9 + $0x1bd8] sm:$0xff]  ;;  %v3939_v11 = vpack.c.bf16 %v1863_v7, %v1859_v4  ;;  %v1899_v7 = vld [vmem:[#allocation9 + $0x1d08] sm:$0xff] }
 0x374   :  { %4432 = vmatprep.subr.bf16.mxu1 %v4431_v12  ;;  %v1865_v17 = vld [vmem:[#allocation9 + $0x1bf8] sm:$0xff]  ;;  %v1858_v12 = vld [vmem:[#allocation9 + $0x1bc0] sm:$0xff] }
 0x375   :  { %v4451_v14 = vpack.c.bf16 %v1865_v17, %v1861_v8  ;;  %v3941_v21 = vpack.c.bf16 %v1862_v13, %v1858_v12  ;;  %v1903_v8 = vld [vmem:[#allocation9 + $0x1d28] sm:$0xff]  ;;  %v1901_v17 = vld [vmem:[#allocation9 + $0x1d18] sm:$0xff]  ;;  %v1898_v13 = vld [vmem:[#allocation9 + $0x1d00] sm:$0xff] }
 0x376   :  { %3922 = vmatpush1.bf16.msra.mxu0 %v3921_v16  ;;  %v1871_v16 = vld [vmem:[#allocation9 + $0x1c28] sm:$0xff]  ;;  %v3959_v12 = vpack.c.bf16 %v1903_v8, %v1899_v7  ;;  %v1936_v7 = vld [vmem:[#allocation9 + $0x1e30] sm:$0xff] }
 0x377   :  { %4434 = vmatpush1.bf16.msra.mxu1 %v4433_v61  ;;  %3924 = vmatprep.subr.bf16.mxu0 %v3923_v19  ;;  %v1869_v61 = vld [vmem:[#allocation9 + $0x1c18] sm:$0xff]  ;;  %v3943_v23 = vpack.c.bf16 %v1871_v16, %v1867_v15  ;;  %v1904_v15 = vld [vmem:[#allocation9 + $0x1d30] sm:$0xff]  ;;  %v1907_v16 = vld [vmem:[#allocation9 + $0x1d48] sm:$0xff] }
 0x378   :  { %4436 = vmatprep.subr.bf16.mxu1 %v4435_v24  ;;  %v1873_v19 = vld [vmem:[#allocation9 + $0x1c38] sm:$0xff]  ;;  %v1866_v24 = vld [vmem:[#allocation9 + $0x1c00] sm:$0xff]  ;;  %v1939_v8 = vld [vmem:[#allocation9 + $0x1e48] sm:$0xff] }
 0x379   :  { %v4455_v27 = vpack.c.bf16 %v1873_v19, %v1869_v61  ;;  %v1911_v61 = vld [vmem:[#allocation9 + $0x1d68] sm:$0xff]  ;;  %v1909_v19 = vld [vmem:[#allocation9 + $0x1d58] sm:$0xff] }
 0x37a   :  { %3926 = vmatpush1.bf16.msra.mxu0 %v3925_v54  ;;  %v1879_v54 = vld [vmem:[#allocation9 + $0x1c68] sm:$0xff] }
 0x37b   :  { %4438 = vmatpush1.bf16.msra.mxu1 %v4437_v63  ;;  %3928 = vmatprep.subr.bf16.mxu0 %v3927_v26  ;;  %v3945_v63 = vpack.c.bf16 %v1870_v25, %v1866_v24  ;;  %v1877_v26 = vld [vmem:[#allocation9 + $0x1c58] sm:$0xff]  ;;  %v3947_v35 = vpack.c.bf16 %v1879_v54, %v1875_v33  ;;  %v3963_v24 = vpack.c.bf16 %v1911_v61, %v1907_v16  ;;  %v1906_v25 = vld [vmem:[#allocation9 + $0x1d40] sm:$0xff]  ;;  %v1912_v33 = vld [vmem:[#allocation9 + $0x1d70] sm:$0xff] }
 0x37c   :  { %4440 = vmatprep.subr.bf16.mxu1 %v4439_v1  ;;  %v1878_v1 = vld [vmem:[#allocation9 + $0x1c60] sm:$0xff]  ;;  %v1915_v54 = vld [vmem:[#allocation9 + $0x1d88] sm:$0xff]  ;;  %v1944_v16 = vld [vmem:[#allocation9 + $0x1e70] sm:$0xff] }
 0x37d   :  { %v3949_v40 = vpack.c.bf16 %v1878_v1, %v1874_v18  ;;  %v4477_v18 = vpack.c.bf16 %v1912_v33, %v1908_v28  ;;  %v1947_v61 = vld [vmem:[#allocation9 + $0x1e88] sm:$0xff]  ;;  %v1950_v28 = vld [vmem:[#allocation9 + $0x1ea0] sm:$0xff] }
 0x37e   :  { %3930 = vmatpush1.bf16.msra.mxu0 %v3929_v38  ;;  %v4459_v38 = vpack.c.bf16 %v1881_v20, %v1877_v26  ;;  %v1917_v26 = vld [vmem:[#allocation9 + $0x1d98] sm:$0xff] }
 0x37f   :  { %4442 = vmatpush1.bf16.msra.mxu1 %v4441_v51  ;;  %3932 = vmatprep.subr.bf16.mxu0 %v3931_v39  ;;  %v1885_v51 = vld [vmem:[#allocation9 + $0x1c98] sm:$0xff] }
 0x380   :  { %4444 = vmatprep.subr.bf16.mxu1 %v4443_v44  ;;  %v1889_v39 = vld [vmem:[#allocation9 + $0x1cb8] sm:$0xff]  ;;  %v1882_v44 = vld [vmem:[#allocation9 + $0x1c80] sm:$0xff] }
 0x381   :  { %v4463_v29 = vpack.c.bf16 %v1889_v39, %v1885_v51  ;;  %v1921_v20 = vld [vmem:[#allocation9 + $0x1db8] sm:$0xff]  ;;  %v1927_v51 = vld [vmem:[#allocation9 + $0x1de8] sm:$0xff] }
 0x382   :  { %3934 = vmatpush1.bf16.msra.mxu0 %v3933_v6  ;;  %v1895_v6 = vld [vmem:[#allocation9 + $0x1ce8] sm:$0xff]  ;;  %v4479_v36 = vpack.c.bf16 %v1921_v20, %v1917_v26  ;;  %v1925_v39 = vld [vmem:[#allocation9 + $0x1dd8] sm:$0xff] }
 0x383   :  { %4446 = vmatpush1.bf16.msra.mxu1 %v4445_v49  ;;  %3936 = vmatprep.subr.bf16.mxu0 %v3935_v50  ;;  %v1893_v49 = vld [vmem:[#allocation9 + $0x1cd8] sm:$0xff]  ;;  %v3953_v50 = vpack.c.bf16 %v1886_v45, %v1882_v44  ;;  %v3955_v62 = vpack.c.bf16 %v1895_v6, %v1891_v48  ;;  %v1922_v45 = vld [vmem:[#allocation9 + $0x1dc0] sm:$0xff]  ;;  %v1928_v48 = vld [vmem:[#allocation9 + $0x1df0] sm:$0xff] }
 0x384   :  { %4448 = vmatprep.subr.bf16.mxu1 %v4447_v5  ;;  %v1894_v5 = vld [vmem:[#allocation9 + $0x1ce0] sm:$0xff]  ;;  %v1931_v6 = vld [vmem:[#allocation9 + $0x1e08] sm:$0xff]  ;;  %v1957_v20 = vld [vmem:[#allocation9 + $0x1ed8] sm:$0xff] }
 0x385   :  { %v1959_v26 = vld [vmem:[#allocation9 + $0x1ee8] sm:$0xff] }
 0x386   :  { %3938 = vmatpush1.bf16.msra.mxu0 %v3937_v9  ;;  %v1905_v9 = vld [vmem:[#allocation9 + $0x1d38] sm:$0xff] }
 0x387   :  { %4450 = vmatpush1.bf16.msra.mxu1 %v4449_v10  ;;  %3940 = vmatprep.subr.bf16.mxu0 %v3939_v11  ;;  %v3957_v10 = vpack.c.bf16 %v1894_v5, %v1890_v2  ;;  %v4471_v31 = vpack.c.bf16 %v1905_v9, %v1901_v17  ;;  %v1930_v5 = vld [vmem:[#allocation9 + $0x1e00] sm:$0xff]  ;;  %v1943_v17 = vld [vmem:[#allocation9 + $0x1e68] sm:$0xff]  ;;  %v1941_v9 = vld [vmem:[#allocation9 + $0x1e58] sm:$0xff] }
 0x388   :  { %4452 = vmatprep.subr.bf16.mxu1 %v4451_v14  ;;  %v1900_v14 = vld [vmem:[#allocation9 + $0x1d10] sm:$0xff] }
 0x38a   :  { %3942 = vmatpush1.bf16.msra.mxu0 %v3941_v21  ;;  %v1913_v21 = vld [vmem:[#allocation9 + $0x1d78] sm:$0xff] }
 0x38b   :  { %4454 = vmatpush1.bf16.msra.mxu1 %v4453_v22  ;;  %3944 = vmatprep.subr.bf16.mxu0 %v3943_v23  ;;  %v3961_v22 = vpack.c.bf16 %v1902_v60, %v1898_v13  ;;  %v4473_v23 = vpack.c.bf16 %v1904_v15, %v1900_v14  ;;  %v4475_v32 = vpack.c.bf16 %v1913_v21, %v1909_v19  ;;  %v1938_v60 = vld [vmem:[#allocation9 + $0x1e40] sm:$0xff]  ;;  %v1951_v19 = vld [vmem:[#allocation9 + $0x1ea8] sm:$0xff]  ;;  %v1949_v21 = vld [vmem:[#allocation9 + $0x1e98] sm:$0xff] }
 0x38c   :  { %4456 = vmatprep.subr.bf16.mxu1 %v4455_v27  ;;  %v1910_v27 = vld [vmem:[#allocation9 + $0x1d60] sm:$0xff]  ;;  %v3979_v13 = vpack.c.bf16 %v1943_v17, %v1939_v8  ;;  %v1976_v8 = vld [vmem:[#allocation9 + $0x1f70] sm:$0xff]  ;;  %v1979_v17 = vld [vmem:[#allocation9 + $0x1f88] sm:$0xff] }
 0x38d   :  { %2507 = vmatmul.mubr.f32.vlgmr.msra.gmra.mrb[8].mxu0 %v5174_v42  ;;  %v1942_v14 = vld [vmem:[#allocation9 + $0x1e60] sm:$0xff] }
 0x38e   :  { %3075 = vmatmul.mubr.f32.vlgmr.msra.gmra.mrb[8].mxu1 %v5174_v42  ;;  %3946 = vmatpush1.bf16.msra.mxu0 %v3945_v63  ;;  %v1897_v42 = vld [vmem:[#allocation9 + $0x1cf8] sm:$0xff]  ;;  %v1919_v63 = vld [vmem:[#allocation9 + $0x1da8] sm:$0xff] }
 0x38f   :  { %2577 = vmatprep.mubr.f32.mxu0 %v5182_v52  ;;  %4458 = vmatpush1.bf16.msra.mxu1 %v4457_v34  ;;  %v4467_v4 = vpack.c.bf16 %v1897_v42, %v1893_v49  ;;  %v3965_v34 = vpack.c.bf16 %v1910_v27, %v1906_v25  ;;  %v3967_v1 = vpack.c.bf16 %v1919_v63, %v1915_v54  ;;  %v1935_v49 = vld [vmem:[#allocation9 + $0x1e28] sm:$0xff]  ;;  %v1933_v42 = vld [vmem:[#allocation9 + $0x1e18] sm:$0xff]  ;;  %v1946_v27 = vld [vmem:[#allocation9 + $0x1e80] sm:$0xff] }
 0x390   :  { %3145 = vmatprep.mubr.f32.mxu1 %v5182_v52  ;;  %3948 = vmatprep.subr.bf16.mxu0 %v3947_v35  ;;  %v1896_v52 = vld [vmem:[#allocation9 + $0x1cf0] sm:$0xff]  ;;  %v1918_v35 = vld [vmem:[#allocation9 + $0x1da0] sm:$0xff]  ;;  %v3975_v2 = vpack.c.bf16 %v1935_v49, %v1931_v6  ;;  %v3983_v25 = vpack.c.bf16 %v1951_v19, %v1947_v61  ;;  %v1955_v63 = vld [vmem:[#allocation9 + $0x1ec8] sm:$0xff] }
 0x391   :  { %4460 = vmatprep.subr.bf16.mxu1 %v4459_v38  ;;  %v4469_v11 = vpack.c.bf16 %v1896_v52, %v1892_v3  ;;  %v1923_v38 = vld [vmem:[#allocation9 + $0x1dc8] sm:$0xff]  ;;  %v1934_v3 = vld [vmem:[#allocation9 + $0x1e20] sm:$0xff]  ;;  %v1952_v54 = vld [vmem:[#allocation9 + $0x1eb0] sm:$0xff] }
 0x392   :  { %3950 = vmatpush1.bf16.msra.mxu0 %v3949_v40  ;;  %v1929_v40 = vld [vmem:[#allocation9 + $0x1df8] sm:$0xff]  ;;  %v3971_v44 = vpack.c.bf16 %v1927_v51, %v1923_v38  ;;  %v1960_v38 = vld [vmem:[#allocation9 + $0x1ef0] sm:$0xff]  ;;  %v1963_v51 = vld [vmem:[#allocation9 + $0x1f08] sm:$0xff] }
 0x393   :  { %4462 = vmatpush1.bf16.msra.mxu1 %v4461_v53  ;;  %3952 = vmatprep.subr.bf16.mxu0 %v3951_v41  ;;  %v3969_v53 = vpack.c.bf16 %v1918_v35, %v1914_v0  ;;  %v4481_v41 = vpack.c.bf16 %v1920_v37, %v1916_v30  ;;  %v4483_v47 = vpack.c.bf16 %v1929_v40, %v1925_v39  ;;  %v1954_v35 = vld [vmem:[#allocation9 + $0x1ec0] sm:$0xff]  ;;  %v1967_v39 = vld [vmem:[#allocation9 + $0x1f28] sm:$0xff]  ;;  %v1965_v40 = vld [vmem:[#allocation9 + $0x1f18] sm:$0xff] }
 0x394   :  { %4464 = vmatprep.subr.bf16.mxu1 %v4463_v29  ;;  %v1924_v29 = vld [vmem:[#allocation9 + $0x1dd0] sm:$0xff]  ;;  %v3987_v0 = vpack.c.bf16 %v1959_v26, %v1955_v63  ;;  %v1958_v30 = vld [vmem:[#allocation9 + $0x1ee0] sm:$0xff]  ;;  %v1971_v49 = vld [vmem:[#allocation9 + $0x1f48] sm:$0xff] }
 0x395   :  { %v1968_v6 = vld [vmem:[#allocation9 + $0x1f30] sm:$0xff]  ;;  %v1987_v19 = vld [vmem:[#allocation9 + $0x1fc8] sm:$0xff] }
 0x396   :  { %3954 = vmatpush1.bf16.msra.mxu0 %v3953_v50  ;;  %v1937_v50 = vld [vmem:[#allocation9 + $0x1e38] sm:$0xff]  ;;  %v1984_v61 = vld [vmem:[#allocation9 + $0x1fb0] sm:$0xff]  ;;  %v3172_v26 = vld [vmem:[#allocation12 + $0x80] sm:$0xff] }
 0x397   :  { %4466 = vmatpush1.bf16.msra.mxu1 %v4465_v57  ;;  %3956 = vmatprep.subr.bf16.mxu0 %v3955_v62  ;;  %v3973_v57 = vpack.c.bf16 %v1926_v46, %v1922_v45  ;;  %v4485_v62 = vpack.c.bf16 %v1928_v48, %v1924_v29  ;;  %v4487_v52 = vpack.c.bf16 %v1937_v50, %v1933_v42  ;;  %v1962_v46 = vld [vmem:[#allocation9 + $0x1f00] sm:$0xff]  ;;  %v1975_v42 = vld [vmem:[#allocation9 + $0x1f68] sm:$0xff]  ;;  %v1973_v50 = vld [vmem:[#allocation9 + $0x1f58] sm:$0xff] }
 0x398   :  { %4468 = vmatprep.subr.bf16.mxu1 %v4467_v4  ;;  %v1932_v4 = vld [vmem:[#allocation9 + $0x1e10] sm:$0xff]  ;;  %v3991_v45 = vpack.c.bf16 %v1967_v39, %v1963_v51  ;;  %v1966_v29 = vld [vmem:[#allocation9 + $0x1f20] sm:$0xff] }
 0x399   :  { %v1992_v63 = vld [vmem:[#allocation9 + $0x1ff0] sm:$0xff] }
 0x39a   :  { %3958 = vmatpush1.bf16.msra.mxu0 %v3957_v10  ;;  %v1945_v10 = vld [vmem:[#allocation9 + $0x1e78] sm:$0xff]  ;;  %v3189_v51 = vld [vmem:[#allocation12 + $0x108] sm:$0xff] }
 0x39b   :  { %4470 = vmatpush1.bf16.msra.mxu1 %v4469_v11  ;;  %3960 = vmatprep.subr.bf16.mxu0 %v3959_v12  ;;  %v3977_v11 = vpack.c.bf16 %v1934_v3, %v1930_v5  ;;  %v4489_v12 = vpack.c.bf16 %v1936_v7, %v1932_v4  ;;  %v4491_v15 = vpack.c.bf16 %v1945_v10, %v1941_v9  ;;  %v1970_v3 = vld [vmem:[#allocation9 + $0x1f40] sm:$0xff]  ;;  %v1983_v9 = vld [vmem:[#allocation9 + $0x1fa8] sm:$0xff]  ;;  %v1981_v10 = vld [vmem:[#allocation9 + $0x1f98] sm:$0xff] }
 0x39c   :  { %4472 = vmatprep.subr.bf16.mxu1 %v4471_v31  ;;  %v1940_v31 = vld [vmem:[#allocation9 + $0x1e50] sm:$0xff]  ;;  %v3995_v5 = vpack.c.bf16 %v1975_v42, %v1971_v49  ;;  %v1974_v4 = vld [vmem:[#allocation9 + $0x1f60] sm:$0xff] }
 0x39d   :  { %v3174_v39 = vld [vmem:[#allocation12 + $0x90] sm:$0xff]  ;;  %v3191_v49 = vld [vmem:[#allocation12 + $0x118] sm:$0xff]  ;;  %v3176_v42 = vld [vmem:[#allocation12 + $0xa0] sm:$0xff] }
 0x39e   :  { %3962 = vmatpush1.bf16.msra.mxu0 %v3961_v22  ;;  %v1953_v22 = vld [vmem:[#allocation9 + $0x1eb8] sm:$0xff] }
 0x39f   :  { %4474 = vmatpush1.bf16.msra.mxu1 %v4473_v23  ;;  %3964 = vmatprep.subr.bf16.mxu0 %v3963_v24  ;;  %v3981_v23 = vpack.c.bf16 %v1942_v14, %v1938_v60  ;;  %v4493_v24 = vpack.c.bf16 %v1944_v16, %v1940_v31  ;;  %v4495_v33 = vpack.c.bf16 %v1953_v22, %v1949_v21  ;;  %v1978_v14 = vld [vmem:[#allocation9 + $0x1f80] sm:$0xff]  ;;  %v1991_v21 = vld [vmem:[#allocation9 + $0x1fe8] sm:$0xff]  ;;  %v1989_v22 = vld [vmem:[#allocation9 + $0x1fd8] sm:$0xff] }
 0x3a0   :  { %4476 = vmatprep.subr.bf16.mxu1 %v4475_v32  ;;  %v1948_v32 = vld [vmem:[#allocation9 + $0x1e90] sm:$0xff]  ;;  %v3999_v60 = vpack.c.bf16 %v1983_v9, %v1979_v17  ;;  %v1982_v31 = vld [vmem:[#allocation9 + $0x1fa0] sm:$0xff] }
 0x3a1   :  { %v3193_v17 = vld [vmem:[#allocation12 + $0x128] sm:$0xff]  ;;  %v3178_v9 = vld [vmem:[#allocation12 + $0xb0] sm:$0xff] }
 0x3a2   :  { %3966 = vmatpush1.bf16.msra.mxu0 %v3965_v34  ;;  %v1961_v34 = vld [vmem:[#allocation9 + $0x1ef8] sm:$0xff] }
 0x3a3   :  { %4478 = vmatpush1.bf16.msra.mxu1 %v4477_v18  ;;  %3968 = vmatprep.subr.bf16.mxu0 %v3967_v1  ;;  %v3985_v18 = vpack.c.bf16 %v1950_v28, %v1946_v27  ;;  %v4497_v1 = vpack.c.bf16 %v1952_v54, %v1948_v32  ;;  %v4499_v37 = vpack.c.bf16 %v1961_v34, %v1957_v20  ;;  %v1986_v28 = vld [vmem:[#allocation9 + $0x1fc0] sm:$0xff]  ;;  %v3173_v20 = vld [vmem:[#allocation12 + $0x88] sm:$0xff] }
 0x3a4   :  { %4480 = vmatprep.subr.bf16.mxu1 %v4479_v36  ;;  %v1956_v36 = vld [vmem:[#allocation9 + $0x1ed0] sm:$0xff]  ;;  %v4003_v27 = vpack.c.bf16 %v1991_v21, %v1987_v19  ;;  %v1990_v32 = vld [vmem:[#allocation9 + $0x1fe0] sm:$0xff] }
 0x3a5   :  { %v3204_v34 = vld [vmem:[#allocation12 + $0x180] sm:$0xff]  ;;  %v3181_v21 = vld [vmem:[#allocation12 + $0xc8] sm:$0xff] }
 0x3a6   :  { %3970 = vmatpush1.bf16.msra.mxu0 %v3969_v53  ;;  %v1969_v53 = vld [vmem:[#allocation9 + $0x1f38] sm:$0xff]  ;;  %v3180_v19 = vld [vmem:[#allocation12 + $0xc0] sm:$0xff] }
 0x3a7   :  { %4482 = vmatpush1.bf16.msra.mxu1 %v4481_v41  ;;  %3972 = vmatprep.subr.bf16.mxu0 %v3971_v44  ;;  %v3989_v41 = vpack.c.bf16 %v1958_v30, %v1954_v35  ;;  %v4501_v44 = vpack.c.bf16 %v1960_v38, %v1956_v36  ;;  %v4503_v48 = vpack.c.bf16 %v1969_v53, %v1965_v40  ;;  %v3156_v30 = vld [vmem:[#allocation12] sm:$0xff]  ;;  %v3157_v36 = vld [vmem:[#allocation12 + $0x8] sm:$0xff]  ;;  %v3175_v40 = vld [vmem:[#allocation12 + $0x98] sm:$0xff] }
 0x3a8   :  { %4484 = vmatprep.subr.bf16.mxu1 %v4483_v47  ;;  %v1964_v47 = vld [vmem:[#allocation9 + $0x1f10] sm:$0xff]  ;;  %v4519_v35 = vpack.c.bf16 %v3173_v20, %v3172_v26  ;;  %v3183_v20 = vld [vmem:[#allocation12 + $0xd8] sm:$0xff] }
 0x3a9   :  { %v3206_v53 = vld [vmem:[#allocation12 + $0x190] sm:$0xff] }
 0x3aa   :  { %3974 = vmatpush1.bf16.msra.mxu0 %v3973_v57  ;;  %v1977_v57 = vld [vmem:[#allocation9 + $0x1f78] sm:$0xff] }
 0x3ab   :  { %4486 = vmatpush1.bf16.msra.mxu1 %v4485_v62  ;;  %3976 = vmatprep.subr.bf16.mxu0 %v3975_v2  ;;  %v3993_v62 = vpack.c.bf16 %v1966_v29, %v1962_v46  ;;  %v4505_v2 = vpack.c.bf16 %v1968_v6, %v1964_v47  ;;  %v4507_v7 = vpack.c.bf16 %v1977_v57, %v1973_v50  ;;  %v3158_v29 = vld [vmem:[#allocation12 + $0x10] sm:$0xff]  ;;  %v3159_v47 = vld [vmem:[#allocation12 + $0x18] sm:$0xff]  ;;  %v3177_v50 = vld [vmem:[#allocation12 + $0xa8] sm:$0xff] }
 0x3ac   :  { %4488 = vmatprep.subr.bf16.mxu1 %v4487_v52  ;;  %v1972_v52 = vld [vmem:[#allocation9 + $0x1f50] sm:$0xff]  ;;  %v4523_v46 = vpack.c.bf16 %v3175_v40, %v3174_v39  ;;  %v3208_v57 = vld [vmem:[#allocation12 + $0x1a0] sm:$0xff] }
 0x3ad   :  { %v3182_v26 = vld [vmem:[#allocation12 + $0xd0] sm:$0xff]  ;;  %v3184_v39 = vld [vmem:[#allocation12 + $0xe0] sm:$0xff]  ;;  %v3185_v40 = vld [vmem:[#allocation12 + $0xe8] sm:$0xff] }
 0x3ae   :  { %3978 = vmatpush1.bf16.msra.mxu0 %v3977_v11  ;;  %v1985_v11 = vld [vmem:[#allocation9 + $0x1fb8] sm:$0xff] }
 0x3af   :  { %4490 = vmatpush1.bf16.msra.mxu1 %v4489_v12  ;;  %3980 = vmatprep.subr.bf16.mxu0 %v3979_v13  ;;  %v3997_v12 = vpack.c.bf16 %v1974_v4, %v1970_v3  ;;  %v4509_v13 = vpack.c.bf16 %v1976_v8, %v1972_v52  ;;  %v4511_v16 = vpack.c.bf16 %v1985_v11, %v1981_v10  ;;  %v3160_v4 = vld [vmem:[#allocation12 + $0x20] sm:$0xff]  ;;  %v3161_v52 = vld [vmem:[#allocation12 + $0x28] sm:$0xff]  ;;  %v3179_v10 = vld [vmem:[#allocation12 + $0xb8] sm:$0xff] }
 0x3b0   :  { %4492 = vmatprep.subr.bf16.mxu1 %v4491_v15  ;;  %v1980_v15 = vld [vmem:[#allocation9 + $0x1f90] sm:$0xff]  ;;  %v4527_v3 = vpack.c.bf16 %v3177_v50, %v3176_v42 }
 0x3b1   :  { %v3210_v11 = vld [vmem:[#allocation12 + $0x1b0] sm:$0xff]  ;;  %v3201_v42 = vld [vmem:[#allocation12 + $0x168] sm:$0xff] }
 0x3b2   :  { %3982 = vmatpush1.bf16.msra.mxu0 %v3981_v23  ;;  %v1993_v23 = vld [vmem:[#allocation9 + $0x1ff8] sm:$0xff] }
 0x3b3   :  { %4494 = vmatpush1.bf16.msra.mxu1 %v4493_v24  ;;  %3984 = vmatprep.subr.bf16.mxu0 %v3983_v25  ;;  %v4001_v24 = vpack.c.bf16 %v1982_v31, %v1978_v14  ;;  %v4513_v25 = vpack.c.bf16 %v1984_v61, %v1980_v15  ;;  %v4515_v54 = vpack.c.bf16 %v1993_v23, %v1989_v22  ;;  %v3162_v14 = vld [vmem:[#allocation12 + $0x30] sm:$0xff]  ;;  %v3163_v31 = vld [vmem:[#allocation12 + $0x38] sm:$0xff]  ;;  %v3212_v22 = vld [vmem:[#allocation12 + $0x1c0] sm:$0xff] }
 0x3b4   :  { %4496 = vmatprep.subr.bf16.mxu1 %v4495_v33  ;;  %v1988_v33 = vld [vmem:[#allocation9 + $0x1fd0] sm:$0xff]  ;;  %v3195_v61 = vld [vmem:[#allocation12 + $0x138] sm:$0xff] }
 0x3b5   :  { %v3194_v15 = vld [vmem:[#allocation12 + $0x130] sm:$0xff]  ;;  %v3213_v23 = vld [vmem:[#allocation12 + $0x1c8] sm:$0xff] }
 0x3b6   :  { %3986 = vmatpush1.bf16.msra.mxu0 %v3985_v18  ;;  %v3205_v18 = vld [vmem:[#allocation12 + $0x188] sm:$0xff] }
 0x3b7   :  { %4498 = vmatpush1.bf16.msra.mxu1 %v4497_v1  ;;  %3988 = vmatprep.subr.bf16.mxu0 %v3987_v0  ;;  %v4005_v1 = vpack.c.bf16 %v1990_v32, %v1986_v28  ;;  %v4517_v0 = vpack.c.bf16 %v1992_v63, %v1988_v33  ;;  %v4551_v38 = vpack.c.bf16 %v3205_v18, %v3204_v34  ;;  %v3164_v28 = vld [vmem:[#allocation12 + $0x40] sm:$0xff]  ;;  %v3165_v32 = vld [vmem:[#allocation12 + $0x48] sm:$0xff]  ;;  %v3214_v34 = vld [vmem:[#allocation12 + $0x1d0] sm:$0xff] }
 0x3b8   :  { %4500 = vmatprep.subr.bf16.mxu1 %v4499_v37  ;;  %v3188_v37 = vld [vmem:[#allocation12 + $0x100] sm:$0xff]  ;;  %v3197_v63 = vld [vmem:[#allocation12 + $0x148] sm:$0xff]  ;;  %v3215_v18 = vld [vmem:[#allocation12 + $0x1d8] sm:$0xff] }
 0x3b9   :  { %v3196_v33 = vld [vmem:[#allocation12 + $0x140] sm:$0xff] }
 0x3ba   :  { %3990 = vmatpush1.bf16.msra.mxu0 %v3989_v41  ;;  %v3207_v41 = vld [vmem:[#allocation12 + $0x198] sm:$0xff] }
 0x3bb   :  { %4502 = vmatpush1.bf16.msra.mxu1 %v4501_v44  ;;  %3992 = vmatprep.subr.bf16.mxu0 %v3991_v45  ;;  %v4521_v44 = vpack.c.bf16 %v3157_v36, %v3156_v30  ;;  %v4553_v45 = vpack.c.bf16 %v3189_v51, %v3188_v37  ;;  %v4555_v6 = vpack.c.bf16 %v3207_v41, %v3206_v53  ;;  %v3166_v30 = vld [vmem:[#allocation12 + $0x50] sm:$0xff]  ;;  %v3167_v36 = vld [vmem:[#allocation12 + $0x58] sm:$0xff]  ;;  %v3216_v53 = vld [vmem:[#allocation12 + $0x1e0] sm:$0xff] }
 0x3bc   :  { %4504 = vmatprep.subr.bf16.mxu1 %v4503_v48  ;;  %v3190_v48 = vld [vmem:[#allocation12 + $0x110] sm:$0xff]  ;;  %v3199_v51 = vld [vmem:[#allocation12 + $0x158] sm:$0xff]  ;;  %v3217_v41 = vld [vmem:[#allocation12 + $0x1e8] sm:$0xff] }
 0x3bd   :  { %v3198_v37 = vld [vmem:[#allocation12 + $0x150] sm:$0xff] }
 0x3be   :  { %3994 = vmatpush1.bf16.msra.mxu0 %v3993_v62  ;;  %v3209_v62 = vld [vmem:[#allocation12 + $0x1a8] sm:$0xff] }
 0x3bf   :  { %4506 = vmatpush1.bf16.msra.mxu1 %v4505_v2  ;;  %3996 = vmatprep.subr.bf16.mxu0 %v3995_v5  ;;  %v4525_v2 = vpack.c.bf16 %v3159_v47, %v3158_v29  ;;  %v4557_v5 = vpack.c.bf16 %v3191_v49, %v3190_v48  ;;  %v4559_v8 = vpack.c.bf16 %v3209_v62, %v3208_v57  ;;  %v3168_v47 = vld [vmem:[#allocation12 + $0x60] sm:$0xff]  ;;  %v3169_v48 = vld [vmem:[#allocation12 + $0x68] sm:$0xff]  ;;  %v3186_v57 = vld [vmem:[#allocation12 + $0xf0] sm:$0xff] }
 0x3c0   :  { %4508 = vmatprep.subr.bf16.mxu1 %v4507_v7  ;;  %v3192_v7 = vld [vmem:[#allocation12 + $0x120] sm:$0xff]  ;;  %v4575_v29 = vpack.c.bf16 %v3217_v41, %v3216_v53  ;;  %v4545_v49 = vpack.c.bf16 %v3169_v48, %v3168_v47  ;;  %v3187_v62 = vld [vmem:[#allocation12 + $0xf8] sm:$0xff] }
 0x3c2   :  { %3998 = vmatpush1.bf16.msra.mxu0 %v3997_v12  ;;  %v3211_v12 = vld [vmem:[#allocation12 + $0x1b8] sm:$0xff] }
 0x3c3   :  { %4510 = vmatpush1.bf16.msra.mxu1 %v4509_v13  ;;  %4000 = vmatprep.subr.bf16.mxu0 %v3999_v60  ;;  %v4529_v13 = vpack.c.bf16 %v3161_v52, %v3160_v4  ;;  %v4531_v60 = vpack.c.bf16 %v3179_v10, %v3178_v9  ;;  %v3170_v4 = vld [vmem:[#allocation12 + $0x70] sm:$0xff]  ;;  %v3171_v52 = vld [vmem:[#allocation12 + $0x78] sm:$0xff] }
 0x3c4   :  { %4512 = vmatprep.subr.bf16.mxu1 %v4511_v16  ;;  %v4563_v16 = vpack.c.bf16 %v3211_v12, %v3210_v11  ;;  %v3203_v9 = vld [vmem:[#allocation12 + $0x178] sm:$0xff] }
 0x3c5   :  { %v1994_v11 = vld [vmem:[#allocation11] sm:$0xf] }
 0x3c6   :  { %4002 = vmatpush1.bf16.msra.mxu0 %v4001_v24  ;;  %v4533_v24 = vpack.c.bf16 %v3163_v31, %v3162_v14  ;;  %v1999_v12 = vrot.slane %v1994_v11, %v5046_v55 }
 0x3c7   :  { %4514 = vmatpush1.bf16.msra.mxu1 %v4513_v25  ;;  %4004 = vmatprep.subr.bf16.mxu0 %v4003_v27  ;;  %v4565_v25 = vpack.c.bf16 %v3195_v61, %v3194_v15  ;;  %v4535_v27 = vpack.c.bf16 %v3181_v21, %v3180_v19 }
 0x3c8   :  { %4516 = vmatprep.subr.bf16.mxu1 %v4515_v54  ;;  %v4567_v54 = vpack.c.bf16 %v3213_v23, %v3212_v22 }
 0x3ca   :  { %4006 = vmatpush1.bf16.msra.mxu0 %v4005_v1  ;;  %v4537_v1 = vpack.c.bf16 %v3165_v32, %v3164_v28 }
 0x3cb   :  { %4518 = vmatpush1.bf16.msra.mxu1 %v4517_v0  ;;  %4520 = vmatprep.subr.bf16.mxu0 %v4519_v35  ;;  %v4569_v0 = vpack.c.bf16 %v3197_v63, %v3196_v33  ;;  %v4539_v35 = vpack.c.bf16 %v3183_v20, %v3182_v26 }
 0x3cc   :  { %4552 = vmatprep.subr.bf16.mxu1 %v4551_v38  ;;  %v4571_v38 = vpack.c.bf16 %v3215_v18, %v3214_v34 }
 0x3cd   :  { %2578 = vmatmul.mubr.f32.vlgmr.msra.gmra.mrb[8].mxu0 %v5176_v43 }
 0x3ce   :  { %3146 = vmatmul.mubr.f32.vlgmr.msra.gmra.mrb[8].mxu1 %v5176_v43  ;;  %4522 = vmatpush3.bf16.msra.mxu0 %v4521_v44  ;;  %v4561_v43 = vpack.c.bf16 %v3193_v17, %v3192_v7  ;;  %v4541_v44 = vpack.c.bf16 %v3167_v36, %v3166_v30  ;;  %v3202_v17 = vld [vmem:[#allocation12 + $0x170] sm:$0xff] }
 0x3cf   :  { %4554 = vmatpush3.bf16.msra.mxu1 %v4553_v45  ;;  %4524 = vmatprep.subr.bf16.mxu0 %v4523_v46  ;;  %v4573_v45 = vpack.c.bf16 %v3199_v51, %v3198_v37  ;;  %v4543_v46 = vpack.c.bf16 %v3185_v40, %v3184_v39  ;;  %v4581_v10 = vpack.c.bf16 %v3203_v9, %v3202_v17 }
 0x3d0   :  { %4556 = vmatprep.subr.bf16.mxu1 %v4555_v6  ;;  %v3200_v6 = vld [vmem:[#allocation12 + $0x160] sm:$0xff] }
 0x3d1   :  { %v4577_v50 = vpack.c.bf16 %v3201_v42, %v3200_v6 }
 0x3d2   :  { %4526 = vmatpush3.bf16.msra.mxu0 %v4525_v2  ;;  %v3218_v2 = vld [vmem:[#allocation12 + $0x1f0] sm:$0xff] }
 0x3d3   :  { %4558 = vmatpush3.bf16.msra.mxu1 %v4557_v5  ;;  %4528 = vmatprep.subr.bf16.mxu0 %v4527_v3  ;;  %v4547_v5 = vpack.c.bf16 %v3187_v62, %v3186_v57  ;;  %v3219_v3 = vld [vmem:[#allocation12 + $0x1f8] sm:$0xff] }
 0x3d4   :  { %4560 = vmatprep.subr.bf16.mxu1 %v4559_v8  ;;  %v4579_v7 = vpack.c.bf16 %v3219_v3, %v3218_v2  ;;  %v4549_v8 = vpack.c.bf16 %v3171_v52, %v3170_v4 }
 0x3d6   :  { %4530 = vmatpush3.bf16.msra.mxu0 %v4529_v13  ;;  %v2007_v13 = vrot.slane %v1994_v11, %v5049_v56 }
 0x3d7   :  { %4562 = vmatpush3.bf16.msra.mxu1 %v4561_v43  ;;  %4532 = vmatprep.subr.bf16.mxu0 %v4531_v60  ;;  %v2003_v43 = vrot.slane %v1994_v11, %v5052_v58  ;;  %v2011_v60 = vrot.slane %v1994_v11, %v5055_v59 }
 0x3d8   :  { %4564 = vmatprep.subr.bf16.mxu1 %v4563_v16 }
 0x3da   :  { %4534 = vmatpush3.bf16.msra.mxu0 %v4533_v24 }
 0x3db   :  { %4566 = vmatpush3.bf16.msra.mxu1 %v4565_v25  ;;  %4536 = vmatprep.subr.bf16.mxu0 %v4535_v27 }
 0x3dc   :  { %4568 = vmatprep.subr.bf16.mxu1 %v4567_v54 }
 0x3de   :  { %4538 = vmatpush3.bf16.msra.mxu0 %v4537_v1 }
 0x3df   :  { %4570 = vmatpush3.bf16.msra.mxu1 %v4569_v0  ;;  %4540 = vmatprep.subr.bf16.mxu0 %v4539_v35 }
 0x3e0   :  { %4572 = vmatprep.subr.bf16.mxu1 %v4571_v38 }
 0x3e2   :  { %4542 = vmatpush3.bf16.msra.mxu0 %v4541_v44 }
 0x3e3   :  { %4574 = vmatpush3.bf16.msra.mxu1 %v4573_v45  ;;  %4544 = vmatprep.subr.bf16.mxu0 %v4543_v46 }
 0x3e4   :  { %4576 = vmatprep.subr.bf16.mxu1 %v4575_v29 }
 0x3e6   :  { %4546 = vmatpush3.bf16.msra.mxu0 %v4545_v49 }
 0x3e7   :  { %4578 = vmatpush3.bf16.msra.mxu1 %v4577_v50  ;;  %4548 = vmatprep.subr.bf16.mxu0 %v4547_v5 }
 0x3e8   :  { %4580 = vmatprep.subr.bf16.mxu1 %v4579_v7 }
 0x3ea   :  { %4550 = vmatpush3.bf16.msra.mxu0 %v4549_v8 }
 0x3eb   :  { %4582 = vmatpush3.bf16.msra.mxu1 %v4581_v10 }
 0x4a0   :  { %v2579_v14 = vpop.f32.mrb[8].mxu0 }
 0x4a1   :  { %v4583_v31 = vadd.f32 %v2579_v14, %v1999_v12  ;;  %v3147_v15 = vpop.f32.mrb[8].mxu1  ;;  %v2581_v16 = vpop.f32.mrb[9].mxu0 }
 0x4a2   :  { %v4585_v61 = vadd.f32 %v3147_v15, %v2007_v13  ;;  %v4584_v19 = vadd.f32 %v2581_v16, %v2003_v43  ;;  %v3149_v21 = vpop.f32.mrb[9].mxu1 }
 0x4a3   :  { %v4586_v22 = vadd.f32 %v3149_v21, %v2011_v60  ;;  %v3152_v24 = vmax.f32 %v4583_v31, 0.0 }
 0x4a4   :  { %v3153_v23 = vmax.f32 %v4584_v19, 0.0  ;;  %v3154_v27 = vmax.f32 %v4585_v61, 0.0 }
 0x4a5   :  { %v3155_v25 = vmax.f32 %v4586_v22, 0.0 }
 0x4a6   :  { %3291 = vmatprep.mubr.f32.mxu0 %v3153_v23 }
 0x4a7   :  { %3361 = vmatprep.mubr.f32.mxu1 %v3155_v25  ;;  %3292 = vmatmul.mubr.f32.vlgmr.msra.gmra.mrb[10].mxu0 %v3152_v24 }
 0x4a8   :  { %3362 = vmatmul.mubr.f32.vlgmr.msra.gmra.mrb[10].mxu1 %v3154_v27 }
 0x4a9   :  { %4803 = shalt.err (!%p4800_p4)
}
 0x4aa   :  { %s4804_s30 = scalar_lea.hbm %s5251_s7, 512 }
 0x4ab   :  { %p4805_p5 = scmp.ne.s32.totalorder %s5251_s7, %s4804_s30  ;;  %p4808_p6 = scmp.lt.u32.totalorder %s4804_s30, %s5251_s7 }
 0x4ad   :  { %p4810_p7 = pnand %p4808_p6, %p4805_p5 }
 0x4af   :  { %4813 = shalt.err (!%p4810_p7)
}
 0x4b0   :  { %3377 = dma.vmem_to_hbm [thread:$0]  %s3375_s3, 512, %s5251_s7, [#allocation5]   ;;  %v3424_v58 = vld [vmem:[#allocation14] ss:$0 sm:$0xff] }
 0x4b1   :  { %s4862_s1 = smov [#allocation16]  }
 0x4b2   :  { %s3384_s27 = sshll.u32 %s4862_s1, 4  ;;  %s3385_s27 = int_to_ptr.vmem [resolvable:$true] %s3384_s27 }
 0x4b3   :  { %s4814_s2 = scalar_lea.vmem %s3385_s27, 32  ;;  %p4819_p9 = scmp.lt.s32.totalorder %s3385_s27, %s3385_s27 }
 0x4b4   :  { %p4815_p8 = scmp.ne.s32.totalorder %s3385_s27, %s4814_s2  ;;  %p4820_p10 = scmp.lt.s32.totalorder %s4814_s2, %s4814_s2 }
 0x4b6   :  { %p4821_p11 = por %p4820_p10, %p4819_p9 }
 0x4b8   :  { %p4822_p12 = pnand %p4821_p11, %p4815_p8 }
 0x57a   :  { %v3457_v55 = vpop.f32.mrb[10].mxu0 }
 0x57b   :  { %v3492_v56 = vpop.f32.mrb[10].mxu1  ;;  %v3458_v59 = vpop.f32.mrb[11].mxu0 }
 0x57c   :  { %v3459_v28 = vadd.f32 %v3458_v59, %v3457_v55  ;;  %v3493_v32 = vpop.f32.mrb[11].mxu1 }
 0x57d   :  { %v3494_v33 = vadd.f32 %v3493_v32, %v3492_v56 }
 0x57e   :  { %v3294_v54 = vadd.f32 %v3459_v28, %v3424_v58 }
 0x580   :  { %v3364_v63 = vadd.f32 %v3494_v33, %v3294_v54 }
 0x582   :  { %3367 = vst [vmem:[#allocation16] sm:$0x3] %v3364_v63 }
 0x583   :  { %4825 = shalt.err (!%p4822_p12)
}
 0x584   :  { %s4826_s29 = scalar_lea.hbm %s5252_s8, 32 }
 0x585   :  { %p4827_p13 = scmp.ne.s32.totalorder %s5252_s8, %s4826_s29  ;;  %p4830_p0 = scmp.lt.u32.totalorder %s4826_s29, %s5252_s8 }
 0x587   :  { %p4832_p1 = pnand %p4830_p0, %p4827_p13 }
 0x589   :  { %4835 = shalt.err (!%p4832_p1)
}
 0x58a   :  { %3387 = dma.vmem_to_hbm [thread:$0]  %s3385_s27, 32, %s5252_s8, [#allocation17]  }
 0x58b   :  { %4844 = dma.done.wait [#allocation5], 512  }
 0x58c   :  { %4845 = vsyncadd [#allocation5], 4294966784 }
 0x58d   :  { %4846 = dma.done.wait [#allocation17], 32  }
 0x58e   :  { %4847 = vsyncadd [#allocation17], 4294967264 }
 0x58f   :  { %3394 = vsyncpa [#allocation4], 1 }
 0x590   :  { %3395 = vsyncpa [#allocation7], 1 }
 0x591   :  { %3396 = vsyncpa [#allocation10], 1 }
 0x592   :  { %3397 = vsyncpa [#allocation13], 1 }
 0x593   :  { %3398 = vsyncpa [#allocation5], 1 }
 0x594   :  { %3399 = vsyncpa [#allocation17], 1 }

</bundles_post_ra>
